<compile_context>
chip_gen: v5e
topology: v5e:2x2
jax: 0.10.0
libtpu: 0.0.40
codegen_flags: <defaults>
</compile_context>

<pallas_src>
import functools
import math

import jax
import jax.numpy as jnp
from jax.experimental import pallas as pl
from jax.experimental.pallas import tpu as pltpu


_VMEM_LIMIT = 32 * 1024 * 1024   # safe on v5e/v6e and v7x's 64 MiB physical VMEM
_LN_EPS = 1e-5


# --------------------------------------------------------------------------
# small helpers
# --------------------------------------------------------------------------
def _round_up(x, m):
    return ((x + m - 1) // m) * m


def _pad2(a, rows, cols):
    r, c = a.shape
    if r == rows and c == cols:
        return a
    return jnp.pad(a, ((0, rows - r), (0, cols - c)))


# --------------------------------------------------------------------------
# tiled linear with optional fused epilogue:
#   y = x @ w + b                      (plain)
#   y = relu(x @ w + b)                (activation="relu")
#   y = LayerNorm(residual + x@w + b)  (ln=(gamma, beta), residual=...)
# --------------------------------------------------------------------------
def _linear_kernel(*refs, n_k, activation, fuse_ln, eps):
    if fuse_ln:
        x_ref, w_ref, b_ref, res_ref, g_ref, bb_ref, o_ref, *rest = refs
    else:
        x_ref, w_ref, b_ref, o_ref, *rest = refs
        res_ref = g_ref = bb_ref = None
    acc_ref = rest[0] if rest else None

    def finish(y):
        if activation == "relu":
            y = jnp.maximum(y, 0.0)
        if fuse_ln:
            y = y + res_ref[...].astype(jnp.float32)
            mu = jnp.mean(y, axis=-1, keepdims=True)
            var = jnp.mean(jnp.square(y - mu), axis=-1, keepdims=True)
            y = (y - mu) * jax.lax.rsqrt(var + eps) * g_ref[...] + bb_ref[...]
        o_ref[...] = y.astype(o_ref.dtype)

    if n_k == 1:
        # single reduction tile: no scratch, no extra VMEM->VMEM copy
        finish(jnp.dot(x_ref[...], w_ref[...],
                       preferred_element_type=jnp.float32) + b_ref[...])
    else:
        k = pl.program_id(2)

        @pl.when(k == 0)
        def _():
            acc_ref[...] = jnp.zeros_like(acc_ref)

        acc_ref[...] += jnp.dot(x_ref[...], w_ref[...],
                                preferred_element_type=jnp.float32)

        @pl.when(k == n_k - 1)
        def _():
            finish(acc_ref[...] + b_ref[...])


def pallas_linear(x, w, b, *, activation=None, ln=None, residual=None,
                  out_dtype=jnp.bfloat16, eps=_LN_EPS, tm=256, tn=256, tk=256):
    """x: (M, K) bf16, w: (K, N) bf16, b: (1, N) f32 -> (M, N) out_dtype."""
    M, K = x.shape
    Kw, N = w.shape
    assert K == Kw
    fuse_ln = ln is not None

    tm = min(tm, _round_up(M, 8))
    Mp = _round_up(M, tm)
    if N <= tn:            # full-dim block -> no 128-alignment padding needed
        tn = N
    Np = _round_up(N, tn)
    if K <= tk:
        tk = K
    Kp = _round_up(K, tk)
    n_k = Kp // tk

    if fuse_ln:
        assert Np == N == tn, "LN fusion needs the full feature dim in one tile"
        assert residual is not None

    xp = _pad2(x, Mp, Kp)
    wp = _pad2(w, Kp, Np)
    bp = _pad2(b, 1, Np)

    in_specs = [
        pl.BlockSpec((tm, tk), lambda i, j, k: (i, k)),
        pl.BlockSpec((tk, tn), lambda i, j, k: (k, j)),
        pl.BlockSpec((1, tn), lambda i, j, k: (0, j)),
    ]
    inputs = [xp, wp, bp]
    if fuse_ln:
        g, bb = ln
        in_specs += [
            pl.BlockSpec((tm, tn), lambda i, j, k: (i, j)),
            pl.BlockSpec((1, tn), lambda i, j, k: (0, j)),
            pl.BlockSpec((1, tn), lambda i, j, k: (0, j)),
        ]
        inputs += [_pad2(residual, Mp, Np), g, bb]

    kernel = functools.partial(_linear_kernel, n_k=n_k, activation=activation,
                               fuse_ln=fuse_ln, eps=eps)
    out = pl.pallas_call(
        kernel,
        out_shape=jax.ShapeDtypeStruct((Mp, Np), out_dtype),
        grid=(Mp // tm, Np // tn, n_k),
        in_specs=in_specs,
        out_specs=pl.BlockSpec((tm, tn), lambda i, j, k: (i, j)),
        scratch_shapes=([pltpu.VMEM((tm, tn), jnp.float32)] if n_k > 1 else []),
        compiler_params=pltpu.CompilerParams(
            dimension_semantics=("parallel", "parallel", "arbitrary"),
            vmem_limit_bytes=_VMEM_LIMIT,
        ),
    )(*inputs)
    if Mp != M or Np != N:
        out = out[:M, :N]
    return out


# --------------------------------------------------------------------------
# fused FFN + residual + LayerNorm:
#   out = LayerNorm(x + relu(x @ w1 + b1) @ w2 + b2)
# --------------------------------------------------------------------------
def _ffn_ln_kernel(x_ref, w1_ref, b1_ref, w2_ref, b2_ref, g_ref, bb_ref,
                   o_ref, *rest, n_f, eps):
    acc_ref = rest[0] if rest else None

    def finish(y):
        y = y + x_ref[...].astype(jnp.float32)          # residual = FFN input
        mu = jnp.mean(y, axis=-1, keepdims=True)
        var = jnp.mean(jnp.square(y - mu), axis=-1, keepdims=True)
        y = (y - mu) * jax.lax.rsqrt(var + eps) * g_ref[...] + bb_ref[...]
        o_ref[...] = y.astype(o_ref.dtype)

    def partial_out():
        h = jnp.dot(x_ref[...], w1_ref[...],
                    preferred_element_type=jnp.float32) + b1_ref[...]
        h = jnp.maximum(h, 0.0).astype(jnp.bfloat16)
        return jnp.dot(h, w2_ref[...], preferred_element_type=jnp.float32)

    if n_f == 1:
        finish(partial_out() + b2_ref[...])
    else:
        j = pl.program_id(1)

        @pl.when(j == 0)
        def _():
            acc_ref[...] = jnp.zeros_like(acc_ref)

        acc_ref[...] += partial_out()

        @pl.when(j == n_f - 1)
        def _():
            finish(acc_ref[...] + b2_ref[...])


def pallas_ffn_ln(x, p, ln, *, eps=_LN_EPS, tm=128, tf=256):
    """x: (B, S, D) bf16 -> LayerNorm(x + FFN(x)) : (B, S, D) bf16."""
    B, S, D = x.shape
    M = B * S
    F = p["w1"].shape[1]
    x2 = x.reshape(M, D)

    tm = min(tm, _round_up(M, 8))
    Mp = _round_up(M, tm)
    if F <= tf:
        tf = F
    Fp = _round_up(F, tf)
    n_f = Fp // tf

    xp = _pad2(x2, Mp, D)
    w1 = _pad2(p["w1"], D, Fp)
    b1 = _pad2(p["b1"], 1, Fp)
    w2 = _pad2(p["w2"], Fp, D)

    kernel = functools.partial(_ffn_ln_kernel, n_f=n_f, eps=eps)
    out = pl.pallas_call(
        kernel,
        out_shape=jax.ShapeDtypeStruct((Mp, D), jnp.bfloat16),
        grid=(Mp // tm, n_f),
        in_specs=[
            pl.BlockSpec((tm, D), lambda i, j: (i, 0)),
            pl.BlockSpec((D, tf), lambda i, j: (0, j)),
            pl.BlockSpec((1, tf), lambda i, j: (0, j)),
            pl.BlockSpec((tf, D), lambda i, j: (j, 0)),
            pl.BlockSpec((1, D), lambda i, j: (0, 0)),
            pl.BlockSpec((1, D), lambda i, j: (0, 0)),
            pl.BlockSpec((1, D), lambda i, j: (0, 0)),
        ],
        out_specs=pl.BlockSpec((tm, D), lambda i, j: (i, 0)),
        scratch_shapes=([pltpu.VMEM((tm, D), jnp.float32)] if n_f > 1 else []),
        compiler_params=pltpu.CompilerParams(
            dimension_semantics=("parallel", "arbitrary"),
            vmem_limit_bytes=_VMEM_LIMIT,
        ),
    )(xp, w1, b1, w2, p["b2"], ln["g"], ln["b"])
    if Mp != M:
        out = out[:M]
    return out.reshape(B, S, D)


# --------------------------------------------------------------------------
# attention kernels: batched-head contraction, in-kernel mask, lane-dense store
# --------------------------------------------------------------------------
def _attn_core(q, k, v, kvm, *, n_head, scale, causal):
    """q: (Sq, D) bf16, k/v: (Sk, D) bf16, kvm: (1, Sk) f32 (1=attend)."""
    Sq, D = q.shape
    Sk = k.shape[0]
    Dh = D // n_head

    qh = q.reshape(Sq, n_head, Dh).transpose(1, 0, 2)   # (H, Sq, Dh)
    kh = k.reshape(Sk, n_head, Dh).transpose(1, 0, 2)   # (H, Sk, Dh)
    vh = v.reshape(Sk, n_head, Dh).transpose(1, 0, 2)   # (H, Sk, Dh)

    s = jnp.einsum("hqd,hkd->hqk", qh, kh,
                   preferred_element_type=jnp.float32) * scale   # (H, Sq, Sk)

    bias = jnp.where(kvm > 0.0, 0.0, -1e9)               # (1, Sk)
    if causal:
        qi = jax.lax.broadcasted_iota(jnp.int32, (Sq, Sk), 0)
        ki = jax.lax.broadcasted_iota(jnp.int32, (Sq, Sk), 1)
        bias = jnp.where(ki <= qi, bias, -1e9)            # (Sq, Sk)
    s = s + bias                                          # broadcasts over heads

    s = s - jnp.max(s, axis=-1, keepdims=True)
    p = jnp.exp(s)
    p = p * pl.reciprocal(jnp.sum(p, axis=-1, keepdims=True), approx=True)

    o = jnp.einsum("hqk,hkd->hqd", p.astype(v.dtype), vh,
                   preferred_element_type=jnp.float32)    # (H, Sq, Dh)
    return o.transpose(1, 0, 2).reshape(Sq, D)            # one lane-dense store


def _self_attn_kernel(qkv_ref, kvm_ref, o_ref, *, n_head, scale, causal):
    qkv = qkv_ref[0]                       # (S, 3D)
    D = qkv.shape[1] // 3
    q, k, v = qkv[:, :D], qkv[:, D:2 * D], qkv[:, 2 * D:]
    o_ref[0] = _attn_core(q, k, v, kvm_ref[0], n_head=n_head, scale=scale,
                          causal=causal).astype(o_ref.dtype)


def _cross_attn_kernel(q_ref, kv_ref, kvm_ref, o_ref, *, n_head, scale):
    q = q_ref[0]                           # (Sq, D)
    kv = kv_ref[0]                         # (Sk, 2D)
    D = q.shape[1]
    k, v = kv[:, :D], kv[:, D:]
    o_ref[0] = _attn_core(q, k, v, kvm_ref[0], n_head=n_head, scale=scale,
                          causal=False).astype(o_ref.dtype)


def pallas_self_attention(qkv, kv_mask, n_head, causal):
    """qkv: (B, S, 3D) bf16, kv_mask: (B, 1, S) f32 -> (B, S, D) bf16."""
    B, S, D3 = qkv.shape
    D = D3 // 3
    scale = 1.0 / math.sqrt(D // n_head)
    kernel = functools.partial(_self_attn_kernel, n_head=n_head,
                               scale=scale, causal=causal)
    return pl.pallas_call(
        kernel,
        out_shape=jax.ShapeDtypeStruct((B, S, D), jnp.bfloat16),
        grid=(B,),
        in_specs=[
            pl.BlockSpec((1, S, D3), lambda b: (b, 0, 0)),
            pl.BlockSpec((1, 1, S), lambda b: (b, 0, 0)),
        ],
        out_specs=pl.BlockSpec((1, S, D), lambda b: (b, 0, 0)),
        compiler_params=pltpu.CompilerParams(
            dimension_semantics=("parallel",),
            vmem_limit_bytes=_VMEM_LIMIT,
        ),
    )(qkv, kv_mask)


def pallas_cross_attention(q, kv, kv_mask, n_head):
    """q: (B, Sq, D) bf16, kv: (B, Sk, 2D) bf16, kv_mask: (B,1,Sk) f32."""
    B, Sq, D = q.shape
    Sk = kv.shape[1]
    scale = 1.0 / math.sqrt(D // n_head)
    kernel = functools.partial(_cross_attn_kernel, n_head=n_head, scale=scale)
    return pl.pallas_call(
        kernel,
        out_shape=jax.ShapeDtypeStruct((B, Sq, D), jnp.bfloat16),
        grid=(B,),
        in_specs=[
            pl.BlockSpec((1, Sq, D), lambda b: (b, 0, 0)),
            pl.BlockSpec((1, Sk, 2 * D), lambda b: (b, 0, 0)),
            pl.BlockSpec((1, 1, Sk), lambda b: (b, 0, 0)),
        ],
        out_specs=pl.BlockSpec((1, Sq, D), lambda b: (b, 0, 0)),
        compiler_params=pltpu.CompilerParams(
            dimension_semantics=("parallel",),
            vmem_limit_bytes=_VMEM_LIMIT,
        ),
    )(q, kv, kv_mask)


# --------------------------------------------------------------------------
# transformer building blocks (post-LN residual, LN fused into Wo / W2 linears)
# --------------------------------------------------------------------------
def self_attention_block_ln(x, kv_mask, p, ln, n_head, causal):
    """LayerNorm(x + Wo(MHA(QKV(x))))."""
    B, S, D = x.shape
    x2 = x.reshape(B * S, D)
    qkv = pallas_linear(x2, p["wqkv"], p["bqkv"])               # (B*S, 3D) bf16
    o = pallas_self_attention(qkv.reshape(B, S, 3 * D), kv_mask, n_head, causal)
    y = pallas_linear(o.reshape(B * S, D), p["wo"], p["bo"],
                      ln=(ln["g"], ln["b"]), residual=x2)
    return y.reshape(B, S, D)


def cross_attention_block_ln(x_q, x_kv, kv_mask, p, ln, n_head):
    """LayerNorm(x_q + Wo(MHA(Q(x_q), KV(x_kv))))."""
    B, Sq, D = x_q.shape
    Sk = x_kv.shape[1]
    xq2 = x_q.reshape(B * Sq, D)
    q = pallas_linear(xq2, p["wq"], p["bq"]).reshape(B, Sq, D)
    kv = pallas_linear(x_kv.reshape(B * Sk, D), p["wkv"], p["bkv"]
                       ).reshape(B, Sk, 2 * D)
    o = pallas_cross_attention(q, kv, kv_mask, n_head)
    y = pallas_linear(o.reshape(B * Sq, D), p["wo"], p["bo"],
                      ln=(ln["g"], ln["b"]), residual=xq2)
    return y.reshape(B, Sq, D)


def encoder_layer(x, src_kv_mask, p, n_head):
    x = self_attention_block_ln(x, src_kv_mask, p["attn"], p["ln1"], n_head,
                                causal=False)
    x = pallas_ffn_ln(x, p["ffn"], p["ln2"])
    return x


def decoder_layer(y, enc, tgt_kv_mask, src_kv_mask, p, n_head):
    y = self_attention_block_ln(y, tgt_kv_mask, p["self_attn"], p["ln1"],
                                n_head, causal=True)
    y = cross_attention_block_ln(y, enc, src_kv_mask, p["cross_attn"],
                                 p["ln2"], n_head)
    y = pallas_ffn_ln(y, p["ffn"], p["ln3"])
    return y


def sinusoidal_pe(max_len, d_model):
    pos = jnp.arange(max_len, dtype=jnp.float32)[:, None]
    i = jnp.arange(0, d_model, 2, dtype=jnp.float32)
    div = jnp.power(10000.0, i / d_model)
    pe = jnp.zeros((max_len, d_model), jnp.float32)
    pe = pe.at[:, 0::2].set(jnp.sin(pos / div))
    pe = pe.at[:, 1::2].set(jnp.cos(pos / div))
    return pe


def transformer_forward(params, src, tgt, *, src_pad_idx, tgt_pad_idx, n_head):
    B, Ss = src.shape
    _, St = tgt.shape
    D = params["enc_tok_emb"].shape[1]

    # key-validity vectors (pad mask over keys); causal mask is built in-kernel.
    src_kv_mask = (src != src_pad_idx).astype(jnp.float32)[:, None, :]  # (B,1,Ss)
    tgt_kv_mask = (tgt != tgt_pad_idx).astype(jnp.float32)[:, None, :]  # (B,1,St)

    # encoder (embedding gather + PE left to XLA; hidden state is bf16)
    x = (jnp.take(params["enc_tok_emb"], src, axis=0)
         + params["pos_enc"][:Ss][None]).astype(jnp.bfloat16)
    for layer in params["enc_layers"]:
        x = encoder_layer(x, src_kv_mask, layer, n_head)
    enc = x

    # decoder
    y = (jnp.take(params["dec_tok_emb"], tgt, axis=0)
         + params["pos_enc"][:St][None]).astype(jnp.bfloat16)
    for layer in params["dec_layers"]:
        y = decoder_layer(y, enc, tgt_kv_mask, src_kv_mask, layer, n_head)

    logits = pallas_linear(y.reshape(B * St, D), params["out_w"],
                           params["out_b"], out_dtype=jnp.float32)
    return logits.reshape(B, St, -1)


# --------------------------------------------------------------------------
# deterministic parameter init (weights pre-cast to bf16, biases pre-shaped)
# --------------------------------------------------------------------------
class KeyGen:
    def __init__(self, key):
        self.key = key

    def __call__(self):
        self.key, sub = jax.random.split(self.key)
        return sub


def init_params(key, src_vocab, tgt_vocab, d_model, n_layer, d_ff, max_seq_len):
    kg = KeyGen(key)

    def dense(din, dout):
        w = (jax.random.normal(kg(), (din, dout), jnp.float32) * 0.02
             ).astype(jnp.bfloat16)
        b = jnp.zeros((1, dout), jnp.float32)
        return w, b

    def self_mha_params():
        wqkv, bqkv = dense(d_model, 3 * d_model)    # fused Q/K/V projection
        wo, bo = dense(d_model, d_model)
        return {"wqkv": wqkv, "bqkv": bqkv, "wo": wo, "bo": bo}

    def cross_mha_params():
        wq, bq = dense(d_model, d_model)
        wkv, bkv = dense(d_model, 2 * d_model)      # fused K/V projection
        wo, bo = dense(d_model, d_model)
        return {"wq": wq, "bq": bq, "wkv": wkv, "bkv": bkv, "wo": wo, "bo": bo}

    def ln_params():
        return {"g": jnp.ones((1, d_model), jnp.float32),
                "b": jnp.zeros((1, d_model), jnp.float32)}

    def ffn_params():
        w1, b1 = dense(d_model, d_ff)
        w2, b2 = dense(d_ff, d_model)
        return {"w1": w1, "b1": b1, "w2": w2, "b2": b2}

    enc_layers = [{"attn": self_mha_params(), "ln1": ln_params(),
                   "ffn": ffn_params(), "ln2": ln_params()}
                  for _ in range(n_layer)]
    dec_layers = [{"self_attn": self_mha_params(), "ln1": ln_params(),
                   "cross_attn": cross_mha_params(), "ln2": ln_params(),
                   "ffn": ffn_params(), "ln3": ln_params()}
                  for _ in range(n_layer)]
    out_w, out_b = dense(d_model, tgt_vocab)
    return {
        "enc_tok_emb": jax.random.normal(kg(), (src_vocab, d_model),
                                         jnp.float32) * 0.02,
        "dec_tok_emb": jax.random.normal(kg(), (tgt_vocab, d_model),
                                         jnp.float32) * 0.02,
        "pos_enc": sinusoidal_pe(max_seq_len, d_model),
        "enc_layers": enc_layers,
        "dec_layers": dec_layers,
        "out_w": out_w,
        "out_b": out_b,
    }


# --------------------------------------------------------------------------
# main
# --------------------------------------------------------------------------
if __name__ == "__main__":
    # small config consistent with the module's constructor
    src_pad_idx = 0
    tgt_pad_idx = 0
    tgt_sos_idx = 1
    src_vocab = 32
    tgt_vocab = 32
    d_model = 32
    n_head = 4
    n_layer = 2
    d_ff = 64
    max_seq_len = 64
    B, S = 2, 8

    key = jax.random.PRNGKey(0)
    kp, ks, kt = jax.random.split(key, 3)
    params = init_params(kp, src_vocab, tgt_vocab, d_model, n_layer, d_ff,
                         max_seq_len)

    src = jax.random.randint(ks, (B, S), 2, src_vocab, dtype=jnp.int32)
    tgt = jax.random.randint(kt, (B, S), 2, tgt_vocab, dtype=jnp.int32)
    # introduce some padding so the masks actually do something
    src = src.at[1, -2:].set(src_pad_idx)
    tgt = tgt.at[1, -3:].set(tgt_pad_idx)
    tgt = tgt.at[:, 0].set(tgt_sos_idx)

    fwd = jax.jit(functools.partial(
        transformer_forward,
        src_pad_idx=src_pad_idx, tgt_pad_idx=tgt_pad_idx, n_head=n_head))
    out = fwd(params, src, tgt)
    jax.block_until_ready(out)

    assert out.shape == (B, S, tgt_vocab)
    assert jnp.all(jnp.isfinite(out))
    print("KERNEL_OK")
</pallas_src>

<mosaic_0001>
module attributes {stable_mosaic.version = 11 : i64} {
  func.func @_linear_kernel(%arg0: i32, %arg1: i32, %arg2: i32, %arg3: memref<16x32xbf16, #tpu.memory_space<vmem>>, %arg4: memref<32x96xbf16, #tpu.memory_space<vmem>>, %arg5: memref<1x96xf32, #tpu.memory_space<vmem>>, %arg6: memref<16x96xbf16, #tpu.memory_space<vmem>>) attributes {dimension_semantics = [#tpu.dimension_semantics<parallel>, #tpu.dimension_semantics<parallel>, #tpu.dimension_semantics<arbitrary>], iteration_bounds = array<i64: 1, 1, 1>, scalar_prefetch = 0 : i64, scratch_operands = 0 : i64, tpu.core_type = #tpu.core_type<tc>, window_params = [{transform_indices = @transform_0, window_bounds = array<i64: 16, 32>}, {transform_indices = @transform_1, window_bounds = array<i64: 32, 96>}, {transform_indices = @transform_2, window_bounds = array<i64: 1, 96>}, {transform_indices = @transform_3, window_bounds = array<i64: 16, 96>}]} {
    %c0 = arith.constant 0 : index
    %c0_0 = arith.constant 0 : index
    %0 = vector.load %arg3[%c0, %c0_0] : memref<16x32xbf16, #tpu.memory_space<vmem>>, vector<16x32xbf16>
    %c0_1 = arith.constant 0 : index
    %c0_2 = arith.constant 0 : index
    %1 = vector.load %arg4[%c0_1, %c0_2] : memref<32x96xbf16, #tpu.memory_space<vmem>>, vector<32x96xbf16>
    %cst = arith.constant dense<0.000000e+00> : vector<16x96xf32>
    %2 = tpu.matmul %0, %1, %cst {dimension_numbers = #tpu.dot_dimension_numbers<[1], [0], [0], [1], [0, 0, 1, 1], [], []>} : vector<16x32xbf16>, vector<32x96xbf16>, vector<16x96xf32> -> vector<16x96xf32>
    %c0_3 = arith.constant 0 : index
    %c0_4 = arith.constant 0 : index
    %3 = vector.load %arg5[%c0_3, %c0_4] : memref<1x96xf32, #tpu.memory_space<vmem>>, vector<1x96xf32>
    %4 = vector.broadcast %3 : vector<1x96xf32> to vector<16x96xf32>
    %5 = arith.addf %2, %4 : vector<16x96xf32>
    %6 = arith.truncf %5 : vector<16x96xf32> to vector<16x96xbf16>
    %c0_5 = arith.constant 0 : index
    %c0_6 = arith.constant 0 : index
    %7 = vector.load %arg6[%c0_5, %c0_6] : memref<16x96xbf16, #tpu.memory_space<vmem>>, vector<16x96xbf16>
    tpu.vector_store %arg6[%c0_5, %c0_6], %6 {strides = array<i32>} : memref<16x96xbf16, #tpu.memory_space<vmem>>, vector<16x96xbf16>,
    return
  }
  func.func @transform_0(%arg0: i32, %arg1: i32, %arg2: i32) -> (i32, i32) {
    %c0_i32 = arith.constant 0 : i32
    return %arg0, %arg2 : i32, i32
  }
  func.func @transform_1(%arg0: i32, %arg1: i32, %arg2: i32) -> (i32, i32) {
    %c0_i32 = arith.constant 0 : i32
    return %arg2, %arg1 : i32, i32
  }
  func.func @transform_2(%arg0: i32, %arg1: i32, %arg2: i32) -> (i32, i32) {
    %c0_i32 = arith.constant 0 : i32
    %c0_i32_0 = arith.constant 0 : i32
    return %c0_i32, %arg1 : i32, i32
  }
  func.func @transform_3(%arg0: i32, %arg1: i32, %arg2: i32) -> (i32, i32) {
    %c0_i32 = arith.constant 0 : i32
    return %arg0, %arg1 : i32, i32
  }
}

module attributes {stable_mosaic.version = 11 : i64} {
  func.func @_self_attn_kernel(%arg0: i32, %arg1: memref<1x8x96xbf16, #tpu.memory_space<vmem>>, %arg2: memref<1x1x8xf32, #tpu.memory_space<vmem>>, %arg3: memref<1x8x32xbf16, #tpu.memory_space<vmem>>) attributes {dimension_semantics = [#tpu.dimension_semantics<parallel>], iteration_bounds = array<i64: 2>, scalar_prefetch = 0 : i64, scratch_operands = 0 : i64, tpu.core_type = #tpu.core_type<tc>, window_params = [{transform_indices = @transform_0, window_bounds = array<i64: 1, 8, 96>}, {transform_indices = @transform_1, window_bounds = array<i64: 1, 1, 8>}, {transform_indices = @transform_2, window_bounds = array<i64: 1, 8, 32>}]} {
    %c0 = arith.constant 0 : index
    %c0_0 = arith.constant 0 : index
    %c0_1 = arith.constant 0 : index
    %0 = vector.load %arg1[%c0, %c0_0, %c0_1] : memref<1x8x96xbf16, #tpu.memory_space<vmem>>, vector<1x8x96xbf16>
    %1 = vector.shape_cast %0 : vector<1x8x96xbf16> to vector<8x96xbf16>
    %2 = vector.extract_strided_slice %1 {offsets = [0, 0], sizes = [8, 32], strides = [1, 1]} : vector<8x96xbf16> to vector<8x32xbf16>
    %3 = vector.extract_strided_slice %1 {offsets = [0, 32], sizes = [8, 32], strides = [1, 1]} : vector<8x96xbf16> to vector<8x32xbf16>
    %4 = vector.extract_strided_slice %1 {offsets = [0, 64], sizes = [8, 32], strides = [1, 1]} : vector<8x96xbf16> to vector<8x32xbf16>
    %c0_2 = arith.constant 0 : index
    %c0_3 = arith.constant 0 : index
    %c0_4 = arith.constant 0 : index
    %5 = vector.load %arg2[%c0_2, %c0_3, %c0_4] : memref<1x1x8xf32, #tpu.memory_space<vmem>>, vector<1x1x8xf32>
    %6 = vector.shape_cast %5 : vector<1x1x8xf32> to vector<1x8xf32>
    %7 = vector.shape_cast %2 : vector<8x32xbf16> to vector<8x4x8xbf16>
    %8 = tpu.transpose %7, [1, 0, 2] : vector<8x4x8xbf16> -> vector<4x8x8xbf16>
    %9 = vector.shape_cast %3 : vector<8x32xbf16> to vector<8x4x8xbf16>
    %10 = tpu.transpose %9, [1, 0, 2] : vector<8x4x8xbf16> -> vector<4x8x8xbf16>
    %11 = vector.shape_cast %4 : vector<8x32xbf16> to vector<8x4x8xbf16>
    %12 = tpu.transpose %11, [1, 0, 2] : vector<8x4x8xbf16> -> vector<4x8x8xbf16>
    "tpu.trace_start"() <{level = 10 : i32, message = "hqd,hkd->hqk"}> : () -> ()
    %cst = arith.constant dense<0.000000e+00> : vector<4x8x8xf32>
    %13 = tpu.matmul %8, %10, %cst {dimension_numbers = #tpu.dot_dimension_numbers<[2], [2], [1], [1], [0, 0, 0, 1, 1, 1], [0], [0]>} : vector<4x8x8xbf16>, vector<4x8x8xbf16>, vector<4x8x8xf32> -> vector<4x8x8xf32>
    "tpu.trace_stop"() : () -> ()
    %cst_5 = arith.constant 0.353553385 : f32
    %14 = vector.broadcast %cst_5 : f32 to vector<4x8x8xf32>
    %15 = arith.mulf %13, %14 : vector<4x8x8xf32>
    %cst_6 = arith.constant 0.000000e+00 : f32
    %16 = vector.broadcast %cst_6 : f32 to vector<1x8xf32>
    %17 = arith.cmpf ogt, %6, %16 : vector<1x8xf32>
    %cst_7 = arith.constant 0.000000e+00 : f32
    %cst_8 = arith.constant -1.000000e+09 : f32
    %18 = vector.broadcast %cst_7 : f32 to vector<1x8xf32>
    %19 = vector.broadcast %cst_8 : f32 to vector<1x8xf32>
    %20 = arith.select %17, %18, %19 : vector<1x8xi1>, vector<1x8xf32>
    %21 = vector.shape_cast %20 : vector<1x8xf32> to vector<1x1x8xf32>
    %22 = vector.broadcast %21 : vector<1x1x8xf32> to vector<4x8x8xf32>
    %23 = arith.addf %15, %22 : vector<4x8x8xf32>
    %cst_9 = arith.constant dense<0xFF800000> : vector<4x8xf32>
    %24 = vector.multi_reduction <maximumf>, %23, %cst_9 [2] : vector<4x8x8xf32> to vector<4x8xf32>
    %25 = vector.shape_cast %24 : vector<4x8xf32> to vector<4x8x1xf32>
    %26 = vector.broadcast %25 : vector<4x8x1xf32> to vector<4x8x8xf32>
    %27 = arith.subf %23, %26 : vector<4x8x8xf32>
    %28 = math.exp %27 : vector<4x8x8xf32>
    %cst_10 = arith.constant dense<0.000000e+00> : vector<4x8xf32>
    %29 = vector.multi_reduction <add>, %28, %cst_10 [2] : vector<4x8x8xf32> to vector<4x8xf32>
    %30 = vector.shape_cast %29 : vector<4x8xf32> to vector<4x8x1xf32>
    %31 = tpu.reciprocal %30 {approx = true} : vector<4x8x1xf32> -> vector<4x8x1xf32>
    %32 = vector.broadcast %31 : vector<4x8x1xf32> to vector<4x8x8xf32>
    %33 = arith.mulf %28, %32 : vector<4x8x8xf32>
    %34 = arith.truncf %33 : vector<4x8x8xf32> to vector<4x8x8xbf16>
    "tpu.trace_start"() <{level = 10 : i32, message = "hqk,hkd->hqd"}> : () -> ()
    %cst_11 = arith.constant dense<0.000000e+00> : vector<4x8x8xf32>
    %35 = tpu.matmul %34, %12, %cst_11 {dimension_numbers = #tpu.dot_dimension_numbers<[2], [1], [1], [2], [0, 0, 0, 1, 1, 2], [0], [0]>} : vector<4x8x8xbf16>, vector<4x8x8xbf16>, vector<4x8x8xf32> -> vector<4x8x8xf32>
    "tpu.trace_stop"() : () -> ()
    %36 = tpu.transpose %35, [1, 0, 2] : vector<4x8x8xf32> -> vector<8x4x8xf32>
    %37 = vector.shape_cast %36 : vector<8x4x8xf32> to vector<8x32xf32>
    %38 = arith.truncf %37 : vector<8x32xf32> to vector<8x32xbf16>
    %c0_12 = arith.constant 0 : index
    %c0_13 = arith.constant 0 : index
    %c0_14 = arith.constant 0 : index
    %39 = vector.load %arg3[%c0_12, %c0_13, %c0_14] : memref<1x8x32xbf16, #tpu.memory_space<vmem>>, vector<1x8x32xbf16>
    %40 = vector.shape_cast %39 : vector<1x8x32xbf16> to vector<8x32xbf16>
    %41 = vector.shape_cast %38 : vector<8x32xbf16> to vector<1x8x32xbf16>
    tpu.vector_store %arg3[%c0_12, %c0_13, %c0_14], %41 {strides = array<i32>} : memref<1x8x32xbf16, #tpu.memory_space<vmem>>, vector<1x8x32xbf16>,
    return
  }
  func.func @transform_0(%arg0: i32) -> (i32, i32, i32) {
    %c0_i32 = arith.constant 0 : i32
    %c0_i32_0 = arith.constant 0 : i32
    %c0_i32_1 = arith.constant 0 : i32
    return %arg0, %c0_i32, %c0_i32_0 : i32, i32, i32
  }
  func.func @transform_1(%arg0: i32) -> (i32, i32, i32) {
    %c0_i32 = arith.constant 0 : i32
    %c0_i32_0 = arith.constant 0 : i32
    %c0_i32_1 = arith.constant 0 : i32
    return %arg0, %c0_i32, %c0_i32_0 : i32, i32, i32
  }
  func.func @transform_2(%arg0: i32) -> (i32, i32, i32) {
    %c0_i32 = arith.constant 0 : i32
    %c0_i32_0 = arith.constant 0 : i32
    %c0_i32_1 = arith.constant 0 : i32
    return %arg0, %c0_i32, %c0_i32_0 : i32, i32, i32
  }
}

module attributes {stable_mosaic.version = 11 : i64} {
  func.func @_linear_kernel(%arg0: i32, %arg1: i32, %arg2: i32, %arg3: memref<16x32xbf16, #tpu.memory_space<vmem>>, %arg4: memref<32x32xbf16, #tpu.memory_space<vmem>>, %arg5: memref<1x32xf32, #tpu.memory_space<vmem>>, %arg6: memref<16x32xbf16, #tpu.memory_space<vmem>>, %arg7: memref<1x32xf32, #tpu.memory_space<vmem>>, %arg8: memref<1x32xf32, #tpu.memory_space<vmem>>, %arg9: memref<16x32xbf16, #tpu.memory_space<vmem>>) attributes {dimension_semantics = [#tpu.dimension_semantics<parallel>, #tpu.dimension_semantics<parallel>, #tpu.dimension_semantics<arbitrary>], iteration_bounds = array<i64: 1, 1, 1>, scalar_prefetch = 0 : i64, scratch_operands = 0 : i64, tpu.core_type = #tpu.core_type<tc>, window_params = [{transform_indices = @transform_0, window_bounds = array<i64: 16, 32>}, {transform_indices = @transform_1, window_bounds = array<i64: 32, 32>}, {transform_indices = @transform_2, window_bounds = array<i64: 1, 32>}, {transform_indices = @transform_3, window_bounds = array<i64: 16, 32>}, {transform_indices = @transform_4, window_bounds = array<i64: 1, 32>}, {transform_indices = @transform_5, window_bounds = array<i64: 1, 32>}, {transform_indices = @transform_6, window_bounds = array<i64: 16, 32>}]} {
    %c0 = arith.constant 0 : index
    %c0_0 = arith.constant 0 : index
    %0 = vector.load %arg3[%c0, %c0_0] : memref<16x32xbf16, #tpu.memory_space<vmem>>, vector<16x32xbf16>
    %c0_1 = arith.constant 0 : index
    %c0_2 = arith.constant 0 : index
    %1 = vector.load %arg4[%c0_1, %c0_2] : memref<32x32xbf16, #tpu.memory_space<vmem>>, vector<32x32xbf16>
    %cst = arith.constant dense<0.000000e+00> : vector<16x32xf32>
    %2 = tpu.matmul %0, %1, %cst {dimension_numbers = #tpu.dot_dimension_numbers<[1], [0], [0], [1], [0, 0, 1, 1], [], []>} : vector<16x32xbf16>, vector<32x32xbf16>, vector<16x32xf32> -> vector<16x32xf32>
    %c0_3 = arith.constant 0 : index
    %c0_4 = arith.constant 0 : index
    %3 = vector.load %arg5[%c0_3, %c0_4] : memref<1x32xf32, #tpu.memory_space<vmem>>, vector<1x32xf32>
    %4 = vector.broadcast %3 : vector<1x32xf32> to vector<16x32xf32>
    %5 = arith.addf %2, %4 : vector<16x32xf32>
    %c0_5 = arith.constant 0 : index
    %c0_6 = arith.constant 0 : index
    %6 = vector.load %arg6[%c0_5, %c0_6] : memref<16x32xbf16, #tpu.memory_space<vmem>>, vector<16x32xbf16>
    %7 = arith.extf %6 : vector<16x32xbf16> to vector<16x32xf32>
    %8 = arith.addf %5, %7 : vector<16x32xf32>
    %cst_7 = arith.constant dense<0.000000e+00> : vector<16xf32>
    %9 = vector.multi_reduction <add>, %8, %cst_7 [1] : vector<16x32xf32> to vector<16xf32>
    %10 = vector.shape_cast %9 : vector<16xf32> to vector<16x1xf32>
    %cst_8 = arith.constant 3.200000e+01 : f32
    %11 = vector.broadcast %cst_8 : f32 to vector<16x1xf32>
    %12 = arith.divf %10, %11 : vector<16x1xf32>
    %13 = vector.broadcast %12 : vector<16x1xf32> to vector<16x32xf32>
    %14 = arith.subf %8, %13 : vector<16x32xf32>
    %15 = arith.mulf %14, %14 : vector<16x32xf32>
    %cst_9 = arith.constant dense<0.000000e+00> : vector<16xf32>
    %16 = vector.multi_reduction <add>, %15, %cst_9 [1] : vector<16x32xf32> to vector<16xf32>
    %17 = vector.shape_cast %16 : vector<16xf32> to vector<16x1xf32>
    %cst_10 = arith.constant 3.200000e+01 : f32
    %18 = vector.broadcast %cst_10 : f32 to vector<16x1xf32>
    %19 = arith.divf %17, %18 : vector<16x1xf32>
    %20 = vector.broadcast %12 : vector<16x1xf32> to vector<16x32xf32>
    %21 = arith.subf %8, %20 : vector<16x32xf32>
    %cst_11 = arith.constant 9.99999974E-6 : f32
    %22 = vector.broadcast %cst_11 : f32 to vector<16x1xf32>
    %23 = arith.addf %19, %22 : vector<16x1xf32>
    %24 = math.rsqrt %23 : vector<16x1xf32>
    %25 = vector.broadcast %24 : vector<16x1xf32> to vector<16x32xf32>
    %26 = arith.mulf %21, %25 : vector<16x32xf32>
    %c0_12 = arith.constant 0 : index
    %c0_13 = arith.constant 0 : index
    %27 = vector.load %arg7[%c0_12, %c0_13] : memref<1x32xf32, #tpu.memory_space<vmem>>, vector<1x32xf32>
    %28 = vector.broadcast %27 : vector<1x32xf32> to vector<16x32xf32>
    %29 = arith.mulf %26, %28 : vector<16x32xf32>
    %c0_14 = arith.constant 0 : index
    %c0_15 = arith.constant 0 : index
    %30 = vector.load %arg8[%c0_14, %c0_15] : memref<1x32xf32, #tpu.memory_space<vmem>>, vector<1x32xf32>
    %31 = vector.broadcast %30 : vector<1x32xf32> to vector<16x32xf32>
    %32 = arith.addf %29, %31 : vector<16x32xf32>
    %33 = arith.truncf %32 : vector<16x32xf32> to vector<16x32xbf16>
    %c0_16 = arith.constant 0 : index
    %c0_17 = arith.constant 0 : index
    %34 = vector.load %arg9[%c0_16, %c0_17] : memref<16x32xbf16, #tpu.memory_space<vmem>>, vector<16x32xbf16>
    tpu.vector_store %arg9[%c0_16, %c0_17], %33 {strides = array<i32>} : memref<16x32xbf16, #tpu.memory_space<vmem>>, vector<16x32xbf16>,
    return
  }
  func.func @transform_0(%arg0: i32, %arg1: i32, %arg2: i32) -> (i32, i32) {
    %c0_i32 = arith.constant 0 : i32
    return %arg0, %arg2 : i32, i32
  }
  func.func @transform_1(%arg0: i32, %arg1: i32, %arg2: i32) -> (i32, i32) {
    %c0_i32 = arith.constant 0 : i32
    return %arg2, %arg1 : i32, i32
  }
  func.func @transform_2(%arg0: i32, %arg1: i32, %arg2: i32) -> (i32, i32) {
    %c0_i32 = arith.constant 0 : i32
    %c0_i32_0 = arith.constant 0 : i32
    return %c0_i32, %arg1 : i32, i32
  }
  func.func @transform_3(%arg0: i32, %arg1: i32, %arg2: i32) -> (i32, i32) {
    %c0_i32 = arith.constant 0 : i32
    return %arg0, %arg1 : i32, i32
  }
  func.func @transform_4(%arg0: i32, %arg1: i32, %arg2: i32) -> (i32, i32) {
    %c0_i32 = arith.constant 0 : i32
    %c0_i32_0 = arith.constant 0 : i32
    return %c0_i32, %arg1 : i32, i32
  }
  func.func @transform_5(%arg0: i32, %arg1: i32, %arg2: i32) -> (i32, i32) {
    %c0_i32 = arith.constant 0 : i32
    %c0_i32_0 = arith.constant 0 : i32
    return %c0_i32, %arg1 : i32, i32
  }
  func.func @transform_6(%arg0: i32, %arg1: i32, %arg2: i32) -> (i32, i32) {
    %c0_i32 = arith.constant 0 : i32
    return %arg0, %arg1 : i32, i32
  }
}

module attributes {stable_mosaic.version = 11 : i64} {
  func.func @_ffn_ln_kernel(%arg0: i32, %arg1: i32, %arg2: memref<16x32xbf16, #tpu.memory_space<vmem>>, %arg3: memref<32x64xbf16, #tpu.memory_space<vmem>>, %arg4: memref<1x64xf32, #tpu.memory_space<vmem>>, %arg5: memref<64x32xbf16, #tpu.memory_space<vmem>>, %arg6: memref<1x32xf32, #tpu.memory_space<vmem>>, %arg7: memref<1x32xf32, #tpu.memory_space<vmem>>, %arg8: memref<1x32xf32, #tpu.memory_space<vmem>>, %arg9: memref<16x32xbf16, #tpu.memory_space<vmem>>) attributes {dimension_semantics = [#tpu.dimension_semantics<parallel>, #tpu.dimension_semantics<arbitrary>], iteration_bounds = array<i64: 1, 1>, scalar_prefetch = 0 : i64, scratch_operands = 0 : i64, tpu.core_type = #tpu.core_type<tc>, window_params = [{transform_indices = @transform_0, window_bounds = array<i64: 16, 32>}, {transform_indices = @transform_1, window_bounds = array<i64: 32, 64>}, {transform_indices = @transform_2, window_bounds = array<i64: 1, 64>}, {transform_indices = @transform_3, window_bounds = array<i64: 64, 32>}, {pipeline_mode = #tpu.pipeline_mode<synchronous>, transform_indices = @transform_4, window_bounds = array<i64: 1, 32>}, {pipeline_mode = #tpu.pipeline_mode<synchronous>, transform_indices = @transform_5, window_bounds = array<i64: 1, 32>}, {pipeline_mode = #tpu.pipeline_mode<synchronous>, transform_indices = @transform_6, window_bounds = array<i64: 1, 32>}, {transform_indices = @transform_7, window_bounds = array<i64: 16, 32>}]} {
    %c0 = arith.constant 0 : index
    %c0_0 = arith.constant 0 : index
    %0 = vector.load %arg2[%c0, %c0_0] : memref<16x32xbf16, #tpu.memory_space<vmem>>, vector<16x32xbf16>
    %c0_1 = arith.constant 0 : index
    %c0_2 = arith.constant 0 : index
    %1 = vector.load %arg3[%c0_1, %c0_2] : memref<32x64xbf16, #tpu.memory_space<vmem>>, vector<32x64xbf16>
    %cst = arith.constant dense<0.000000e+00> : vector<16x64xf32>
    %2 = tpu.matmul %0, %1, %cst {dimension_numbers = #tpu.dot_dimension_numbers<[1], [0], [0], [1], [0, 0, 1, 1], [], []>} : vector<16x32xbf16>, vector<32x64xbf16>, vector<16x64xf32> -> vector<16x64xf32>
    %c0_3 = arith.constant 0 : index
    %c0_4 = arith.constant 0 : index
    %3 = vector.load %arg4[%c0_3, %c0_4] : memref<1x64xf32, #tpu.memory_space<vmem>>, vector<1x64xf32>
    %4 = vector.broadcast %3 : vector<1x64xf32> to vector<16x64xf32>
    %5 = arith.addf %2, %4 : vector<16x64xf32>
    %cst_5 = arith.constant 0.000000e+00 : f32
    %6 = vector.broadcast %cst_5 : f32 to vector<16x64xf32>
    %7 = arith.maximumf %5, %6 : vector<16x64xf32>
    %8 = arith.truncf %7 : vector<16x64xf32> to vector<16x64xbf16>
    %c0_6 = arith.constant 0 : index
    %c0_7 = arith.constant 0 : index
    %9 = vector.load %arg5[%c0_6, %c0_7] : memref<64x32xbf16, #tpu.memory_space<vmem>>, vector<64x32xbf16>
    %cst_8 = arith.constant dense<0.000000e+00> : vector<16x32xf32>
    %10 = tpu.matmul %8, %9, %cst_8 {dimension_numbers = #tpu.dot_dimension_numbers<[1], [0], [0], [1], [0, 0, 1, 1], [], []>} : vector<16x64xbf16>, vector<64x32xbf16>, vector<16x32xf32> -> vector<16x32xf32>
    %c0_9 = arith.constant 0 : index
    %c0_10 = arith.constant 0 : index
    %11 = vector.load %arg6[%c0_9, %c0_10] : memref<1x32xf32, #tpu.memory_space<vmem>>, vector<1x32xf32>
    %12 = vector.broadcast %11 : vector<1x32xf32> to vector<16x32xf32>
    %13 = arith.addf %10, %12 : vector<16x32xf32>
    %c0_11 = arith.constant 0 : index
    %c0_12 = arith.constant 0 : index
    %14 = vector.load %arg2[%c0_11, %c0_12] : memref<16x32xbf16, #tpu.memory_space<vmem>>, vector<16x32xbf16>
    %15 = arith.extf %14 : vector<16x32xbf16> to vector<16x32xf32>
    %16 = arith.addf %13, %15 : vector<16x32xf32>
    %cst_13 = arith.constant dense<0.000000e+00> : vector<16xf32>
    %17 = vector.multi_reduction <add>, %16, %cst_13 [1] : vector<16x32xf32> to vector<16xf32>
    %18 = vector.shape_cast %17 : vector<16xf32> to vector<16x1xf32>
    %cst_14 = arith.constant 3.200000e+01 : f32
    %19 = vector.broadcast %cst_14 : f32 to vector<16x1xf32>
    %20 = arith.divf %18, %19 : vector<16x1xf32>
    %21 = vector.broadcast %20 : vector<16x1xf32> to vector<16x32xf32>
    %22 = arith.subf %16, %21 : vector<16x32xf32>
    %23 = arith.mulf %22, %22 : vector<16x32xf32>
    %cst_15 = arith.constant dense<0.000000e+00> : vector<16xf32>
    %24 = vector.multi_reduction <add>, %23, %cst_15 [1] : vector<16x32xf32> to vector<16xf32>
    %25 = vector.shape_cast %24 : vector<16xf32> to vector<16x1xf32>
    %cst_16 = arith.constant 3.200000e+01 : f32
    %26 = vector.broadcast %cst_16 : f32 to vector<16x1xf32>
    %27 = arith.divf %25, %26 : vector<16x1xf32>
    %28 = vector.broadcast %20 : vector<16x1xf32> to vector<16x32xf32>
    %29 = arith.subf %16, %28 : vector<16x32xf32>
    %cst_17 = arith.constant 9.99999974E-6 : f32
    %30 = vector.broadcast %cst_17 : f32 to vector<16x1xf32>
    %31 = arith.addf %27, %30 : vector<16x1xf32>
    %32 = math.rsqrt %31 : vector<16x1xf32>
    %33 = vector.broadcast %32 : vector<16x1xf32> to vector<16x32xf32>
    %34 = arith.mulf %29, %33 : vector<16x32xf32>
    %c0_18 = arith.constant 0 : index
    %c0_19 = arith.constant 0 : index
    %35 = vector.load %arg7[%c0_18, %c0_19] : memref<1x32xf32, #tpu.memory_space<vmem>>, vector<1x32xf32>
    %36 = vector.broadcast %35 : vector<1x32xf32> to vector<16x32xf32>
    %37 = arith.mulf %34, %36 : vector<16x32xf32>
    %c0_20 = arith.constant 0 : index
    %c0_21 = arith.constant 0 : index
    %38 = vector.load %arg8[%c0_20, %c0_21] : memref<1x32xf32, #tpu.memory_space<vmem>>, vector<1x32xf32>
    %39 = vector.broadcast %38 : vector<1x32xf32> to vector<16x32xf32>
    %40 = arith.addf %37, %39 : vector<16x32xf32>
    %41 = arith.truncf %40 : vector<16x32xf32> to vector<16x32xbf16>
    %c0_22 = arith.constant 0 : index
    %c0_23 = arith.constant 0 : index
    %42 = vector.load %arg9[%c0_22, %c0_23] : memref<16x32xbf16, #tpu.memory_space<vmem>>, vector<16x32xbf16>
    tpu.vector_store %arg9[%c0_22, %c0_23], %41 {strides = array<i32>} : memref<16x32xbf16, #tpu.memory_space<vmem>>, vector<16x32xbf16>,
    return
  }
  func.func @transform_0(%arg0: i32, %arg1: i32) -> (i32, i32) {
    %c0_i32 = arith.constant 0 : i32
    %c0_i32_0 = arith.constant 0 : i32
    return %arg0, %c0_i32 : i32, i32
  }
  func.func @transform_1(%arg0: i32, %arg1: i32) -> (i32, i32) {
    %c0_i32 = arith.constant 0 : i32
    %c0_i32_0 = arith.constant 0 : i32
    return %c0_i32, %arg1 : i32, i32
  }
  func.func @transform_2(%arg0: i32, %arg1: i32) -> (i32, i32) {
    %c0_i32 = arith.constant 0 : i32
    %c0_i32_0 = arith.constant 0 : i32
    return %c0_i32, %arg1 : i32, i32
  }
  func.func @transform_3(%arg0: i32, %arg1: i32) -> (i32, i32) {
    %c0_i32 = arith.constant 0 : i32
    %c0_i32_0 = arith.constant 0 : i32
    return %arg1, %c0_i32 : i32, i32
  }
  func.func @transform_4(%arg0: i32, %arg1: i32) -> (i32, i32) {
    %c0_i32 = arith.constant 0 : i32
    %c0_i32_0 = arith.constant 0 : i32
    %c0_i32_1 = arith.constant 0 : i32
    return %c0_i32, %c0_i32_0 : i32, i32
  }
  func.func @transform_5(%arg0: i32, %arg1: i32) -> (i32, i32) {
    %c0_i32 = arith.constant 0 : i32
    %c0_i32_0 = arith.constant 0 : i32
    %c0_i32_1 = arith.constant 0 : i32
    return %c0_i32, %c0_i32_0 : i32, i32
  }
  func.func @transform_6(%arg0: i32, %arg1: i32) -> (i32, i32) {
    %c0_i32 = arith.constant 0 : i32
    %c0_i32_0 = arith.constant 0 : i32
    %c0_i32_1 = arith.constant 0 : i32
    return %c0_i32, %c0_i32_0 : i32, i32
  }
  func.func @transform_7(%arg0: i32, %arg1: i32) -> (i32, i32) {
    %c0_i32 = arith.constant 0 : i32
    %c0_i32_0 = arith.constant 0 : i32
    return %arg0, %c0_i32 : i32, i32
  }
}

module attributes {stable_mosaic.version = 11 : i64} {
  func.func @_linear_kernel(%arg0: i32, %arg1: i32, %arg2: i32, %arg3: memref<16x32xbf16, #tpu.memory_space<vmem>>, %arg4: memref<32x64xbf16, #tpu.memory_space<vmem>>, %arg5: memref<1x64xf32, #tpu.memory_space<vmem>>, %arg6: memref<16x64xbf16, #tpu.memory_space<vmem>>) attributes {dimension_semantics = [#tpu.dimension_semantics<parallel>, #tpu.dimension_semantics<parallel>, #tpu.dimension_semantics<arbitrary>], iteration_bounds = array<i64: 1, 1, 1>, scalar_prefetch = 0 : i64, scratch_operands = 0 : i64, tpu.core_type = #tpu.core_type<tc>, window_params = [{transform_indices = @transform_0, window_bounds = array<i64: 16, 32>}, {transform_indices = @transform_1, window_bounds = array<i64: 32, 64>}, {transform_indices = @transform_2, window_bounds = array<i64: 1, 64>}, {transform_indices = @transform_3, window_bounds = array<i64: 16, 64>}]} {
    %c0 = arith.constant 0 : index
    %c0_0 = arith.constant 0 : index
    %0 = vector.load %arg3[%c0, %c0_0] : memref<16x32xbf16, #tpu.memory_space<vmem>>, vector<16x32xbf16>
    %c0_1 = arith.constant 0 : index
    %c0_2 = arith.constant 0 : index
    %1 = vector.load %arg4[%c0_1, %c0_2] : memref<32x64xbf16, #tpu.memory_space<vmem>>, vector<32x64xbf16>
    %cst = arith.constant dense<0.000000e+00> : vector<16x64xf32>
    %2 = tpu.matmul %0, %1, %cst {dimension_numbers = #tpu.dot_dimension_numbers<[1], [0], [0], [1], [0, 0, 1, 1], [], []>} : vector<16x32xbf16>, vector<32x64xbf16>, vector<16x64xf32> -> vector<16x64xf32>
    %c0_3 = arith.constant 0 : index
    %c0_4 = arith.constant 0 : index
    %3 = vector.load %arg5[%c0_3, %c0_4] : memref<1x64xf32, #tpu.memory_space<vmem>>, vector<1x64xf32>
    %4 = vector.broadcast %3 : vector<1x64xf32> to vector<16x64xf32>
    %5 = arith.addf %2, %4 : vector<16x64xf32>
    %6 = arith.truncf %5 : vector<16x64xf32> to vector<16x64xbf16>
    %c0_5 = arith.constant 0 : index
    %c0_6 = arith.constant 0 : index
    %7 = vector.load %arg6[%c0_5, %c0_6] : memref<16x64xbf16, #tpu.memory_space<vmem>>, vector<16x64xbf16>
    tpu.vector_store %arg6[%c0_5, %c0_6], %6 {strides = array<i32>} : memref<16x64xbf16, #tpu.memory_space<vmem>>, vector<16x64xbf16>,
    return
  }
  func.func @transform_0(%arg0: i32, %arg1: i32, %arg2: i32) -> (i32, i32) {
    %c0_i32 = arith.constant 0 : i32
    return %arg0, %arg2 : i32, i32
  }
  func.func @transform_1(%arg0: i32, %arg1: i32, %arg2: i32) -> (i32, i32) {
    %c0_i32 = arith.constant 0 : i32
    return %arg2, %arg1 : i32, i32
  }
  func.func @transform_2(%arg0: i32, %arg1: i32, %arg2: i32) -> (i32, i32) {
    %c0_i32 = arith.constant 0 : i32
    %c0_i32_0 = arith.constant 0 : i32
    return %c0_i32, %arg1 : i32, i32
  }
  func.func @transform_3(%arg0: i32, %arg1: i32, %arg2: i32) -> (i32, i32) {
    %c0_i32 = arith.constant 0 : i32
    return %arg0, %arg1 : i32, i32
  }
}

module attributes {stable_mosaic.version = 11 : i64} {
  func.func @_linear_kernel(%arg0: i32, %arg1: i32, %arg2: i32, %arg3: memref<16x32xbf16, #tpu.memory_space<vmem>>, %arg4: memref<32x32xbf16, #tpu.memory_space<vmem>>, %arg5: memref<1x32xf32, #tpu.memory_space<vmem>>, %arg6: memref<16x32xbf16, #tpu.memory_space<vmem>>, %arg7: memref<1x32xf32, #tpu.memory_space<vmem>>, %arg8: memref<1x32xf32, #tpu.memory_space<vmem>>, %arg9: memref<16x32xbf16, #tpu.memory_space<vmem>>) attributes {dimension_semantics = [#tpu.dimension_semantics<parallel>, #tpu.dimension_semantics<parallel>, #tpu.dimension_semantics<arbitrary>], iteration_bounds = array<i64: 1, 1, 1>, scalar_prefetch = 0 : i64, scratch_operands = 0 : i64, tpu.core_type = #tpu.core_type<tc>, window_params = [{transform_indices = @transform_0, window_bounds = array<i64: 16, 32>}, {transform_indices = @transform_1, window_bounds = array<i64: 32, 32>}, {transform_indices = @transform_2, window_bounds = array<i64: 1, 32>}, {transform_indices = @transform_3, window_bounds = array<i64: 16, 32>}, {transform_indices = @transform_4, window_bounds = array<i64: 1, 32>}, {transform_indices = @transform_5, window_bounds = array<i64: 1, 32>}, {transform_indices = @transform_6, window_bounds = array<i64: 16, 32>}]} {
    %c0 = arith.constant 0 : index
    %c0_0 = arith.constant 0 : index
    %0 = vector.load %arg3[%c0, %c0_0] : memref<16x32xbf16, #tpu.memory_space<vmem>>, vector<16x32xbf16>
    %c0_1 = arith.constant 0 : index
    %c0_2 = arith.constant 0 : index
    %1 = vector.load %arg4[%c0_1, %c0_2] : memref<32x32xbf16, #tpu.memory_space<vmem>>, vector<32x32xbf16>
    %cst = arith.constant dense<0.000000e+00> : vector<16x32xf32>
    %2 = tpu.matmul %0, %1, %cst {dimension_numbers = #tpu.dot_dimension_numbers<[1], [0], [0], [1], [0, 0, 1, 1], [], []>} : vector<16x32xbf16>, vector<32x32xbf16>, vector<16x32xf32> -> vector<16x32xf32>
    %c0_3 = arith.constant 0 : index
    %c0_4 = arith.constant 0 : index
    %3 = vector.load %arg5[%c0_3, %c0_4] : memref<1x32xf32, #tpu.memory_space<vmem>>, vector<1x32xf32>
    %4 = vector.broadcast %3 : vector<1x32xf32> to vector<16x32xf32>
    %5 = arith.addf %2, %4 : vector<16x32xf32>
    %c0_5 = arith.constant 0 : index
    %c0_6 = arith.constant 0 : index
    %6 = vector.load %arg6[%c0_5, %c0_6] : memref<16x32xbf16, #tpu.memory_space<vmem>>, vector<16x32xbf16>
    %7 = arith.extf %6 : vector<16x32xbf16> to vector<16x32xf32>
    %8 = arith.addf %5, %7 : vector<16x32xf32>
    %cst_7 = arith.constant dense<0.000000e+00> : vector<16xf32>
    %9 = vector.multi_reduction <add>, %8, %cst_7 [1] : vector<16x32xf32> to vector<16xf32>
    %10 = vector.shape_cast %9 : vector<16xf32> to vector<16x1xf32>
    %cst_8 = arith.constant 3.200000e+01 : f32
    %11 = vector.broadcast %cst_8 : f32 to vector<16x1xf32>
    %12 = arith.divf %10, %11 : vector<16x1xf32>
    %13 = vector.broadcast %12 : vector<16x1xf32> to vector<16x32xf32>
    %14 = arith.subf %8, %13 : vector<16x32xf32>
    %15 = arith.mulf %14, %14 : vector<16x32xf32>
    %cst_9 = arith.constant dense<0.000000e+00> : vector<16xf32>
    %16 = vector.multi_reduction <add>, %15, %cst_9 [1] : vector<16x32xf32> to vector<16xf32>
    %17 = vector.shape_cast %16 : vector<16xf32> to vector<16x1xf32>
    %cst_10 = arith.constant 3.200000e+01 : f32
    %18 = vector.broadcast %cst_10 : f32 to vector<16x1xf32>
    %19 = arith.divf %17, %18 : vector<16x1xf32>
    %20 = vector.broadcast %12 : vector<16x1xf32> to vector<16x32xf32>
    %21 = arith.subf %8, %20 : vector<16x32xf32>
    %cst_11 = arith.constant 9.99999974E-6 : f32
    %22 = vector.broadcast %cst_11 : f32 to vector<16x1xf32>
    %23 = arith.addf %19, %22 : vector<16x1xf32>
    %24 = math.rsqrt %23 : vector<16x1xf32>
    %25 = vector.broadcast %24 : vector<16x1xf32> to vector<16x32xf32>
    %26 = arith.mulf %21, %25 : vector<16x32xf32>
    %c0_12 = arith.constant 0 : index
    %c0_13 = arith.constant 0 : index
    %27 = vector.load %arg7[%c0_12, %c0_13] : memref<1x32xf32, #tpu.memory_space<vmem>>, vector<1x32xf32>
    %28 = vector.broadcast %27 : vector<1x32xf32> to vector<16x32xf32>
    %29 = arith.mulf %26, %28 : vector<16x32xf32>
    %c0_14 = arith.constant 0 : index
    %c0_15 = arith.constant 0 : index
    %30 = vector.load %arg8[%c0_14, %c0_15] : memref<1x32xf32, #tpu.memory_space<vmem>>, vector<1x32xf32>
    %31 = vector.broadcast %30 : vector<1x32xf32> to vector<16x32xf32>
    %32 = arith.addf %29, %31 : vector<16x32xf32>
    %33 = arith.truncf %32 : vector<16x32xf32> to vector<16x32xbf16>
    %c0_16 = arith.constant 0 : index
    %c0_17 = arith.constant 0 : index
    %34 = vector.load %arg9[%c0_16, %c0_17] : memref<16x32xbf16, #tpu.memory_space<vmem>>, vector<16x32xbf16>
    tpu.vector_store %arg9[%c0_16, %c0_17], %33 {strides = array<i32>} : memref<16x32xbf16, #tpu.memory_space<vmem>>, vector<16x32xbf16>,
    return
  }
  func.func @transform_0(%arg0: i32, %arg1: i32, %arg2: i32) -> (i32, i32) {
    %c0_i32 = arith.constant 0 : i32
    return %arg0, %arg2 : i32, i32
  }
  func.func @transform_1(%arg0: i32, %arg1: i32, %arg2: i32) -> (i32, i32) {
    %c0_i32 = arith.constant 0 : i32
    return %arg2, %arg1 : i32, i32
  }
  func.func @transform_2(%arg0: i32, %arg1: i32, %arg2: i32) -> (i32, i32) {
    %c0_i32 = arith.constant 0 : i32
    %c0_i32_0 = arith.constant 0 : i32
    return %c0_i32, %arg1 : i32, i32
  }
  func.func @transform_3(%arg0: i32, %arg1: i32, %arg2: i32) -> (i32, i32) {
    %c0_i32 = arith.constant 0 : i32
    return %arg0, %arg1 : i32, i32
  }
  func.func @transform_4(%arg0: i32, %arg1: i32, %arg2: i32) -> (i32, i32) {
    %c0_i32 = arith.constant 0 : i32
    %c0_i32_0 = arith.constant 0 : i32
    return %c0_i32, %arg1 : i32, i32
  }
  func.func @transform_5(%arg0: i32, %arg1: i32, %arg2: i32) -> (i32, i32) {
    %c0_i32 = arith.constant 0 : i32
    %c0_i32_0 = arith.constant 0 : i32
    return %c0_i32, %arg1 : i32, i32
  }
  func.func @transform_6(%arg0: i32, %arg1: i32, %arg2: i32) -> (i32, i32) {
    %c0_i32 = arith.constant 0 : i32
    return %arg0, %arg1 : i32, i32
  }
}

module attributes {stable_mosaic.version = 11 : i64} {
  func.func @_self_attn_kernel(%arg0: i32, %arg1: memref<1x8x96xbf16, #tpu.memory_space<vmem>>, %arg2: memref<1x1x8xf32, #tpu.memory_space<vmem>>, %arg3: memref<1x8x32xbf16, #tpu.memory_space<vmem>>) attributes {dimension_semantics = [#tpu.dimension_semantics<parallel>], iteration_bounds = array<i64: 2>, scalar_prefetch = 0 : i64, scratch_operands = 0 : i64, tpu.core_type = #tpu.core_type<tc>, window_params = [{transform_indices = @transform_0, window_bounds = array<i64: 1, 8, 96>}, {transform_indices = @transform_1, window_bounds = array<i64: 1, 1, 8>}, {transform_indices = @transform_2, window_bounds = array<i64: 1, 8, 32>}]} {
    %c0 = arith.constant 0 : index
    %c0_0 = arith.constant 0 : index
    %c0_1 = arith.constant 0 : index
    %0 = vector.load %arg1[%c0, %c0_0, %c0_1] : memref<1x8x96xbf16, #tpu.memory_space<vmem>>, vector<1x8x96xbf16>
    %1 = vector.shape_cast %0 : vector<1x8x96xbf16> to vector<8x96xbf16>
    %2 = vector.extract_strided_slice %1 {offsets = [0, 0], sizes = [8, 32], strides = [1, 1]} : vector<8x96xbf16> to vector<8x32xbf16>
    %3 = vector.extract_strided_slice %1 {offsets = [0, 32], sizes = [8, 32], strides = [1, 1]} : vector<8x96xbf16> to vector<8x32xbf16>
    %4 = vector.extract_strided_slice %1 {offsets = [0, 64], sizes = [8, 32], strides = [1, 1]} : vector<8x96xbf16> to vector<8x32xbf16>
    %c0_2 = arith.constant 0 : index
    %c0_3 = arith.constant 0 : index
    %c0_4 = arith.constant 0 : index
    %5 = vector.load %arg2[%c0_2, %c0_3, %c0_4] : memref<1x1x8xf32, #tpu.memory_space<vmem>>, vector<1x1x8xf32>
    %6 = vector.shape_cast %5 : vector<1x1x8xf32> to vector<1x8xf32>
    %7 = vector.shape_cast %2 : vector<8x32xbf16> to vector<8x4x8xbf16>
    %8 = tpu.transpose %7, [1, 0, 2] : vector<8x4x8xbf16> -> vector<4x8x8xbf16>
    %9 = vector.shape_cast %3 : vector<8x32xbf16> to vector<8x4x8xbf16>
    %10 = tpu.transpose %9, [1, 0, 2] : vector<8x4x8xbf16> -> vector<4x8x8xbf16>
    %11 = vector.shape_cast %4 : vector<8x32xbf16> to vector<8x4x8xbf16>
    %12 = tpu.transpose %11, [1, 0, 2] : vector<8x4x8xbf16> -> vector<4x8x8xbf16>
    "tpu.trace_start"() <{level = 10 : i32, message = "hqd,hkd->hqk"}> : () -> ()
    %cst = arith.constant dense<0.000000e+00> : vector<4x8x8xf32>
    %13 = tpu.matmul %8, %10, %cst {dimension_numbers = #tpu.dot_dimension_numbers<[2], [2], [1], [1], [0, 0, 0, 1, 1, 1], [0], [0]>} : vector<4x8x8xbf16>, vector<4x8x8xbf16>, vector<4x8x8xf32> -> vector<4x8x8xf32>
    "tpu.trace_stop"() : () -> ()
    %cst_5 = arith.constant 0.353553385 : f32
    %14 = vector.broadcast %cst_5 : f32 to vector<4x8x8xf32>
    %15 = arith.mulf %13, %14 : vector<4x8x8xf32>
    %cst_6 = arith.constant 0.000000e+00 : f32
    %16 = vector.broadcast %cst_6 : f32 to vector<1x8xf32>
    %17 = arith.cmpf ogt, %6, %16 : vector<1x8xf32>
    %cst_7 = arith.constant 0.000000e+00 : f32
    %cst_8 = arith.constant -1.000000e+09 : f32
    %18 = vector.broadcast %cst_7 : f32 to vector<1x8xf32>
    %19 = vector.broadcast %cst_8 : f32 to vector<1x8xf32>
    %20 = arith.select %17, %18, %19 : vector<1x8xi1>, vector<1x8xf32>
    %21 = tpu.iota {dimensions = array<i32: 0>} : vector<8x8xi32>
    %22 = tpu.iota {dimensions = array<i32: 1>} : vector<8x8xi32>
    %23 = arith.cmpi sle, %22, %21 : vector<8x8xi32>
    %cst_9 = arith.constant -1.000000e+09 : f32
    %24 = vector.shape_cast %20 : vector<1x8xf32> to vector<1x8xf32>
    %25 = vector.broadcast %24 : vector<1x8xf32> to vector<8x8xf32>
    %26 = vector.broadcast %cst_9 : f32 to vector<8x8xf32>
    %27 = arith.select %23, %25, %26 : vector<8x8xi1>, vector<8x8xf32>
    %28 = vector.shape_cast %27 : vector<8x8xf32> to vector<1x8x8xf32>
    %29 = vector.broadcast %28 : vector<1x8x8xf32> to vector<4x8x8xf32>
    %30 = arith.addf %15, %29 : vector<4x8x8xf32>
    %cst_10 = arith.constant dense<0xFF800000> : vector<4x8xf32>
    %31 = vector.multi_reduction <maximumf>, %30, %cst_10 [2] : vector<4x8x8xf32> to vector<4x8xf32>
    %32 = vector.shape_cast %31 : vector<4x8xf32> to vector<4x8x1xf32>
    %33 = vector.broadcast %32 : vector<4x8x1xf32> to vector<4x8x8xf32>
    %34 = arith.subf %30, %33 : vector<4x8x8xf32>
    %35 = math.exp %34 : vector<4x8x8xf32>
    %cst_11 = arith.constant dense<0.000000e+00> : vector<4x8xf32>
    %36 = vector.multi_reduction <add>, %35, %cst_11 [2] : vector<4x8x8xf32> to vector<4x8xf32>
    %37 = vector.shape_cast %36 : vector<4x8xf32> to vector<4x8x1xf32>
    %38 = tpu.reciprocal %37 {approx = true} : vector<4x8x1xf32> -> vector<4x8x1xf32>
    %39 = vector.broadcast %38 : vector<4x8x1xf32> to vector<4x8x8xf32>
    %40 = arith.mulf %35, %39 : vector<4x8x8xf32>
    %41 = arith.truncf %40 : vector<4x8x8xf32> to vector<4x8x8xbf16>
    "tpu.trace_start"() <{level = 10 : i32, message = "hqk,hkd->hqd"}> : () -> ()
    %cst_12 = arith.constant dense<0.000000e+00> : vector<4x8x8xf32>
    %42 = tpu.matmul %41, %12, %cst_12 {dimension_numbers = #tpu.dot_dimension_numbers<[2], [1], [1], [2], [0, 0, 0, 1, 1, 2], [0], [0]>} : vector<4x8x8xbf16>, vector<4x8x8xbf16>, vector<4x8x8xf32> -> vector<4x8x8xf32>
    "tpu.trace_stop"() : () -> ()
    %43 = tpu.transpose %42, [1, 0, 2] : vector<4x8x8xf32> -> vector<8x4x8xf32>
    %44 = vector.shape_cast %43 : vector<8x4x8xf32> to vector<8x32xf32>
    %45 = arith.truncf %44 : vector<8x32xf32> to vector<8x32xbf16>
    %c0_13 = arith.constant 0 : index
    %c0_14 = arith.constant 0 : index
    %c0_15 = arith.constant 0 : index
    %46 = vector.load %arg3[%c0_13, %c0_14, %c0_15] : memref<1x8x32xbf16, #tpu.memory_space<vmem>>, vector<1x8x32xbf16>
    %47 = vector.shape_cast %46 : vector<1x8x32xbf16> to vector<8x32xbf16>
    %48 = vector.shape_cast %45 : vector<8x32xbf16> to vector<1x8x32xbf16>
    tpu.vector_store %arg3[%c0_13, %c0_14, %c0_15], %48 {strides = array<i32>} : memref<1x8x32xbf16, #tpu.memory_space<vmem>>, vector<1x8x32xbf16>,
    return
  }
  func.func @transform_0(%arg0: i32) -> (i32, i32, i32) {
    %c0_i32 = arith.constant 0 : i32
    %c0_i32_0 = arith.constant 0 : i32
    %c0_i32_1 = arith.constant 0 : i32
    return %arg0, %c0_i32, %c0_i32_0 : i32, i32, i32
  }
  func.func @transform_1(%arg0: i32) -> (i32, i32, i32) {
    %c0_i32 = arith.constant 0 : i32
    %c0_i32_0 = arith.constant 0 : i32
    %c0_i32_1 = arith.constant 0 : i32
    return %arg0, %c0_i32, %c0_i32_0 : i32, i32, i32
  }
  func.func @transform_2(%arg0: i32) -> (i32, i32, i32) {
    %c0_i32 = arith.constant 0 : i32
    %c0_i32_0 = arith.constant 0 : i32
    %c0_i32_1 = arith.constant 0 : i32
    return %arg0, %c0_i32, %c0_i32_0 : i32, i32, i32
  }
}

module attributes {stable_mosaic.version = 11 : i64} {
  func.func @_linear_kernel(%arg0: i32, %arg1: i32, %arg2: i32, %arg3: memref<16x32xbf16, #tpu.memory_space<vmem>>, %arg4: memref<32x32xbf16, #tpu.memory_space<vmem>>, %arg5: memref<1x32xf32, #tpu.memory_space<vmem>>, %arg6: memref<16x32xbf16, #tpu.memory_space<vmem>>) attributes {dimension_semantics = [#tpu.dimension_semantics<parallel>, #tpu.dimension_semantics<parallel>, #tpu.dimension_semantics<arbitrary>], iteration_bounds = array<i64: 1, 1, 1>, scalar_prefetch = 0 : i64, scratch_operands = 0 : i64, tpu.core_type = #tpu.core_type<tc>, window_params = [{transform_indices = @transform_0, window_bounds = array<i64: 16, 32>}, {transform_indices = @transform_1, window_bounds = array<i64: 32, 32>}, {transform_indices = @transform_2, window_bounds = array<i64: 1, 32>}, {transform_indices = @transform_3, window_bounds = array<i64: 16, 32>}]} {
    %c0 = arith.constant 0 : index
    %c0_0 = arith.constant 0 : index
    %0 = vector.load %arg3[%c0, %c0_0] : memref<16x32xbf16, #tpu.memory_space<vmem>>, vector<16x32xbf16>
    %c0_1 = arith.constant 0 : index
    %c0_2 = arith.constant 0 : index
    %1 = vector.load %arg4[%c0_1, %c0_2] : memref<32x32xbf16, #tpu.memory_space<vmem>>, vector<32x32xbf16>
    %cst = arith.constant dense<0.000000e+00> : vector<16x32xf32>
    %2 = tpu.matmul %0, %1, %cst {dimension_numbers = #tpu.dot_dimension_numbers<[1], [0], [0], [1], [0, 0, 1, 1], [], []>} : vector<16x32xbf16>, vector<32x32xbf16>, vector<16x32xf32> -> vector<16x32xf32>
    %c0_3 = arith.constant 0 : index
    %c0_4 = arith.constant 0 : index
    %3 = vector.load %arg5[%c0_3, %c0_4] : memref<1x32xf32, #tpu.memory_space<vmem>>, vector<1x32xf32>
    %4 = vector.broadcast %3 : vector<1x32xf32> to vector<16x32xf32>
    %5 = arith.addf %2, %4 : vector<16x32xf32>
    %6 = arith.truncf %5 : vector<16x32xf32> to vector<16x32xbf16>
    %c0_5 = arith.constant 0 : index
    %c0_6 = arith.constant 0 : index
    %7 = vector.load %arg6[%c0_5, %c0_6] : memref<16x32xbf16, #tpu.memory_space<vmem>>, vector<16x32xbf16>
    tpu.vector_store %arg6[%c0_5, %c0_6], %6 {strides = array<i32>} : memref<16x32xbf16, #tpu.memory_space<vmem>>, vector<16x32xbf16>,
    return
  }
  func.func @transform_0(%arg0: i32, %arg1: i32, %arg2: i32) -> (i32, i32) {
    %c0_i32 = arith.constant 0 : i32
    return %arg0, %arg2 : i32, i32
  }
  func.func @transform_1(%arg0: i32, %arg1: i32, %arg2: i32) -> (i32, i32) {
    %c0_i32 = arith.constant 0 : i32
    return %arg2, %arg1 : i32, i32
  }
  func.func @transform_2(%arg0: i32, %arg1: i32, %arg2: i32) -> (i32, i32) {
    %c0_i32 = arith.constant 0 : i32
    %c0_i32_0 = arith.constant 0 : i32
    return %c0_i32, %arg1 : i32, i32
  }
  func.func @transform_3(%arg0: i32, %arg1: i32, %arg2: i32) -> (i32, i32) {
    %c0_i32 = arith.constant 0 : i32
    return %arg0, %arg1 : i32, i32
  }
}

module attributes {stable_mosaic.version = 11 : i64} {
  func.func @_cross_attn_kernel(%arg0: i32, %arg1: memref<1x8x32xbf16, #tpu.memory_space<vmem>>, %arg2: memref<1x8x64xbf16, #tpu.memory_space<vmem>>, %arg3: memref<1x1x8xf32, #tpu.memory_space<vmem>>, %arg4: memref<1x8x32xbf16, #tpu.memory_space<vmem>>) attributes {dimension_semantics = [#tpu.dimension_semantics<parallel>], iteration_bounds = array<i64: 2>, scalar_prefetch = 0 : i64, scratch_operands = 0 : i64, tpu.core_type = #tpu.core_type<tc>, window_params = [{transform_indices = @transform_0, window_bounds = array<i64: 1, 8, 32>}, {transform_indices = @transform_1, window_bounds = array<i64: 1, 8, 64>}, {transform_indices = @transform_2, window_bounds = array<i64: 1, 1, 8>}, {transform_indices = @transform_3, window_bounds = array<i64: 1, 8, 32>}]} {
    %c0 = arith.constant 0 : index
    %c0_0 = arith.constant 0 : index
    %c0_1 = arith.constant 0 : index
    %0 = vector.load %arg1[%c0, %c0_0, %c0_1] : memref<1x8x32xbf16, #tpu.memory_space<vmem>>, vector<1x8x32xbf16>
    %1 = vector.shape_cast %0 : vector<1x8x32xbf16> to vector<8x32xbf16>
    %c0_2 = arith.constant 0 : index
    %c0_3 = arith.constant 0 : index
    %c0_4 = arith.constant 0 : index
    %2 = vector.load %arg2[%c0_2, %c0_3, %c0_4] : memref<1x8x64xbf16, #tpu.memory_space<vmem>>, vector<1x8x64xbf16>
    %3 = vector.shape_cast %2 : vector<1x8x64xbf16> to vector<8x64xbf16>
    %4 = vector.extract_strided_slice %3 {offsets = [0, 0], sizes = [8, 32], strides = [1, 1]} : vector<8x64xbf16> to vector<8x32xbf16>
    %5 = vector.extract_strided_slice %3 {offsets = [0, 32], sizes = [8, 32], strides = [1, 1]} : vector<8x64xbf16> to vector<8x32xbf16>
    %c0_5 = arith.constant 0 : index
    %c0_6 = arith.constant 0 : index
    %c0_7 = arith.constant 0 : index
    %6 = vector.load %arg3[%c0_5, %c0_6, %c0_7] : memref<1x1x8xf32, #tpu.memory_space<vmem>>, vector<1x1x8xf32>
    %7 = vector.shape_cast %6 : vector<1x1x8xf32> to vector<1x8xf32>
    %8 = vector.shape_cast %1 : vector<8x32xbf16> to vector<8x4x8xbf16>
    %9 = tpu.transpose %8, [1, 0, 2] : vector<8x4x8xbf16> -> vector<4x8x8xbf16>
    %10 = vector.shape_cast %4 : vector<8x32xbf16> to vector<8x4x8xbf16>
    %11 = tpu.transpose %10, [1, 0, 2] : vector<8x4x8xbf16> -> vector<4x8x8xbf16>
    %12 = vector.shape_cast %5 : vector<8x32xbf16> to vector<8x4x8xbf16>
    %13 = tpu.transpose %12, [1, 0, 2] : vector<8x4x8xbf16> -> vector<4x8x8xbf16>
    "tpu.trace_start"() <{level = 10 : i32, message = "hqd,hkd->hqk"}> : () -> ()
    %cst = arith.constant dense<0.000000e+00> : vector<4x8x8xf32>
    %14 = tpu.matmul %9, %11, %cst {dimension_numbers = #tpu.dot_dimension_numbers<[2], [2], [1], [1], [0, 0, 0, 1, 1, 1], [0], [0]>} : vector<4x8x8xbf16>, vector<4x8x8xbf16>, vector<4x8x8xf32> -> vector<4x8x8xf32>
    "tpu.trace_stop"() : () -> ()
    %cst_8 = arith.constant 0.353553385 : f32
    %15 = vector.broadcast %cst_8 : f32 to vector<4x8x8xf32>
    %16 = arith.mulf %14, %15 : vector<4x8x8xf32>
    %cst_9 = arith.constant 0.000000e+00 : f32
    %17 = vector.broadcast %cst_9 : f32 to vector<1x8xf32>
    %18 = arith.cmpf ogt, %7, %17 : vector<1x8xf32>
    %cst_10 = arith.constant 0.000000e+00 : f32
    %cst_11 = arith.constant -1.000000e+09 : f32
    %19 = vector.broadcast %cst_10 : f32 to vector<1x8xf32>
    %20 = vector.broadcast %cst_11 : f32 to vector<1x8xf32>
    %21 = arith.select %18, %19, %20 : vector<1x8xi1>, vector<1x8xf32>
    %22 = vector.shape_cast %21 : vector<1x8xf32> to vector<1x1x8xf32>
    %23 = vector.broadcast %22 : vector<1x1x8xf32> to vector<4x8x8xf32>
    %24 = arith.addf %16, %23 : vector<4x8x8xf32>
    %cst_12 = arith.constant dense<0xFF800000> : vector<4x8xf32>
    %25 = vector.multi_reduction <maximumf>, %24, %cst_12 [2] : vector<4x8x8xf32> to vector<4x8xf32>
    %26 = vector.shape_cast %25 : vector<4x8xf32> to vector<4x8x1xf32>
    %27 = vector.broadcast %26 : vector<4x8x1xf32> to vector<4x8x8xf32>
    %28 = arith.subf %24, %27 : vector<4x8x8xf32>
    %29 = math.exp %28 : vector<4x8x8xf32>
    %cst_13 = arith.constant dense<0.000000e+00> : vector<4x8xf32>
    %30 = vector.multi_reduction <add>, %29, %cst_13 [2] : vector<4x8x8xf32> to vector<4x8xf32>
    %31 = vector.shape_cast %30 : vector<4x8xf32> to vector<4x8x1xf32>
    %32 = tpu.reciprocal %31 {approx = true} : vector<4x8x1xf32> -> vector<4x8x1xf32>
    %33 = vector.broadcast %32 : vector<4x8x1xf32> to vector<4x8x8xf32>
    %34 = arith.mulf %29, %33 : vector<4x8x8xf32>
    %35 = arith.truncf %34 : vector<4x8x8xf32> to vector<4x8x8xbf16>
    "tpu.trace_start"() <{level = 10 : i32, message = "hqk,hkd->hqd"}> : () -> ()
    %cst_14 = arith.constant dense<0.000000e+00> : vector<4x8x8xf32>
    %36 = tpu.matmul %35, %13, %cst_14 {dimension_numbers = #tpu.dot_dimension_numbers<[2], [1], [1], [2], [0, 0, 0, 1, 1, 2], [0], [0]>} : vector<4x8x8xbf16>, vector<4x8x8xbf16>, vector<4x8x8xf32> -> vector<4x8x8xf32>
    "tpu.trace_stop"() : () -> ()
    %37 = tpu.transpose %36, [1, 0, 2] : vector<4x8x8xf32> -> vector<8x4x8xf32>
    %38 = vector.shape_cast %37 : vector<8x4x8xf32> to vector<8x32xf32>
    %39 = arith.truncf %38 : vector<8x32xf32> to vector<8x32xbf16>
    %c0_15 = arith.constant 0 : index
    %c0_16 = arith.constant 0 : index
    %c0_17 = arith.constant 0 : index
    %40 = vector.load %arg4[%c0_15, %c0_16, %c0_17] : memref<1x8x32xbf16, #tpu.memory_space<vmem>>, vector<1x8x32xbf16>
    %41 = vector.shape_cast %40 : vector<1x8x32xbf16> to vector<8x32xbf16>
    %42 = vector.shape_cast %39 : vector<8x32xbf16> to vector<1x8x32xbf16>
    tpu.vector_store %arg4[%c0_15, %c0_16, %c0_17], %42 {strides = array<i32>} : memref<1x8x32xbf16, #tpu.memory_space<vmem>>, vector<1x8x32xbf16>,
    return
  }
  func.func @transform_0(%arg0: i32) -> (i32, i32, i32) {
    %c0_i32 = arith.constant 0 : i32
    %c0_i32_0 = arith.constant 0 : i32
    %c0_i32_1 = arith.constant 0 : i32
    return %arg0, %c0_i32, %c0_i32_0 : i32, i32, i32
  }
  func.func @transform_1(%arg0: i32) -> (i32, i32, i32) {
    %c0_i32 = arith.constant 0 : i32
    %c0_i32_0 = arith.constant 0 : i32
    %c0_i32_1 = arith.constant 0 : i32
    return %arg0, %c0_i32, %c0_i32_0 : i32, i32, i32
  }
  func.func @transform_2(%arg0: i32) -> (i32, i32, i32) {
    %c0_i32 = arith.constant 0 : i32
    %c0_i32_0 = arith.constant 0 : i32
    %c0_i32_1 = arith.constant 0 : i32
    return %arg0, %c0_i32, %c0_i32_0 : i32, i32, i32
  }
  func.func @transform_3(%arg0: i32) -> (i32, i32, i32) {
    %c0_i32 = arith.constant 0 : i32
    %c0_i32_0 = arith.constant 0 : i32
    %c0_i32_1 = arith.constant 0 : i32
    return %arg0, %c0_i32, %c0_i32_0 : i32, i32, i32
  }
}

module attributes {stable_mosaic.version = 11 : i64} {
  func.func @_ffn_ln_kernel(%arg0: i32, %arg1: i32, %arg2: memref<16x32xbf16, #tpu.memory_space<vmem>>, %arg3: memref<32x64xbf16, #tpu.memory_space<vmem>>, %arg4: memref<1x64xf32, #tpu.memory_space<vmem>>, %arg5: memref<64x32xbf16, #tpu.memory_space<vmem>>, %arg6: memref<1x32xf32, #tpu.memory_space<vmem>>, %arg7: memref<1x32xf32, #tpu.memory_space<vmem>>, %arg8: memref<1x32xf32, #tpu.memory_space<vmem>>, %arg9: memref<16x32xbf16, #tpu.memory_space<vmem>>) attributes {dimension_semantics = [#tpu.dimension_semantics<parallel>, #tpu.dimension_semantics<arbitrary>], iteration_bounds = array<i64: 1, 1>, scalar_prefetch = 0 : i64, scratch_operands = 0 : i64, tpu.core_type = #tpu.core_type<tc>, window_params = [{transform_indices = @transform_0, window_bounds = array<i64: 16, 32>}, {transform_indices = @transform_1, window_bounds = array<i64: 32, 64>}, {transform_indices = @transform_2, window_bounds = array<i64: 1, 64>}, {transform_indices = @transform_3, window_bounds = array<i64: 64, 32>}, {pipeline_mode = #tpu.pipeline_mode<synchronous>, transform_indices = @transform_4, window_bounds = array<i64: 1, 32>}, {pipeline_mode = #tpu.pipeline_mode<synchronous>, transform_indices = @transform_5, window_bounds = array<i64: 1, 32>}, {pipeline_mode = #tpu.pipeline_mode<synchronous>, transform_indices = @transform_6, window_bounds = array<i64: 1, 32>}, {transform_indices = @transform_7, window_bounds = array<i64: 16, 32>}]} {
    %c0 = arith.constant 0 : index
    %c0_0 = arith.constant 0 : index
    %0 = vector.load %arg2[%c0, %c0_0] : memref<16x32xbf16, #tpu.memory_space<vmem>>, vector<16x32xbf16>
    %c0_1 = arith.constant 0 : index
    %c0_2 = arith.constant 0 : index
    %1 = vector.load %arg3[%c0_1, %c0_2] : memref<32x64xbf16, #tpu.memory_space<vmem>>, vector<32x64xbf16>
    %cst = arith.constant dense<0.000000e+00> : vector<16x64xf32>
    %2 = tpu.matmul %0, %1, %cst {dimension_numbers = #tpu.dot_dimension_numbers<[1], [0], [0], [1], [0, 0, 1, 1], [], []>} : vector<16x32xbf16>, vector<32x64xbf16>, vector<16x64xf32> -> vector<16x64xf32>
    %c0_3 = arith.constant 0 : index
    %c0_4 = arith.constant 0 : index
    %3 = vector.load %arg4[%c0_3, %c0_4] : memref<1x64xf32, #tpu.memory_space<vmem>>, vector<1x64xf32>
    %4 = vector.broadcast %3 : vector<1x64xf32> to vector<16x64xf32>
    %5 = arith.addf %2, %4 : vector<16x64xf32>
    %cst_5 = arith.constant 0.000000e+00 : f32
    %6 = vector.broadcast %cst_5 : f32 to vector<16x64xf32>
    %7 = arith.maximumf %5, %6 : vector<16x64xf32>
    %8 = arith.truncf %7 : vector<16x64xf32> to vector<16x64xbf16>
    %c0_6 = arith.constant 0 : index
    %c0_7 = arith.constant 0 : index
    %9 = vector.load %arg5[%c0_6, %c0_7] : memref<64x32xbf16, #tpu.memory_space<vmem>>, vector<64x32xbf16>
    %cst_8 = arith.constant dense<0.000000e+00> : vector<16x32xf32>
    %10 = tpu.matmul %8, %9, %cst_8 {dimension_numbers = #tpu.dot_dimension_numbers<[1], [0], [0], [1], [0, 0, 1, 1], [], []>} : vector<16x64xbf16>, vector<64x32xbf16>, vector<16x32xf32> -> vector<16x32xf32>
    %c0_9 = arith.constant 0 : index
    %c0_10 = arith.constant 0 : index
    %11 = vector.load %arg6[%c0_9, %c0_10] : memref<1x32xf32, #tpu.memory_space<vmem>>, vector<1x32xf32>
    %12 = vector.broadcast %11 : vector<1x32xf32> to vector<16x32xf32>
    %13 = arith.addf %10, %12 : vector<16x32xf32>
    %c0_11 = arith.constant 0 : index
    %c0_12 = arith.constant 0 : index
    %14 = vector.load %arg2[%c0_11, %c0_12] : memref<16x32xbf16, #tpu.memory_space<vmem>>, vector<16x32xbf16>
    %15 = arith.extf %14 : vector<16x32xbf16> to vector<16x32xf32>
    %16 = arith.addf %13, %15 : vector<16x32xf32>
    %cst_13 = arith.constant dense<0.000000e+00> : vector<16xf32>
    %17 = vector.multi_reduction <add>, %16, %cst_13 [1] : vector<16x32xf32> to vector<16xf32>
    %18 = vector.shape_cast %17 : vector<16xf32> to vector<16x1xf32>
    %cst_14 = arith.constant 3.200000e+01 : f32
    %19 = vector.broadcast %cst_14 : f32 to vector<16x1xf32>
    %20 = arith.divf %18, %19 : vector<16x1xf32>
    %21 = vector.broadcast %20 : vector<16x1xf32> to vector<16x32xf32>
    %22 = arith.subf %16, %21 : vector<16x32xf32>
    %23 = arith.mulf %22, %22 : vector<16x32xf32>
    %cst_15 = arith.constant dense<0.000000e+00> : vector<16xf32>
    %24 = vector.multi_reduction <add>, %23, %cst_15 [1] : vector<16x32xf32> to vector<16xf32>
    %25 = vector.shape_cast %24 : vector<16xf32> to vector<16x1xf32>
    %cst_16 = arith.constant 3.200000e+01 : f32
    %26 = vector.broadcast %cst_16 : f32 to vector<16x1xf32>
    %27 = arith.divf %25, %26 : vector<16x1xf32>
    %28 = vector.broadcast %20 : vector<16x1xf32> to vector<16x32xf32>
    %29 = arith.subf %16, %28 : vector<16x32xf32>
    %cst_17 = arith.constant 9.99999974E-6 : f32
    %30 = vector.broadcast %cst_17 : f32 to vector<16x1xf32>
    %31 = arith.addf %27, %30 : vector<16x1xf32>
    %32 = math.rsqrt %31 : vector<16x1xf32>
    %33 = vector.broadcast %32 : vector<16x1xf32> to vector<16x32xf32>
    %34 = arith.mulf %29, %33 : vector<16x32xf32>
    %c0_18 = arith.constant 0 : index
    %c0_19 = arith.constant 0 : index
    %35 = vector.load %arg7[%c0_18, %c0_19] : memref<1x32xf32, #tpu.memory_space<vmem>>, vector<1x32xf32>
    %36 = vector.broadcast %35 : vector<1x32xf32> to vector<16x32xf32>
    %37 = arith.mulf %34, %36 : vector<16x32xf32>
    %c0_20 = arith.constant 0 : index
    %c0_21 = arith.constant 0 : index
    %38 = vector.load %arg8[%c0_20, %c0_21] : memref<1x32xf32, #tpu.memory_space<vmem>>, vector<1x32xf32>
    %39 = vector.broadcast %38 : vector<1x32xf32> to vector<16x32xf32>
    %40 = arith.addf %37, %39 : vector<16x32xf32>
    %41 = arith.truncf %40 : vector<16x32xf32> to vector<16x32xbf16>
    %c0_22 = arith.constant 0 : index
    %c0_23 = arith.constant 0 : index
    %42 = vector.load %arg9[%c0_22, %c0_23] : memref<16x32xbf16, #tpu.memory_space<vmem>>, vector<16x32xbf16>
    tpu.vector_store %arg9[%c0_22, %c0_23], %41 {strides = array<i32>} : memref<16x32xbf16, #tpu.memory_space<vmem>>, vector<16x32xbf16>,
    return
  }
  func.func @transform_0(%arg0: i32, %arg1: i32) -> (i32, i32) {
    %c0_i32 = arith.constant 0 : i32
    %c0_i32_0 = arith.constant 0 : i32
    return %arg0, %c0_i32 : i32, i32
  }
  func.func @transform_1(%arg0: i32, %arg1: i32) -> (i32, i32) {
    %c0_i32 = arith.constant 0 : i32
    %c0_i32_0 = arith.constant 0 : i32
    return %c0_i32, %arg1 : i32, i32
  }
  func.func @transform_2(%arg0: i32, %arg1: i32) -> (i32, i32) {
    %c0_i32 = arith.constant 0 : i32
    %c0_i32_0 = arith.constant 0 : i32
    return %c0_i32, %arg1 : i32, i32
  }
  func.func @transform_3(%arg0: i32, %arg1: i32) -> (i32, i32) {
    %c0_i32 = arith.constant 0 : i32
    %c0_i32_0 = arith.constant 0 : i32
    return %arg1, %c0_i32 : i32, i32
  }
  func.func @transform_4(%arg0: i32, %arg1: i32) -> (i32, i32) {
    %c0_i32 = arith.constant 0 : i32
    %c0_i32_0 = arith.constant 0 : i32
    %c0_i32_1 = arith.constant 0 : i32
    return %c0_i32, %c0_i32_0 : i32, i32
  }
  func.func @transform_5(%arg0: i32, %arg1: i32) -> (i32, i32) {
    %c0_i32 = arith.constant 0 : i32
    %c0_i32_0 = arith.constant 0 : i32
    %c0_i32_1 = arith.constant 0 : i32
    return %c0_i32, %c0_i32_0 : i32, i32
  }
  func.func @transform_6(%arg0: i32, %arg1: i32) -> (i32, i32) {
    %c0_i32 = arith.constant 0 : i32
    %c0_i32_0 = arith.constant 0 : i32
    %c0_i32_1 = arith.constant 0 : i32
    return %c0_i32, %c0_i32_0 : i32, i32
  }
  func.func @transform_7(%arg0: i32, %arg1: i32) -> (i32, i32) {
    %c0_i32 = arith.constant 0 : i32
    %c0_i32_0 = arith.constant 0 : i32
    return %arg0, %c0_i32 : i32, i32
  }
}

module attributes {stable_mosaic.version = 11 : i64} {
  func.func @_linear_kernel(%arg0: i32, %arg1: i32, %arg2: i32, %arg3: memref<16x32xbf16, #tpu.memory_space<vmem>>, %arg4: memref<32x32xbf16, #tpu.memory_space<vmem>>, %arg5: memref<1x32xf32, #tpu.memory_space<vmem>>, %arg6: memref<16x32xbf16, #tpu.memory_space<vmem>>, %arg7: memref<1x32xf32, #tpu.memory_space<vmem>>, %arg8: memref<1x32xf32, #tpu.memory_space<vmem>>, %arg9: memref<16x32xbf16, #tpu.memory_space<vmem>>) attributes {dimension_semantics = [#tpu.dimension_semantics<parallel>, #tpu.dimension_semantics<parallel>, #tpu.dimension_semantics<arbitrary>], iteration_bounds = array<i64: 1, 1, 1>, scalar_prefetch = 0 : i64, scratch_operands = 0 : i64, tpu.core_type = #tpu.core_type<tc>, window_params = [{transform_indices = @transform_0, window_bounds = array<i64: 16, 32>}, {transform_indices = @transform_1, window_bounds = array<i64: 32, 32>}, {transform_indices = @transform_2, window_bounds = array<i64: 1, 32>}, {transform_indices = @transform_3, window_bounds = array<i64: 16, 32>}, {transform_indices = @transform_4, window_bounds = array<i64: 1, 32>}, {transform_indices = @transform_5, window_bounds = array<i64: 1, 32>}, {transform_indices = @transform_6, window_bounds = array<i64: 16, 32>}]} {
    %c0 = arith.constant 0 : index
    %c0_0 = arith.constant 0 : index
    %0 = vector.load %arg3[%c0, %c0_0] : memref<16x32xbf16, #tpu.memory_space<vmem>>, vector<16x32xbf16>
    %c0_1 = arith.constant 0 : index
    %c0_2 = arith.constant 0 : index
    %1 = vector.load %arg4[%c0_1, %c0_2] : memref<32x32xbf16, #tpu.memory_space<vmem>>, vector<32x32xbf16>
    %cst = arith.constant dense<0.000000e+00> : vector<16x32xf32>
    %2 = tpu.matmul %0, %1, %cst {dimension_numbers = #tpu.dot_dimension_numbers<[1], [0], [0], [1], [0, 0, 1, 1], [], []>} : vector<16x32xbf16>, vector<32x32xbf16>, vector<16x32xf32> -> vector<16x32xf32>
    %c0_3 = arith.constant 0 : index
    %c0_4 = arith.constant 0 : index
    %3 = vector.load %arg5[%c0_3, %c0_4] : memref<1x32xf32, #tpu.memory_space<vmem>>, vector<1x32xf32>
    %4 = vector.broadcast %3 : vector<1x32xf32> to vector<16x32xf32>
    %5 = arith.addf %2, %4 : vector<16x32xf32>
    %c0_5 = arith.constant 0 : index
    %c0_6 = arith.constant 0 : index
    %6 = vector.load %arg6[%c0_5, %c0_6] : memref<16x32xbf16, #tpu.memory_space<vmem>>, vector<16x32xbf16>
    %7 = arith.extf %6 : vector<16x32xbf16> to vector<16x32xf32>
    %8 = arith.addf %5, %7 : vector<16x32xf32>
    %cst_7 = arith.constant dense<0.000000e+00> : vector<16xf32>
    %9 = vector.multi_reduction <add>, %8, %cst_7 [1] : vector<16x32xf32> to vector<16xf32>
    %10 = vector.shape_cast %9 : vector<16xf32> to vector<16x1xf32>
    %cst_8 = arith.constant 3.200000e+01 : f32
    %11 = vector.broadcast %cst_8 : f32 to vector<16x1xf32>
    %12 = arith.divf %10, %11 : vector<16x1xf32>
    %13 = vector.broadcast %12 : vector<16x1xf32> to vector<16x32xf32>
    %14 = arith.subf %8, %13 : vector<16x32xf32>
    %15 = arith.mulf %14, %14 : vector<16x32xf32>
    %cst_9 = arith.constant dense<0.000000e+00> : vector<16xf32>
    %16 = vector.multi_reduction <add>, %15, %cst_9 [1] : vector<16x32xf32> to vector<16xf32>
    %17 = vector.shape_cast %16 : vector<16xf32> to vector<16x1xf32>
    %cst_10 = arith.constant 3.200000e+01 : f32
    %18 = vector.broadcast %cst_10 : f32 to vector<16x1xf32>
    %19 = arith.divf %17, %18 : vector<16x1xf32>
    %20 = vector.broadcast %12 : vector<16x1xf32> to vector<16x32xf32>
    %21 = arith.subf %8, %20 : vector<16x32xf32>
    %cst_11 = arith.constant 9.99999974E-6 : f32
    %22 = vector.broadcast %cst_11 : f32 to vector<16x1xf32>
    %23 = arith.addf %19, %22 : vector<16x1xf32>
    %24 = math.rsqrt %23 : vector<16x1xf32>
    %25 = vector.broadcast %24 : vector<16x1xf32> to vector<16x32xf32>
    %26 = arith.mulf %21, %25 : vector<16x32xf32>
    %c0_12 = arith.constant 0 : index
    %c0_13 = arith.constant 0 : index
    %27 = vector.load %arg7[%c0_12, %c0_13] : memref<1x32xf32, #tpu.memory_space<vmem>>, vector<1x32xf32>
    %28 = vector.broadcast %27 : vector<1x32xf32> to vector<16x32xf32>
    %29 = arith.mulf %26, %28 : vector<16x32xf32>
    %c0_14 = arith.constant 0 : index
    %c0_15 = arith.constant 0 : index
    %30 = vector.load %arg8[%c0_14, %c0_15] : memref<1x32xf32, #tpu.memory_space<vmem>>, vector<1x32xf32>
    %31 = vector.broadcast %30 : vector<1x32xf32> to vector<16x32xf32>
    %32 = arith.addf %29, %31 : vector<16x32xf32>
    %33 = arith.truncf %32 : vector<16x32xf32> to vector<16x32xbf16>
    %c0_16 = arith.constant 0 : index
    %c0_17 = arith.constant 0 : index
    %34 = vector.load %arg9[%c0_16, %c0_17] : memref<16x32xbf16, #tpu.memory_space<vmem>>, vector<16x32xbf16>
    tpu.vector_store %arg9[%c0_16, %c0_17], %33 {strides = array<i32>} : memref<16x32xbf16, #tpu.memory_space<vmem>>, vector<16x32xbf16>,
    return
  }
  func.func @transform_0(%arg0: i32, %arg1: i32, %arg2: i32) -> (i32, i32) {
    %c0_i32 = arith.constant 0 : i32
    return %arg0, %arg2 : i32, i32
  }
  func.func @transform_1(%arg0: i32, %arg1: i32, %arg2: i32) -> (i32, i32) {
    %c0_i32 = arith.constant 0 : i32
    return %arg2, %arg1 : i32, i32
  }
  func.func @transform_2(%arg0: i32, %arg1: i32, %arg2: i32) -> (i32, i32) {
    %c0_i32 = arith.constant 0 : i32
    %c0_i32_0 = arith.constant 0 : i32
    return %c0_i32, %arg1 : i32, i32
  }
  func.func @transform_3(%arg0: i32, %arg1: i32, %arg2: i32) -> (i32, i32) {
    %c0_i32 = arith.constant 0 : i32
    return %arg0, %arg1 : i32, i32
  }
  func.func @transform_4(%arg0: i32, %arg1: i32, %arg2: i32) -> (i32, i32) {
    %c0_i32 = arith.constant 0 : i32
    %c0_i32_0 = arith.constant 0 : i32
    return %c0_i32, %arg1 : i32, i32
  }
  func.func @transform_5(%arg0: i32, %arg1: i32, %arg2: i32) -> (i32, i32) {
    %c0_i32 = arith.constant 0 : i32
    %c0_i32_0 = arith.constant 0 : i32
    return %c0_i32, %arg1 : i32, i32
  }
  func.func @transform_6(%arg0: i32, %arg1: i32, %arg2: i32) -> (i32, i32) {
    %c0_i32 = arith.constant 0 : i32
    return %arg0, %arg1 : i32, i32
  }
}

module attributes {stable_mosaic.version = 11 : i64} {
  func.func @_linear_kernel(%arg0: i32, %arg1: i32, %arg2: i32, %arg3: memref<16x32xbf16, #tpu.memory_space<vmem>>, %arg4: memref<32x96xbf16, #tpu.memory_space<vmem>>, %arg5: memref<1x96xf32, #tpu.memory_space<vmem>>, %arg6: memref<16x96xbf16, #tpu.memory_space<vmem>>) attributes {dimension_semantics = [#tpu.dimension_semantics<parallel>, #tpu.dimension_semantics<parallel>, #tpu.dimension_semantics<arbitrary>], iteration_bounds = array<i64: 1, 1, 1>, scalar_prefetch = 0 : i64, scratch_operands = 0 : i64, tpu.core_type = #tpu.core_type<tc>, window_params = [{transform_indices = @transform_0, window_bounds = array<i64: 16, 32>}, {transform_indices = @transform_1, window_bounds = array<i64: 32, 96>}, {transform_indices = @transform_2, window_bounds = array<i64: 1, 96>}, {transform_indices = @transform_3, window_bounds = array<i64: 16, 96>}]} {
    %c0 = arith.constant 0 : index
    %c0_0 = arith.constant 0 : index
    %0 = vector.load %arg3[%c0, %c0_0] : memref<16x32xbf16, #tpu.memory_space<vmem>>, vector<16x32xbf16>
    %c0_1 = arith.constant 0 : index
    %c0_2 = arith.constant 0 : index
    %1 = vector.load %arg4[%c0_1, %c0_2] : memref<32x96xbf16, #tpu.memory_space<vmem>>, vector<32x96xbf16>
    %cst = arith.constant dense<0.000000e+00> : vector<16x96xf32>
    %2 = tpu.matmul %0, %1, %cst {dimension_numbers = #tpu.dot_dimension_numbers<[1], [0], [0], [1], [0, 0, 1, 1], [], []>} : vector<16x32xbf16>, vector<32x96xbf16>, vector<16x96xf32> -> vector<16x96xf32>
    %c0_3 = arith.constant 0 : index
    %c0_4 = arith.constant 0 : index
    %3 = vector.load %arg5[%c0_3, %c0_4] : memref<1x96xf32, #tpu.memory_space<vmem>>, vector<1x96xf32>
    %4 = vector.broadcast %3 : vector<1x96xf32> to vector<16x96xf32>
    %5 = arith.addf %2, %4 : vector<16x96xf32>
    %6 = arith.truncf %5 : vector<16x96xf32> to vector<16x96xbf16>
    %c0_5 = arith.constant 0 : index
    %c0_6 = arith.constant 0 : index
    %7 = vector.load %arg6[%c0_5, %c0_6] : memref<16x96xbf16, #tpu.memory_space<vmem>>, vector<16x96xbf16>
    tpu.vector_store %arg6[%c0_5, %c0_6], %6 {strides = array<i32>} : memref<16x96xbf16, #tpu.memory_space<vmem>>, vector<16x96xbf16>,
    return
  }
  func.func @transform_0(%arg0: i32, %arg1: i32, %arg2: i32) -> (i32, i32) {
    %c0_i32 = arith.constant 0 : i32
    return %arg0, %arg2 : i32, i32
  }
  func.func @transform_1(%arg0: i32, %arg1: i32, %arg2: i32) -> (i32, i32) {
    %c0_i32 = arith.constant 0 : i32
    return %arg2, %arg1 : i32, i32
  }
  func.func @transform_2(%arg0: i32, %arg1: i32, %arg2: i32) -> (i32, i32) {
    %c0_i32 = arith.constant 0 : i32
    %c0_i32_0 = arith.constant 0 : i32
    return %c0_i32, %arg1 : i32, i32
  }
  func.func @transform_3(%arg0: i32, %arg1: i32, %arg2: i32) -> (i32, i32) {
    %c0_i32 = arith.constant 0 : i32
    return %arg0, %arg1 : i32, i32
  }
}

module attributes {stable_mosaic.version = 11 : i64} {
  func.func @_linear_kernel(%arg0: i32, %arg1: i32, %arg2: i32, %arg3: memref<16x32xbf16, #tpu.memory_space<vmem>>, %arg4: memref<32x32xbf16, #tpu.memory_space<vmem>>, %arg5: memref<1x32xf32, #tpu.memory_space<vmem>>, %arg6: memref<16x32xbf16, #tpu.memory_space<vmem>>) attributes {dimension_semantics = [#tpu.dimension_semantics<parallel>, #tpu.dimension_semantics<parallel>, #tpu.dimension_semantics<arbitrary>], iteration_bounds = array<i64: 1, 1, 1>, scalar_prefetch = 0 : i64, scratch_operands = 0 : i64, tpu.core_type = #tpu.core_type<tc>, window_params = [{transform_indices = @transform_0, window_bounds = array<i64: 16, 32>}, {transform_indices = @transform_1, window_bounds = array<i64: 32, 32>}, {transform_indices = @transform_2, window_bounds = array<i64: 1, 32>}, {transform_indices = @transform_3, window_bounds = array<i64: 16, 32>}]} {
    %c0 = arith.constant 0 : index
    %c0_0 = arith.constant 0 : index
    %0 = vector.load %arg3[%c0, %c0_0] : memref<16x32xbf16, #tpu.memory_space<vmem>>, vector<16x32xbf16>
    %c0_1 = arith.constant 0 : index
    %c0_2 = arith.constant 0 : index
    %1 = vector.load %arg4[%c0_1, %c0_2] : memref<32x32xbf16, #tpu.memory_space<vmem>>, vector<32x32xbf16>
    %cst = arith.constant dense<0.000000e+00> : vector<16x32xf32>
    %2 = tpu.matmul %0, %1, %cst {dimension_numbers = #tpu.dot_dimension_numbers<[1], [0], [0], [1], [0, 0, 1, 1], [], []>} : vector<16x32xbf16>, vector<32x32xbf16>, vector<16x32xf32> -> vector<16x32xf32>
    %c0_3 = arith.constant 0 : index
    %c0_4 = arith.constant 0 : index
    %3 = vector.load %arg5[%c0_3, %c0_4] : memref<1x32xf32, #tpu.memory_space<vmem>>, vector<1x32xf32>
    %4 = vector.broadcast %3 : vector<1x32xf32> to vector<16x32xf32>
    %5 = arith.addf %2, %4 : vector<16x32xf32>
    %6 = arith.truncf %5 : vector<16x32xf32> to vector<16x32xbf16>
    %c0_5 = arith.constant 0 : index
    %c0_6 = arith.constant 0 : index
    %7 = vector.load %arg6[%c0_5, %c0_6] : memref<16x32xbf16, #tpu.memory_space<vmem>>, vector<16x32xbf16>
    tpu.vector_store %arg6[%c0_5, %c0_6], %6 {strides = array<i32>} : memref<16x32xbf16, #tpu.memory_space<vmem>>, vector<16x32xbf16>,
    return
  }
  func.func @transform_0(%arg0: i32, %arg1: i32, %arg2: i32) -> (i32, i32) {
    %c0_i32 = arith.constant 0 : i32
    return %arg0, %arg2 : i32, i32
  }
  func.func @transform_1(%arg0: i32, %arg1: i32, %arg2: i32) -> (i32, i32) {
    %c0_i32 = arith.constant 0 : i32
    return %arg2, %arg1 : i32, i32
  }
  func.func @transform_2(%arg0: i32, %arg1: i32, %arg2: i32) -> (i32, i32) {
    %c0_i32 = arith.constant 0 : i32
    %c0_i32_0 = arith.constant 0 : i32
    return %c0_i32, %arg1 : i32, i32
  }
  func.func @transform_3(%arg0: i32, %arg1: i32, %arg2: i32) -> (i32, i32) {
    %c0_i32 = arith.constant 0 : i32
    return %arg0, %arg1 : i32, i32
  }
}

module attributes {stable_mosaic.version = 11 : i64} {
  func.func @_linear_kernel(%arg0: i32, %arg1: i32, %arg2: i32, %arg3: memref<16x32xbf16, #tpu.memory_space<vmem>>, %arg4: memref<32x32xbf16, #tpu.memory_space<vmem>>, %arg5: memref<1x32xf32, #tpu.memory_space<vmem>>, %arg6: memref<16x32xf32, #tpu.memory_space<vmem>>) attributes {dimension_semantics = [#tpu.dimension_semantics<parallel>, #tpu.dimension_semantics<parallel>, #tpu.dimension_semantics<arbitrary>], iteration_bounds = array<i64: 1, 1, 1>, scalar_prefetch = 0 : i64, scratch_operands = 0 : i64, tpu.core_type = #tpu.core_type<tc>, window_params = [{transform_indices = @transform_0, window_bounds = array<i64: 16, 32>}, {transform_indices = @transform_1, window_bounds = array<i64: 32, 32>}, {transform_indices = @transform_2, window_bounds = array<i64: 1, 32>}, {transform_indices = @transform_3, window_bounds = array<i64: 16, 32>}]} {
    %c0 = arith.constant 0 : index
    %c0_0 = arith.constant 0 : index
    %0 = vector.load %arg3[%c0, %c0_0] : memref<16x32xbf16, #tpu.memory_space<vmem>>, vector<16x32xbf16>
    %c0_1 = arith.constant 0 : index
    %c0_2 = arith.constant 0 : index
    %1 = vector.load %arg4[%c0_1, %c0_2] : memref<32x32xbf16, #tpu.memory_space<vmem>>, vector<32x32xbf16>
    %cst = arith.constant dense<0.000000e+00> : vector<16x32xf32>
    %2 = tpu.matmul %0, %1, %cst {dimension_numbers = #tpu.dot_dimension_numbers<[1], [0], [0], [1], [0, 0, 1, 1], [], []>} : vector<16x32xbf16>, vector<32x32xbf16>, vector<16x32xf32> -> vector<16x32xf32>
    %c0_3 = arith.constant 0 : index
    %c0_4 = arith.constant 0 : index
    %3 = vector.load %arg5[%c0_3, %c0_4] : memref<1x32xf32, #tpu.memory_space<vmem>>, vector<1x32xf32>
    %4 = vector.broadcast %3 : vector<1x32xf32> to vector<16x32xf32>
    %5 = arith.addf %2, %4 : vector<16x32xf32>
    %c0_5 = arith.constant 0 : index
    %c0_6 = arith.constant 0 : index
    %6 = vector.load %arg6[%c0_5, %c0_6] : memref<16x32xf32, #tpu.memory_space<vmem>>, vector<16x32xf32>
    tpu.vector_store %arg6[%c0_5, %c0_6], %5 {strides = array<i32>} : memref<16x32xf32, #tpu.memory_space<vmem>>, vector<16x32xf32>,
    return
  }
  func.func @transform_0(%arg0: i32, %arg1: i32, %arg2: i32) -> (i32, i32) {
    %c0_i32 = arith.constant 0 : i32
    return %arg0, %arg2 : i32, i32
  }
  func.func @transform_1(%arg0: i32, %arg1: i32, %arg2: i32) -> (i32, i32) {
    %c0_i32 = arith.constant 0 : i32
    return %arg2, %arg1 : i32, i32
  }
  func.func @transform_2(%arg0: i32, %arg1: i32, %arg2: i32) -> (i32, i32) {
    %c0_i32 = arith.constant 0 : i32
    %c0_i32_0 = arith.constant 0 : i32
    return %c0_i32, %arg1 : i32, i32
  }
  func.func @transform_3(%arg0: i32, %arg1: i32, %arg2: i32) -> (i32, i32) {
    %c0_i32 = arith.constant 0 : i32
    return %arg0, %arg1 : i32, i32
  }
}

</mosaic_0001>

<bundles_post_ra>
// kernel: transformer_forward.25
= control target key start
LH: loop header
LB: loop body
LE: loop exit
PB: predicated region body
PF: predicated region fallthrough
CT: control target
= control target key end

     0   :  { %vm42_vm0 = vcmask 261120   ;;  %vm62_vm1 = vcmask 781312   ;;  %s124_s1 = inlined_call_operand.vmem [shape: bf16[32,96], index: 1, kind: input, shape index: {}]   ;;  %s125_s2 = inlined_call_operand.vmem [shape: f32[1,96], index: 2, kind: input, shape index: {}]   ;;  %s126_s0 = inlined_call_operand.vmem [shape: bf16[16,32], index: 0, kind: input, shape index: {}]   ;;  %s127_s3 = inlined_call_operand.vmem [shape: bf16[16,96], index: 3, kind: output, shape index: {}]  }
   0x1   :  { %v84_v0 = vld [vmem:[%s124_s1 + $0x8] sm:$0xff]  ;;  %v83_v1 = vld [vmem:[%s124_s1] sm:$0xff] }
   0x2   :  { %52 = vmatpush.bf16.msra.mxu0 %v84_v0  ;;  %v82_v2 = vld [vmem:[%s126_s0] sm:$0xff] }
   0x3   :  { %v85_v3 = vld [vmem:[%s125_s2] ss:$0 sm:$0xff] }
   0x6   :  { %53 = vmatpush.bf16.msra.mxu0 %v83_v1 }
   0x9   :  { %81 = vmatmul.msk.bf16.vlgmr.msra.gmra.mxu0 %vm42_vm0, %v82_v2 }
  0x86   :  { %v55_v4 = vpop.f32.mrf.mxu0 }
  0x87   :  { %v56_v5 = vadd.f32 %v85_v3, %v55_v4 }
  0x89   :  { %v60_v6 = vpack.c.bf16 %v56_v5, %v56_v5 }
  0x8b   :  { %63 = vst.msk [vmem:[%s127_s3] sm:$0xf] %vm62_vm1, %v60_v6 }
  0x8e   :  { %v57_v7 = vpop.f32.mrf.mxu0 }
  0x8f   :  { %v58_v8 = vadd.f32 %v85_v3, %v57_v7 }
  0x91   :  { %v61_v9 = vpack.c.bf16 %v58_v8, %v58_v8 }
  0x93   :  { %64 = vst.msk [vmem:[%s127_s3 + $0x4] sm:$0xf] %vm62_vm1, %v61_v9 }

// kernel: transformer_forward.27
= control target key start
LH: loop header
LB: loop body
LE: loop exit
PB: predicated region body
PF: predicated region fallthrough
CT: control target
= control target key end

     0   :  { %vm51_vm0 = vcmask 261120   ;;  %v177_v15 = vmov 32.0   ;;  %vm140_vm6 = vcmask 257024   ;;  %s245_s1 = inlined_call_operand.vmem [shape: bf16[32,32], index: 1, kind: input, shape index: {}]   ;;  %s246_s2 = inlined_call_operand.vmem [shape: f32[1,32], index: 2, kind: input, shape index: {}]   ;;  %s247_s0 = inlined_call_operand.vmem [shape: bf16[16,32], index: 0, kind: input, shape index: {}]   ;;  %s248_s3 = inlined_call_operand.vmem [shape: bf16[16,32], index: 3, kind: input, shape index: {}]   ;;  %s249_s4 = inlined_call_operand.vmem [shape: f32[1,32], index: 4, kind: input, shape index: {}]   ;;  %s250_s5 = inlined_call_operand.vmem [shape: f32[1,32], index: 5, kind: input, shape index: {}]   ;;  %s251_s6 = inlined_call_operand.vmem [shape: bf16[16,32], index: 6, kind: output, shape index: {}]  }
   0x1   :  { %v162_v0 = vld [vmem:[%s245_s1 + $0x8] sm:$0xff]  ;;  %v161_v1 = vld [vmem:[%s245_s1] sm:$0xff]  ;;  %171 = vrcp.f32 %v177_v15 }
   0x2   :  { %61 = vmatpush.bf16.msra.mxu0 %v162_v0  ;;  %v160_v2 = vld [vmem:[%s247_s0] sm:$0xff] }
   0x3   :  { %v164_v3 = vld [vmem:[%s248_s3] sm:$0xff]  }
   0x4   :  { %v168_v4 = vld [vmem:[%s246_s2] ss:$0 sm:$0xff]  ;;  %v165_v5 = vunpack.c.l.bf16 %v164_v3  ;;  %v166_v10 = vunpack.c.h.bf16 %v164_v3 }
   0x5   :  { %v169_v46 = vld [vmem:[%s249_s4] ss:$0 sm:$0xff] }
   0x6   :  { %62 = vmatpush.bf16.msra.mxu0 %v161_v1  ;;  %v170_v49 = vld [vmem:[%s250_s5] ss:$0 sm:$0xff] }
   0x7   :  { %v172_v16 = vpop.eup %171 }
   0x8   :  { %v82_v17 = vmul.f32 32.0, %v172_v16  ;;  %vm86_vm1 = vweird.f32 %v172_v16 }
   0x9   :  { %159 = vmatmul.msk.bf16.vlgmr.msra.gmra.mxu0 %vm51_vm0, %v160_v2 }
   0xa   :  { %v83_v18 = vsub.f32 1.0, %v82_v17 }
   0xc   :  { %v84_v19 = vmul.f32 %v172_v16, %v83_v18 }
   0xe   :  { %v85_v20 = vadd.f32 %v172_v16, %v84_v19 }
  0x10   :  { %v87_v21 = vsel %vm86_vm1, %v172_v16, %v85_v20 }
  0x86   :  { %v64_v6 = vpop.f32.mrf.mxu0 }
  0x87   :  { %v65_v7 = vadd.f32 %v168_v4, %v64_v6 }
  0x89   :  { %v73_v8 = vadd.f32 %v165_v5, %v65_v7 }
  0x8b   :  { %v75_v9 = vsel %vm51_vm0, %v73_v8, 0.0 }
  0x8c   :  { %76 = vadd.xlane.f32.xlu0 %v75_v9 }
  0x8e   :  { %v66_v11 = vpop.f32.mrf.mxu0 }
  0x8f   :  { %v67_v12 = vadd.f32 %v168_v4, %v66_v11 }
  0x91   :  { %v74_v13 = vadd.f32 %v166_v10, %v67_v12 }
  0x93   :  { %v78_v14 = vsel %vm51_vm0, %v74_v13, 0.0 }
  0x94   :  { %79 = vadd.xlane.f32.xlu0 %v78_v14 }
  0xff   :  { %v77_v22 = vpop.xlane.xlu0 %76 }
 0x100   :  { %v88_v23 = vmul.f32 %v87_v21, %v77_v22 }
 0x102   :  { %v90_v24 = vsub.f32 %v73_v8, %v88_v23 }
 0x104   :  { %v92_v25 = vmul.f32 %v90_v24, %v90_v24 }
 0x106   :  { %v94_v26 = vsel %vm51_vm0, %v92_v25, 0.0 }
 0x107   :  { %95 = vadd.xlane.f32.xlu1 %v94_v26  ;;  %v80_v27 = vpop.xlane.xlu0 %79 }
 0x108   :  { %v89_v28 = vmul.f32 %v87_v21, %v80_v27 }
 0x10a   :  { %v91_v29 = vsub.f32 %v74_v13, %v89_v28 }
 0x10c   :  { %v93_v30 = vmul.f32 %v91_v29, %v91_v29 }
 0x10e   :  { %v97_v31 = vsel %vm51_vm0, %v93_v30, 0.0 }
 0x10f   :  { %98 = vadd.xlane.f32.xlu1 %v97_v31 }
 0x17a   :  { %v96_v32 = vpop.xlane.xlu1 %95 }
 0x17b   :  { %v100_v33 = vmul.f32 %v96_v32, %v87_v21 }
 0x17d   :  { %v102_v34 = vadd.f32 1e-05, %v100_v33 }
 0x17f   :  { %173 = vrsqrt.f32 %v102_v34  ;;  %vm110_vm3 = vweird.f32 %v102_v34 }
 0x182   :  { %v99_v35 = vpop.xlane.xlu1 %98 }
 0x183   :  { %v101_v36 = vmul.f32 %v99_v35, %v87_v21 }
 0x185   :  { %v174_v37 = vpop.eup %173  ;;  %v103_v38 = vadd.f32 1e-05, %v101_v36 }
 0x186   :  { %v105_v39 = vmul.f32 %v174_v37, %v102_v34  ;;  %vm111_vm2 = vweird.f32 %v174_v37 }
 0x187   :  { %175 = vrsqrt.f32 %v103_v38  ;;  %vm112_vm4 = vmor %vm110_vm3, %vm111_vm2  ;;  %vm120_vm7 = vweird.f32 %v103_v38 }
 0x188   :  { %v106_v40 = vmul.f32 %v174_v37, %v105_v39 }
 0x18a   :  { %v107_v41 = vmul.f32 0.5, %v106_v40 }
 0x18c   :  { %v108_v42 = vsub.f32 1.5, %v107_v41 }
 0x18d   :  { %v176_v43 = vpop.eup %175 }
 0x18e   :  { %v109_v44 = vmul.f32 %v174_v37, %v108_v42  ;;  %v115_v45 = vmul.f32 %v176_v43, %v103_v38  ;;  %vm121_vm5 = vweird.f32 %v176_v43 }
 0x18f   :  { %vm122_vm8 = vmor %vm120_vm7, %vm121_vm5 }
 0x190   :  { %v113_v47 = vsel %vm112_vm4, %v174_v37, %v109_v44  ;;  %v116_v48 = vmul.f32 %v176_v43, %v115_v45 }
 0x191   :  { %v124_v50 = vmul.f32 %v113_v47, %v90_v24 }
 0x192   :  { %v117_v51 = vmul.f32 0.5, %v116_v48 }
 0x193   :  { %v130_v52 = vmul.f32 %v169_v46, %v124_v50 }
 0x194   :  { %v118_v53 = vsub.f32 1.5, %v117_v51 }
 0x195   :  { %v136_v54 = vadd.f32 %v170_v49, %v130_v52 }
 0x196   :  { %v119_v55 = vmul.f32 %v176_v43, %v118_v53 }
 0x197   :  { %v138_v56 = vpack.c.bf16 %v136_v54, %v136_v54 }
 0x198   :  { %v123_v57 = vsel %vm122_vm8, %v176_v43, %v119_v55 }
 0x199   :  { %141 = vst.msk [vmem:[%s251_s6] sm:$0xf] %vm140_vm6, %v138_v56  ;;  %v125_v58 = vmul.f32 %v123_v57, %v91_v29 }
 0x19b   :  { %v131_v59 = vmul.f32 %v169_v46, %v125_v58 }
 0x19d   :  { %v137_v60 = vadd.f32 %v170_v49, %v131_v59 }
 0x19f   :  { %v139_v61 = vpack.c.bf16 %v137_v60, %v137_v60 }
 0x1a1   :  { %142 = vst.msk [vmem:[%s251_s6 + $0x4] sm:$0xf] %vm140_vm6, %v139_v61 }

// kernel: transformer_forward.28
= control target key start
LH: loop header
LB: loop body
LE: loop exit
PB: predicated region body
PF: predicated region fallthrough
CT: control target
= control target key end

     0   :  { %vm54_vm0 = vcmask 261120   ;;  %vm111_vm1 = vcmask 523264   ;;  %v253_v27 = vmov 32.0   ;;  %vm198_vm7 = vcmask 257024   ;;  %s341_s1 = inlined_call_operand.vmem [shape: bf16[32,64], index: 1, kind: input, shape index: {}]   ;;  %s342_s2 = inlined_call_operand.vmem [shape: f32[1,64], index: 2, kind: input, shape index: {}]   ;;  %s343_s0 = inlined_call_operand.vmem [shape: bf16[16,32], index: 0, kind: input, shape index: {}]   ;;  %s344_s4 = inlined_call_operand.vmem [shape: f32[1,32], index: 4, kind: input, shape index: {}]   ;;  %s345_s3 = inlined_call_operand.vmem [shape: bf16[64,32], index: 3, kind: input, shape index: {}]   ;;  %s346_s5 = inlined_call_operand.vmem [shape: f32[1,32], index: 5, kind: input, shape index: {}]   ;;  %s347_s6 = inlined_call_operand.vmem [shape: f32[1,32], index: 6, kind: input, shape index: {}]   ;;  %s348_s7 = inlined_call_operand.vmem [shape: bf16[16,32], index: 7, kind: output, shape index: {}]  }
   0x1   :  { %v237_v0 = vld [vmem:[%s341_s1 + $0x8] sm:$0xff]  ;;  %v236_v1 = vld [vmem:[%s341_s1] sm:$0xff]  ;;  %v241_v3 = vld [vmem:[%s345_s3 + $0x18] sm:$0xff]  ;;  %247 = vrcp.f32 %v253_v27 }
   0x2   :  { %64 = vmatpush.bf16.msra.mxu0 %v237_v0  ;;  %v235_v2 = vld [vmem:[%s343_s0] sm:$0xff]  ;;  %119 = vmatpush.bf16.msra.mxu1 %v241_v3  ;;  %v240_v4 = vld [vmem:[%s345_s3 + $0x10] sm:$0xff]  ;;  %v239_v5 = vld [vmem:[%s345_s3 + $0x8] sm:$0xff] }
   0x3   :  { %v238_v6 = vld [vmem:[%s345_s3] sm:$0xff] }
   0x4   :  { %v243_v8 = vld [vmem:[%s342_s2] ss:$0 sm:$0xff] }
   0x5   :  { %v27_v15 = vld [vmem:[%s343_s0] sm:$0xff]  }
   0x6   :  { %65 = vmatpush.bf16.msra.mxu0 %v236_v1  ;;  %120 = vmatpush.bf16.msra.mxu1 %v240_v4  ;;  %v244_v16 = vld [vmem:[%s344_s4] ss:$0 sm:$0xff]  ;;  %v129_v17 = vunpack.c.l.bf16 %v27_v15  ;;  %v130_v22 = vunpack.c.h.bf16 %v27_v15 }
   0x7   :  { %v248_v28 = vpop.eup %247  ;;  %v245_v58 = vld [vmem:[%s346_s5] ss:$0 sm:$0xff] }
   0x8   :  { %v140_v29 = vmul.f32 32.0, %v248_v28  ;;  %vm144_vm2 = vweird.f32 %v248_v28  ;;  %v246_v61 = vld [vmem:[%s347_s6] ss:$0 sm:$0xff] }
   0x9   :  { %217 = vmatmul.msk.bf16.vlgmr.msra.gmra.mxu0 %vm54_vm0, %v235_v2 }
   0xa   :  { %121 = vmatpush.bf16.msra.mxu1 %v239_v5  ;;  %v141_v30 = vsub.f32 1.0, %v140_v29 }
   0xc   :  { %v142_v31 = vmul.f32 %v248_v28, %v141_v30 }
   0xe   :  { %122 = vmatpush.bf16.msra.mxu1 %v238_v6  ;;  %v143_v32 = vadd.f32 %v248_v28, %v142_v31 }
  0x10   :  { %v145_v33 = vsel %vm144_vm2, %v248_v28, %v143_v32 }
  0x86   :  { %v67_v7 = vpop.f32.mrf.mxu0 }
  0x87   :  { %v68_v9 = vadd.f32 %v243_v8, %v67_v7 }
  0x89   :  { %v72_v12 = vmax.f32 %v68_v9, 0.0 }
  0x8e   :  { %v69_v10 = vpop.f32.mrf.mxu0 }
  0x8f   :  { %v70_v11 = vadd.f32 %v243_v8, %v69_v10 }
  0x91   :  { %v73_v13 = vmax.f32 %v70_v11, 0.0 }
  0x93   :  { %v74_v14 = vpack.c.bf16 %v73_v13, %v72_v12 }
  0x95   :  { %234 = vmatmul.msk.bf16.vlgmr.msra.gmra.mxu1 %vm111_vm1, %v74_v14 }
 0x112   :  { %v124_v18 = vpop.f32.mrf.mxu1 }
 0x113   :  { %v125_v19 = vadd.f32 %v244_v16, %v124_v18 }
 0x115   :  { %v131_v20 = vadd.f32 %v129_v17, %v125_v19 }
 0x117   :  { %v133_v21 = vsel %vm54_vm0, %v131_v20, 0.0 }
 0x118   :  { %134 = vadd.xlane.f32.xlu0 %v133_v21 }
 0x11a   :  { %v126_v23 = vpop.f32.mrf.mxu1 }
 0x11b   :  { %v127_v24 = vadd.f32 %v244_v16, %v126_v23 }
 0x11d   :  { %v132_v25 = vadd.f32 %v130_v22, %v127_v24 }
 0x11f   :  { %v136_v26 = vsel %vm54_vm0, %v132_v25, 0.0 }
 0x120   :  { %137 = vadd.xlane.f32.xlu0 %v136_v26 }
 0x18b   :  { %v135_v34 = vpop.xlane.xlu0 %134 }
 0x18c   :  { %v146_v35 = vmul.f32 %v145_v33, %v135_v34 }
 0x18e   :  { %v148_v36 = vsub.f32 %v131_v20, %v146_v35 }
 0x190   :  { %v150_v37 = vmul.f32 %v148_v36, %v148_v36 }
 0x192   :  { %v152_v38 = vsel %vm54_vm0, %v150_v37, 0.0 }
 0x193   :  { %153 = vadd.xlane.f32.xlu1 %v152_v38  ;;  %v138_v39 = vpop.xlane.xlu0 %137 }
 0x194   :  { %v147_v40 = vmul.f32 %v145_v33, %v138_v39 }
 0x196   :  { %v149_v41 = vsub.f32 %v132_v25, %v147_v40 }
 0x198   :  { %v151_v42 = vmul.f32 %v149_v41, %v149_v41 }
 0x19a   :  { %v155_v43 = vsel %vm54_vm0, %v151_v42, 0.0 }
 0x19b   :  { %156 = vadd.xlane.f32.xlu1 %v155_v43 }
 0x206   :  { %v154_v44 = vpop.xlane.xlu1 %153 }
 0x207   :  { %v158_v45 = vmul.f32 %v154_v44, %v145_v33 }
 0x209   :  { %v160_v46 = vadd.f32 1e-05, %v158_v45 }
 0x20b   :  { %249 = vrsqrt.f32 %v160_v46  ;;  %vm168_vm4 = vweird.f32 %v160_v46 }
 0x20e   :  { %v157_v47 = vpop.xlane.xlu1 %156 }
 0x20f   :  { %v159_v48 = vmul.f32 %v157_v47, %v145_v33 }
 0x211   :  { %v250_v49 = vpop.eup %249  ;;  %v161_v50 = vadd.f32 1e-05, %v159_v48 }
 0x212   :  { %v163_v51 = vmul.f32 %v250_v49, %v160_v46  ;;  %vm169_vm3 = vweird.f32 %v250_v49 }
 0x213   :  { %251 = vrsqrt.f32 %v161_v50  ;;  %vm170_vm5 = vmor %vm168_vm4, %vm169_vm3  ;;  %vm178_vm8 = vweird.f32 %v161_v50 }
 0x214   :  { %v164_v52 = vmul.f32 %v250_v49, %v163_v51 }
 0x216   :  { %v165_v53 = vmul.f32 0.5, %v164_v52 }
 0x218   :  { %v166_v54 = vsub.f32 1.5, %v165_v53 }
 0x219   :  { %v252_v55 = vpop.eup %251 }
 0x21a   :  { %v167_v56 = vmul.f32 %v250_v49, %v166_v54  ;;  %v173_v57 = vmul.f32 %v252_v55, %v161_v50  ;;  %vm179_vm6 = vweird.f32 %v252_v55 }
 0x21b   :  { %vm180_vm9 = vmor %vm178_vm8, %vm179_vm6 }
 0x21c   :  { %v171_v59 = vsel %vm170_vm5, %v250_v49, %v167_v56  ;;  %v174_v60 = vmul.f32 %v252_v55, %v173_v57 }
 0x21d   :  { %v182_v62 = vmul.f32 %v171_v59, %v148_v36 }
 0x21e   :  { %v175_v63 = vmul.f32 0.5, %v174_v60 }
 0x21f   :  { %v188_v0 = vmul.f32 %v245_v58, %v182_v62 }
 0x220   :  { %v176_v1 = vsub.f32 1.5, %v175_v63 }
 0x221   :  { %v194_v2 = vadd.f32 %v246_v61, %v188_v0 }
 0x222   :  { %v177_v3 = vmul.f32 %v252_v55, %v176_v1 }
 0x223   :  { %v196_v4 = vpack.c.bf16 %v194_v2, %v194_v2 }
 0x224   :  { %v181_v5 = vsel %vm180_vm9, %v252_v55, %v177_v3 }
 0x225   :  { %199 = vst.msk [vmem:[%s348_s7] sm:$0xf] %vm198_vm7, %v196_v4  ;;  %v183_v6 = vmul.f32 %v181_v5, %v149_v41 }
 0x227   :  { %v189_v7 = vmul.f32 %v245_v58, %v183_v6 }
 0x229   :  { %v195_v8 = vadd.f32 %v246_v61, %v189_v7 }
 0x22b   :  { %v197_v9 = vpack.c.bf16 %v195_v8, %v195_v8 }
 0x22d   :  { %200 = vst.msk [vmem:[%s348_s7 + $0x4] sm:$0xf] %vm198_vm7, %v197_v9 }

// kernel: transformer_forward.26
= control target key start
LH: loop header
LB: loop body
LE: loop exit
PB: predicated region body
PF: predicated region fallthrough
CT: control target
= control target key end

     0   :  { %s1016_s9 = smov 0   ;;  %s1241_s0 = inlined_call_operand.vmem [shape: bf16[2,8,96], index: 0, kind: input, shape index: {}]   ;;  %s1242_s1 = inlined_call_operand.vmem [shape: f32[2,1,8], index: 1, kind: input, shape index: {}]   ;;  %s1243_s2 = inlined_call_operand.vmem [shape: bf16[2,8,32], index: 2, kind: output, shape index: {}]  }
   0x1 LB: > { %s930_s10 = sadd.s32 4294967295, %s988_s9   ;;  %p934_p0 = scmp.ge.s32.totalorder %s988_s9, 1  ;;  %s988_s9 = sphi %s1016_s9, %s12_s9  }
   0x2   : > { %p119_p1 = scmp.lt.s32.totalorder %s988_s9, 3 }
   0x4   : > { %p120_p2 = pnand %p934_p0, %p119_p1 }
   0x5   : > { %p142_p3 = scmp.lt.s32.totalorder (!%p120_p2), %s930_s10, 1  ;;  %s990_s15 = smov (!%p120_p2), 104  }
   0x6   : > { %123 = sbr.rel (%p120_p2) target bundleno = 948 (0x3b4), region = 28  ;;  %s991_s16 = smov (!%p120_p2), 120  }
   0x7   : > { %s992_s17 = smov (!%p120_p2), 112   ;;  %s993_s18 = smov (!%p120_p2), 96  }
   0x8   : > { %s994_s19 = smov (!%p120_p2), 64   ;;  %s998_s23 = smov (!%p120_p2), 24  }
   0x9   : > { %s999_s24 = smov (!%p120_p2), 16   ;;  %s1000_s25 = smov (!%p120_p2), 8  }
   0xb   : > { %s1245_s10 = smov (!%p142_p3, %s930_s10), 1  ;;  %v995_v6 = vmov 1983009808   ;;  %v996_v19 = vmov 1934713408   ;;  %vm186_vm0 = vcmask 1047556  }
   0xc   : > { %s935_s11 = sshll.u32 %s1245_s10, 2  ;;  %v177_v7 = vunpack.c.l.s4 %v995_v6  ;;  %v191_v20 = vunpack.c.l.s4 %v996_v19  ;;  %vm522_vm1 = vcmask 64512   ;;  %s148_s22 = scalar_lea.vmem %s1242_s1, %s1245_s10  ;;  %vm663_vm3 = vcmask 1043456  }
   0xd   : > { %s145_s14 = scalar_lea.vmem %s1241_s0, %s935_s11  ;;  %vm861_vm4 = vcmask 130048   ;;  %vm863_vm5 = vcmask 195584   ;;  %s152_s28 = scalar_lea.vmem %s1243_s2, %s935_s11  ;;  %vm866_vm6 = vcmask 257024  }
   0xe   : > { %v154_v0 = vld [vmem:[%s145_s14] sm:$0xf]  ;;  %v1045_v11 = vunpack.c.0.s8 %v177_v7  ;;  %v1055_v26 = vunpack.c.0.s8 %v191_v20 }
   0xf   : > { %161 = vrot.lane.b32.xlu1 %v154_v0, %s990_s15  ;;  %157 = vrot.lane.b32.xlu0 %v154_v0, %s991_s16  ;;  %v166_v4 = vshrl.u32 %v154_v0, 16 }
  0x17   : > { %159 = vrot.lane.b32.xlu0 %v154_v0, %s992_s17  ;;  %278 = vrot.lane.b32.xlu1 %v154_v0, %s993_s18 }
  0x1f   : > { %400 = vrot.lane.b32.xlu1 %v154_v0, %s994_s19 }
  0x81   : > { %v1032_v1 = vpop.permute.xlu1 %161  ;;  %v1034_v2 = vpop.permute.xlu0 %157 }
  0x82   : > { %284 = vrot.lane.b32.xlu0 %v1032_v1, %s993_s18  ;;  %280 = vrot.lane.b32.xlu2 %v1034_v2, %s993_s18  ;;  %v167_v5 = vshrl.u32 %v1034_v2, 16  ;;  %v173_v10 = vshrl.u32 %v1032_v1, 16  ;;  %v165_v12 = vpack.i.b16 %v1034_v2, %v154_v0 }
  0x84   : > { %v168_v8 = vpack.i.b16 %v167_v5, %v166_v4  ;;  %v179_v16 = vperm.slane %v165_v12, %v1045_v11 }
  0x86   : > { %v206_v13 = vperm.slane %v168_v8, %v1045_v11  ;;  %v188_v22 = vrot.slane %v179_v16, 4 }
  0x88   : > { %v214_v17 = vrot.slane %v206_v13, 4 }
  0x89   : > { %v1038_v3 = vpop.permute.xlu0 %159  ;;  %v279_v29 = vpop.permute.xlu1 %278 }
  0x8a   : > { %282 = vrot.lane.b32.xlu2 %v1038_v3, %s993_s18  ;;  %v172_v9 = vshrl.u32 %v1038_v3, 16  ;;  %v171_v15 = vpack.i.b16 %v1032_v1, %v1038_v3  ;;  %v289_v34 = vshrl.u32 %v279_v29, 16 }
  0x8c   : > { %v174_v14 = vpack.i.b16 %v173_v10, %v172_v9  ;;  %v184_v21 = vperm.slane %v171_v15, %v1045_v11 }
  0x8e   : > { %v211_v18 = vperm.slane %v174_v14, %v1045_v11  ;;  %v185_v27 = vrot.slane %v184_v21, 4  ;;  %v189_v28 = vsel %vm186_vm0, %v184_v21, %v188_v22 }
  0x8f   : > { %v197_v33 = vperm.slane %v189_v28, %v1055_v26 }
  0x90   : > { %v212_v24 = vrot.slane %v211_v18, 4  ;;  %v215_v25 = vsel %vm186_vm0, %v211_v18, %v214_v17  ;;  %v187_v32 = vsel %vm186_vm0, %v185_v27, %v179_v16 }
  0x91   : > { %v223_v30 = vperm.slane %v215_v25, %v1055_v26  ;;  %v193_v39 = vperm.slane %v187_v32, %v1055_v26  ;;  %v200_v41 = vrot.slane %v197_v33, 4 }
  0x92   : > { %v213_v31 = vsel %vm186_vm0, %v212_v24, %v206_v13 }
  0x93   : > { %v219_v36 = vperm.slane %v213_v31, %v1055_v26  ;;  %v226_v37 = vrot.slane %v223_v30, 4  ;;  %v198_v47 = vrot.slane %v193_v39, 4  ;;  %v201_v49 = vsel %vm186_vm0, 0, %v200_v41 }
  0x94   : > { %v233_v58 = vrot.slane %v201_v49, 4  ;;  %v228_v31 = vsel %vm186_vm0, %v200_v41, %v193_v39 }
  0x95   : > { %v224_v43 = vrot.slane %v219_v36, 4  ;;  %v227_v44 = vsel %vm186_vm0, 0, %v226_v37  ;;  %v199_v59 = vsel %vm186_vm0, 0, %v198_v47  ;;  %v247_v28 = vsel %vm186_vm0, %v226_v37, %v219_v36 }
  0x96   : > { %v252_v53 = vrot.slane %v227_v44, 4  ;;  %v234_v12 = vsel %vm186_vm0, %v233_v58, %v199_v59  ;;  %v232_v36 = vperm.slane %v228_v31, %v1045_v11 }
  0x97   : > { %v225_v57 = vsel %vm186_vm0, 0, %v224_v43  ;;  %v238_v20 = vperm.slane %v234_v12, %v1045_v11  ;;  %v251_v43 = vperm.slane %v247_v28, %v1045_v11 }
  0x98   : > { %v253_v4 = vsel %vm186_vm0, %v252_v53, %v225_v57 }
  0x99   : > { %v257_v14 = vperm.slane %v253_v4, %v1045_v11 }
  0x9b   : > { %v258_v32 = vrot.slane %v257_v14, 4 }
  0x9d   : > { %v259_v41 = vsel %vm186_vm0, %v258_v32, %v251_v43 }
  0xdc   : > { %v281_v23 = vpop.permute.xlu2 %280 }
  0xdd   : > { %v290_v35 = vshrl.u32 %v281_v23, 16  ;;  %v288_v38 = vpack.i.b16 %v281_v23, %v279_v29 }
  0xdf   : > { %v291_v42 = vpack.i.b16 %v290_v35, %v289_v34  ;;  %v302_v45 = vperm.slane %v288_v38, %v1045_v11  ;;  %v239_v35 = vrot.slane %v238_v20, 4  ;;  %v997_v20 = vmov -1e+09  }
  0xe1   : > { %v328_v50 = vperm.slane %v291_v42, %v1045_v11  ;;  %v310_v54 = vrot.slane %v302_v45, 4 }
  0xe3   : > { %v336_v60 = vrot.slane %v328_v50, 4 }
  0xe4   : > { %v283_v40 = vpop.permute.xlu2 %282 }
  0xe5   : > { %v295_v46 = vshrl.u32 %v283_v40, 16 }
  0xf4   : > { %v285_v48 = vpop.permute.xlu0 %284 }
  0xf5   : > { %v296_v51 = vshrl.u32 %v285_v48, 16  ;;  %v294_v52 = vpack.i.b16 %v285_v48, %v283_v40 }
  0xf7   : > { %v297_v55 = vpack.i.b16 %v296_v51, %v295_v46  ;;  %v307_v56 = vperm.slane %v294_v52, %v1045_v11  ;;  %v240_v46 = vsel %vm186_vm0, %v239_v35, %v232_v36 }
  0xf8   : > { %v244_v52 = vperm.slane %v240_v46, %v1055_v26 }
  0xf9   : > { %v308_v61 = vrot.slane %v307_v56, 4  ;;  %v311_v62 = vsel %vm186_vm0, %v307_v56, %v310_v54  ;;  %v333_v63 = vperm.slane %v297_v55, %v1045_v11 }
  0xfa   : > { %v319_v0 = vperm.slane %v311_v62, %v1055_v26  ;;  %v245_v4 = vrot.slane %v244_v52, 4  ;;  %v269_v12 = vshrl.u32 %v244_v52, 16 }
  0xfb   : > { %v309_v5 = vsel %vm186_vm0, %v308_v61, %v302_v45  ;;  %v334_v6 = vrot.slane %v333_v63, 4  ;;  %v337_v7 = vsel %vm186_vm0, %v333_v63, %v336_v60 }
  0xfc   : > { %v315_v8 = vperm.slane %v309_v5, %v1055_v26  ;;  %v322_v9 = vrot.slane %v319_v0, 4  ;;  %v345_v10 = vperm.slane %v337_v7, %v1055_v26 }
  0xfd   : > { %v335_v13 = vsel %vm186_vm0, %v334_v6, %v328_v50  ;;  %v263_v50 = vperm.slane %v259_v41, %v1055_v26 }
  0xfe   : > { %v320_v15 = vrot.slane %v315_v8, 4  ;;  %v323_v16 = vsel %vm186_vm0, 0, %v322_v9  ;;  %v341_v17 = vperm.slane %v335_v13, %v1055_v26  ;;  %v348_v18 = vrot.slane %v345_v10, 4 }
  0xff   : > { %v355_v19 = vrot.slane %v323_v16, 4  ;;  %v350_v25 = vsel %vm186_vm0, %v322_v9, %v315_v8  ;;  %v264_v60 = vrot.slane %v263_v50, 4  ;;  %v270_v7 = vshrl.u32 %v263_v50, 16 }
 0x100   : > { %v321_v21 = vsel %vm186_vm0, 0, %v320_v15  ;;  %v346_v22 = vrot.slane %v341_v17, 4  ;;  %v349_v23 = vsel %vm186_vm0, 0, %v348_v18  ;;  %v369_v33 = vsel %vm186_vm0, %v348_v18, %v341_v17 }
 0x101   : > { %v374_v24 = vrot.slane %v349_v23, 4  ;;  %v356_v27 = vsel %vm186_vm0, %v355_v19, %v321_v21  ;;  %v354_v38 = vperm.slane %v350_v25, %v1045_v11  ;;  %v373_v44 = vperm.slane %v369_v33, %v1045_v11  ;;  %v155_v19 = vld [vmem:[%s148_s22] sm:$0x1] }
 0x102   : > { %v347_v29 = vsel %vm186_vm0, 0, %v346_v22  ;;  %v360_v30 = vperm.slane %v356_v27, %v1045_v11  ;;  %v265_v8 = vsel %vm186_vm0, 0, %v264_v60  ;;  %v268_v10 = vpack.i.b16 %v263_v50, %v244_v52 }
 0x103   : > { %v375_v34 = vsel %vm186_vm0, %v374_v24, %v347_v29  ;;  %v246_v13 = vsel %vm186_vm0, 0, %v245_v4  ;;  %v276_v14 = vshrl.u32 %v265_v8, 16  ;;  %v271_v15 = vpack.i.b16 %v270_v7, %v269_v12 }
 0x104   : > { %v361_v40 = vrot.slane %v360_v30, 4  ;;  %v379_v42 = vperm.slane %v375_v34, %v1045_v11  ;;  %v274_v16 = vpack.i.b16 %v265_v8, %v246_v13  ;;  %v275_v17 = vshrl.u32 %v246_v13, 16 }
 0x105   : > { %vm603_vm2 = vcmp.gt.f32.partialorder %v155_v19, 0.0 }
 0x106   : > { %v362_v37 = vsel %vm186_vm0, %v361_v40, %v354_v38  ;;  %v380_v39 = vrot.slane %v379_v42, 4  ;;  %v277_v18 = vpack.i.b16 %v276_v14, %v275_v17  ;;  %v604_v21 = vsel %vm603_vm2, 0.0, %v997_v20 }
 0x107   : > { %v366_v45 = vperm.slane %v362_v37, %v1055_v26  ;;  %v606_v22 = vperm.slane %v604_v21, 0 }
 0x108   : > { %v381_v47 = vsel %vm186_vm0, %v380_v39, %v373_v44 }
 0x109   : > { %v385_v48 = vperm.slane %v381_v47, %v1055_v26  ;;  %v367_v49 = vrot.slane %v366_v45, 4  ;;  %v391_v51 = vshrl.u32 %v366_v45, 16 }
 0x10b   : > { %v390_v53 = vpack.i.b16 %v385_v48, %v366_v45  ;;  %v392_v54 = vshrl.u32 %v385_v48, 16  ;;  %v368_v55 = vsel %vm186_vm0, 0, %v367_v49  ;;  %v386_v56 = vrot.slane %v385_v48, 4  ;;  %v401_v45 = vpop.permute.xlu1 %400 }
 0x10c   : > { %v397_v62 = vshrl.u32 %v368_v55, 16 }
 0x10d   : > { %v527_v57 = vsel %vm522_vm1, %v390_v53, 0  ;;  %v393_v58 = vpack.i.b16 %v392_v54, %v391_v51  ;;  %v387_v59 = vsel %vm186_vm0, 0, %v386_v56 }
 0x10e   : > { %536 = vmatpush.bf16.xpose.msra.mxu0 %v527_v57  ;;  %v396_v61 = vpack.i.b16 %v387_v59, %v368_v55  ;;  %v398_v63 = vshrl.u32 %v387_v59, 16 }
 0x10f   : > { %v546_v0 = vsel %vm522_vm1, %v393_v58, 0 }
 0x110   : > { %555 = vmatpush.bf16.xpose.msra.mxu1 %v546_v0  ;;  %v565_v5 = vsel %vm522_vm1, %v396_v61, 0  ;;  %v399_v6 = vpack.i.b16 %v398_v63, %v397_v62  ;;  %v411_v63 = vshrl.u32 %v401_v45, 16 }
 0x111   : > { %574 = vmatpush.bf16.xpose.msra.mxu2 %v565_v5 }
 0x112   : > { %v584_v9 = vsel %vm522_vm1, %v399_v6, 0 }
 0x113   : > { %593 = vmatpush.bf16.xpose.msra.mxu3 %v584_v9 }
 0x115   : > { %937 = vmatmul.msk.bf16.vlgmr.msra.gmra.mxu0 %vm522_vm1, %v268_v10 }
 0x117   : > { %938 = vmatmul.msk.bf16.vlgmr.msra.gmra.mxu1 %vm522_vm1, %v271_v15 }
 0x118   : > { %939 = vmatmul.msk.bf16.vlgmr.msra.gmra.mxu2 %vm522_vm1, %v274_v16 }
 0x11a   : > { %940 = vmatmul.msk.bf16.vlgmr.msra.gmra.mxu3 %vm522_vm1, %v277_v18 }
 0x192   : > { %v538_v23 = vpop.f32.mrf.mxu0 }
 0x193   : > { %v599_v24 = vmul.f32 0.35355338, %v538_v23 }
 0x194   : > { %v557_v25 = vpop.f32.mrf.mxu1 }
 0x195   : > { %v600_v27 = vmul.f32 0.35355338, %v557_v25  ;;  %v608_v28 = vadd.f32 %v606_v22, %v599_v24 }
 0x197   : > { %v612_v29 = vsel %vm522_vm1, %v608_v28, -inf  ;;  %v609_v30 = vadd.f32 %v606_v22, %v600_v27 }
 0x198   : > { %613 = vmax.xlane.f32.xlu0 %v612_v29 }
 0x199   : > { %v615_v31 = vsel %vm522_vm1, %v609_v30, -inf }
 0x19a   : > { %616 = vmax.xlane.f32.xlu2 %v615_v31  ;;  %v540_v32 = vpop.f32.mrf.mxu0 }
 0x19b   : > { %v576_v33 = vpop.f32.mrf.mxu2 }
 0x19c   : > { %v601_v34 = vmul.f32 0.35355338, %v576_v33  ;;  %v559_v35 = vpop.f32.mrf.mxu1 }
 0x19d   : > { %v595_v38 = vpop.f32.mrf.mxu3 }
 0x19e   : > { %v602_v40 = vmul.f32 0.35355338, %v595_v38  ;;  %v610_v42 = vadd.f32 %v606_v22, %v601_v34 }
 0x1a0   : > { %v618_v43 = vsel %vm522_vm1, %v610_v42, -inf  ;;  %v611_v36 = vadd.f32 %v606_v22, %v602_v40 }
 0x1a1   : > { %619 = vmax.xlane.f32.xlu1 %v618_v43 }
 0x1a2   : > { %v621_v37 = vsel %vm522_vm1, %v611_v36, -inf }
 0x1a3   : > { %622 = vmax.xlane.f32.xlu2 %v621_v37  ;;  %v578_v44 = vpop.f32.mrf.mxu2 }
 0x1a5   : > { %v597_v39 = vpop.f32.mrf.mxu3 }
 0x1ac   : > { %404 = vrot.lane.b32.xlu0 %v1038_v3, %s994_s19 }
 0x1ba   : > { %406 = vrot.lane.b32.xlu1 %v1032_v1, %s994_s19 }
 0x1bb   : > { %402 = vrot.lane.b32.xlu2 %v1034_v2, %s994_s19 }
 0x20b   : > { %v614_v41 = vpop.xlane.xlu0 %613 }
 0x20c   : > { %v624_v46 = vsub.f32 %v608_v28, %v614_v41 }
 0x20d   : > { %v617_v47 = vpop.xlane.xlu2 %616 }
 0x20e   : > { %v628_v48 = vmul.f32 1.442695, %v624_v46  ;;  %v625_v53 = vsub.f32 %v609_v30, %v617_v47 }
 0x210   : > { %966 = vpow2.f32 %v628_v48  ;;  %v630_v55 = vmul.f32 1.442695, %v625_v53 }
 0x214   : > { %v620_v49 = vpop.xlane.xlu1 %619 }
 0x215   : > { %v626_v50 = vsub.f32 %v610_v42, %v620_v49 }
 0x216   : > { %v1134_v51 = vpop.eup %966  ;;  %v623_v52 = vpop.xlane.xlu2 %622 }
 0x217   : > { %v632_v54 = vmul.f32 1.442695, %v626_v50  ;;  %v627_v3 = vsub.f32 %v611_v36, %v623_v52  ;;  %v636_v1 = vsel %vm522_vm1, %v1134_v51, 0.0 }
 0x218   : > { %637 = vadd.xlane.f32.xlu1 %v636_v1 }
 0x219   : > { %968 = vpow2.f32 %v632_v54  ;;  %v634_v2 = vmul.f32 1.442695, %v627_v3 }
 0x21b   : > { %970 = vpow2.f32 %v634_v2 }
 0x21c   : > { %972 = vpow2.f32 %v630_v55 }
 0x21e   : > { %v403_v59 = vpop.permute.xlu2 %402  ;;  %v405_v6 = vpop.permute.xlu0 %404 }
 0x21f   : > { %v1138_v56 = vpop.eup %968  ;;  %v412_v62 = vshrl.u32 %v403_v59, 16  ;;  %v410_v0 = vpack.i.b16 %v403_v59, %v401_v45  ;;  %v417_v9 = vshrl.u32 %v405_v6, 16 }
 0x220   : > { %v642_v57 = vsel %vm522_vm1, %v1138_v56, 0.0 }
 0x221   : > { %v1142_v58 = vpop.eup %970  ;;  %643 = vadd.xlane.f32.xlu0 %v642_v57  ;;  %v413_v5 = vpack.i.b16 %v412_v62, %v411_v63  ;;  %v424_v7 = vperm.slane %v410_v0, %v1045_v11 }
 0x222   : > { %v645_v60 = vsel %vm522_vm1, %v1142_v58, 0.0  ;;  %v1146_v61 = vpop.eup %972 }
 0x223   : > { %646 = vadd.xlane.f32.xlu2 %v645_v60  ;;  %v639_v4 = vsel %vm522_vm1, %v1146_v61, 0.0  ;;  %v450_v10 = vperm.slane %v413_v5, %v1045_v11  ;;  %v432_v14 = vrot.slane %v424_v7, 4 }
 0x225   : > { %v458_v17 = vrot.slane %v450_v10, 4 }
 0x229   : > { %640 = vadd.xlane.f32.xlu0 %v639_v4 }
 0x22c   : > { %v407_v8 = vpop.permute.xlu1 %406 }
 0x22d   : > { %v416_v12 = vpack.i.b16 %v407_v8, %v405_v6  ;;  %v418_v13 = vshrl.u32 %v407_v8, 16 }
 0x22f   : > { %v419_v15 = vpack.i.b16 %v418_v13, %v417_v9  ;;  %v429_v16 = vperm.slane %v416_v12, %v1045_v11 }
 0x231   : > { %v430_v18 = vrot.slane %v429_v16, 4  ;;  %v433_v19 = vsel %vm186_vm0, %v429_v16, %v432_v14  ;;  %v455_v20 = vperm.slane %v419_v15, %v1045_v11 }
 0x232   : > { %v441_v21 = vperm.slane %v433_v19, %v1055_v26 }
 0x233   : > { %v431_v22 = vsel %vm186_vm0, %v430_v18, %v424_v7  ;;  %v456_v23 = vrot.slane %v455_v20, 4  ;;  %v459_v24 = vsel %vm186_vm0, %v455_v20, %v458_v17 }
 0x234   : > { %v437_v25 = vperm.slane %v431_v22, %v1055_v26  ;;  %v444_v27 = vrot.slane %v441_v21, 4  ;;  %v467_v28 = vperm.slane %v459_v24, %v1055_v26 }
 0x235   : > { %v457_v29 = vsel %vm186_vm0, %v456_v23, %v450_v10 }
 0x236   : > { %v442_v30 = vrot.slane %v437_v25, 4  ;;  %v445_v31 = vsel %vm186_vm0, 0, %v444_v27  ;;  %v463_v32 = vperm.slane %v457_v29, %v1055_v26  ;;  %v470_v33 = vrot.slane %v467_v28, 4 }
 0x237   : > { %v477_v34 = vrot.slane %v445_v31, 4  ;;  %v472_v43 = vsel %vm186_vm0, %v444_v27, %v437_v25 }
 0x238   : > { %v443_v35 = vsel %vm186_vm0, 0, %v442_v30  ;;  %v468_v38 = vrot.slane %v463_v32, 4  ;;  %v471_v40 = vsel %vm186_vm0, 0, %v470_v33  ;;  %v491_v39 = vsel %vm186_vm0, %v470_v33, %v463_v32 }
 0x239   : > { %v496_v42 = vrot.slane %v471_v40, 4  ;;  %v478_v36 = vsel %vm186_vm0, %v477_v34, %v443_v35  ;;  %v476_v45 = vperm.slane %v472_v43, %v1045_v11  ;;  %v495_v49 = vperm.slane %v491_v39, %v1045_v11 }
 0x23a   : > { %v469_v37 = vsel %vm186_vm0, 0, %v468_v38  ;;  %v482_v44 = vperm.slane %v478_v36, %v1045_v11 }
 0x23b   : > { %v497_v41 = vsel %vm186_vm0, %v496_v42, %v469_v37 }
 0x23c   : > { %v483_v46 = vrot.slane %v482_v44, 4  ;;  %v501_v47 = vperm.slane %v497_v41, %v1045_v11 }
 0x23e   : > { %v484_v48 = vsel %vm186_vm0, %v483_v46, %v476_v45  ;;  %v502_v50 = vrot.slane %v501_v47, 4 }
 0x23f   : > { %v488_v52 = vperm.slane %v484_v48, %v1055_v26 }
 0x240   : > { %v503_v53 = vsel %vm186_vm0, %v502_v50, %v495_v49 }
 0x241   : > { %v507_v54 = vperm.slane %v503_v53, %v1055_v26  ;;  %v489_v3 = vrot.slane %v488_v52, 4  ;;  %v513_v1 = vshrl.u32 %v488_v52, 16 }
 0x243   : > { %v512_v2 = vpack.i.b16 %v507_v54, %v488_v52  ;;  %v514_v55 = vshrl.u32 %v507_v54, 16  ;;  %v490_v57 = vsel %vm186_vm0, 0, %v489_v3  ;;  %v508_v59 = vrot.slane %v507_v54, 4 }
 0x244   : > { %v519_v4 = vshrl.u32 %v490_v57, 16 }
 0x245   : > { %v665_v60 = vsel %vm663_vm3, %v512_v2, 0  ;;  %v515_v62 = vpack.i.b16 %v514_v55, %v513_v1  ;;  %v509_v63 = vsel %vm186_vm0, 0, %v508_v59 }
 0x246   : > { %674 = vmatpush.bf16.msrb.mxu0 %v665_v60  ;;  %v518_v0 = vpack.i.b16 %v509_v63, %v490_v57  ;;  %v520_v5 = vshrl.u32 %v509_v63, 16 }
 0x247   : > { %v684_v6 = vsel %vm663_vm3, %v515_v62, 0 }
 0x248   : > { %693 = vmatpush.bf16.msrb.mxu1 %v684_v6  ;;  %v703_v7 = vsel %vm663_vm3, %v518_v0, 0  ;;  %v521_v8 = vpack.i.b16 %v520_v5, %v519_v4 }
 0x249   : > { %712 = vmatpush.bf16.msrb.mxu2 %v703_v7 }
 0x24a   : > { %v722_v9 = vsel %vm663_vm3, %v521_v8, 0 }
 0x24b   : > { %731 = vmatpush.bf16.msrb.mxu3 %v722_v9 }
 0x28b   : > { %v638_v10 = vpop.xlane.xlu1 %637 }
 0x28c   : > { %974 = vrcp.f32 %v638_v10 }
 0x292   : > { %v975_v12 = vpop.eup %974 }
 0x293   : > { %v652_v13 = vmul.f32 %v975_v12, %v1134_v51 }
 0x294   : > { %v644_v14 = vpop.xlane.xlu0 %643 }
 0x295   : > { %976 = vrcp.f32 %v644_v14  ;;  %v656_v15 = vpack.c.bf16 %v652_v13, %v652_v13 }
 0x296   : > { %v647_v16 = vpop.xlane.xlu2 %646 }
 0x297   : > { %978 = vrcp.f32 %v647_v16  ;;  %941 = vmatmul.msk.bf16.vlgmr.msrb.gmra.mxu0 %vm522_vm1, %v656_v15 }
 0x29b   : > { %v977_v17 = vpop.eup %976 }
 0x29c   : > { %v654_v18 = vmul.f32 %v977_v17, %v1138_v56  ;;  %v641_v19 = vpop.xlane.xlu0 %640 }
 0x29d   : > { %v979_v20 = vpop.eup %978  ;;  %980 = vrcp.f32 %v641_v19 }
 0x29e   : > { %v655_v21 = vmul.f32 %v979_v20, %v1142_v58  ;;  %v658_v22 = vpack.c.bf16 %v654_v18, %v654_v18 }
 0x2a0   : > { %943 = vmatmul.msk.bf16.vlgmr.msrb.gmra.mxu2 %vm522_vm1, %v658_v22  ;;  %v659_v23 = vpack.c.bf16 %v655_v21, %v655_v21 }
 0x2a2   : > { %944 = vmatmul.msk.bf16.vlgmr.msrb.gmra.mxu3 %vm522_vm1, %v659_v23 }
 0x2a3   : > { %v981_v51 = vpop.eup %980 }
 0x2a4   : > { %v653_v24 = vmul.f32 %v981_v51, %v1146_v61 }
 0x2a6   : > { %v657_v25 = vpack.c.bf16 %v653_v24, %v653_v24 }
 0x2a8   : > { %942 = vmatmul.msk.bf16.vlgmr.msrb.gmra.mxu1 %vm522_vm1, %v657_v25 }
 0x314   : > { %v676_v27 = vpop.f32.mrf.mxu0 }
 0x315   : > { %v740_v56 = vrot.slane %v676_v27, 4 }
 0x31c   : > { %v678_v28 = vpop.f32.mrf.mxu0 }
 0x323   : > { %v714_v29 = vpop.f32.mrf.mxu2 }
 0x324   : > { %v737_v30 = vrot.slane %v714_v29, 4  ;;  %v741_v31 = vsel %vm186_vm0, %v714_v29, %v740_v56 }
 0x325   : > { %v749_v58 = vperm.slane %v741_v31, %v1045_v11  ;;  %v695_v32 = vpop.f32.mrf.mxu1  ;;  %v733_v33 = vpop.f32.mrf.mxu3 }
 0x326   : > { %v739_v34 = vsel %vm186_vm0, %v737_v30, %v676_v27  ;;  %v752_v35 = vrot.slane %v695_v32, 4  ;;  %v750_v38 = vrot.slane %v733_v33, 4 }
 0x327   : > { %v745_v61 = vperm.slane %v739_v34, %v1045_v11  ;;  %v776_v36 = vrot.slane %v749_v58, 4 }
 0x328   : > { %v751_v40 = vsel %vm186_vm0, %v750_v38, %v695_v32  ;;  %v753_v42 = vsel %vm186_vm0, %v733_v33, %v752_v35 }
 0x329   : > { %v764_v43 = vrot.slane %v745_v61, 4  ;;  %v757_v37 = vperm.slane %v751_v40, %v1045_v11  ;;  %v761_v44 = vperm.slane %v753_v42, %v1045_v11 }
 0x32b   : > { %v762_v39 = vrot.slane %v757_v37, 4  ;;  %v765_v41 = vsel %vm186_vm0, %v757_v37, %v764_v43  ;;  %v774_v45 = vrot.slane %v761_v44, 4  ;;  %v777_v46 = vsel %vm186_vm0, %v761_v44, %v776_v36  ;;  %v716_v47 = vpop.f32.mrf.mxu2 }
 0x32c   : > { %v773_v48 = vperm.slane %v765_v41, %v1055_v26  ;;  %v785_v49 = vperm.slane %v777_v46, %v1055_v26 }
 0x32d   : > { %v763_v50 = vsel %vm186_vm0, %v762_v39, %v745_v61  ;;  %v775_v52 = vsel %vm186_vm0, %v774_v45, %v749_v58  ;;  %v697_v53 = vpop.f32.mrf.mxu1  ;;  %v735_v54 = vpop.f32.mrf.mxu3 }
 0x32e   : > { %v769_v3 = vperm.slane %v763_v50, %v1055_v26  ;;  %v781_v1 = vperm.slane %v775_v52, %v1055_v26  ;;  %v788_v2 = vrot.slane %v773_v48, 4  ;;  %v792_v55 = vrot.slane %v785_v49, 4 }
 0x330   : > { %v786_v57 = vrot.slane %v769_v3, 4  ;;  %v789_v59 = vsel %vm186_vm0, 0.0, %v788_v2  ;;  %v790_v60 = vrot.slane %v781_v1, 4  ;;  %v793_v62 = vsel %vm186_vm0, 0.0, %v792_v55 }
 0x331   : > { %v799_v63 = vrot.slane %v789_v59, 4  ;;  %v805_v0 = vsel %vm186_vm0, %v792_v55, %v781_v1  ;;  %v810_v4 = vrot.slane %v793_v62, 4  ;;  %v794_v5 = vsel %vm186_vm0, %v788_v2, %v769_v3 }
 0x332   : > { %v791_v6 = vsel %vm186_vm0, 0.0, %v790_v60  ;;  %v787_v7 = vsel %vm186_vm0, 0.0, %v786_v57  ;;  %v798_v8 = vperm.slane %v794_v5, %v1045_v11  ;;  %v809_v9 = vperm.slane %v805_v0, %v1045_v11 }
 0x333   : > { %v800_v10 = vsel %vm186_vm0, %v799_v63, %v787_v7  ;;  %v811_v12 = vsel %vm186_vm0, %v810_v4, %v791_v6 }
 0x334   : > { %v804_v13 = vperm.slane %v800_v10, %v1045_v11  ;;  %v815_v14 = vperm.slane %v811_v12, %v1045_v11  ;;  %v818_v15 = vrot.slane %v798_v8, 4  ;;  %v830_v16 = vrot.slane %v809_v9, 4 }
 0x336   : > { %v819_v17 = vsel %vm186_vm0, %v804_v13, %v818_v15  ;;  %v831_v18 = vsel %vm186_vm0, %v815_v14, %v830_v16  ;;  %v816_v19 = vrot.slane %v804_v13, 4  ;;  %v828_v20 = vrot.slane %v815_v14, 4 }
 0x337   : > { %v827_v21 = vperm.slane %v819_v17, %v1055_v26  ;;  %v839_v22 = vperm.slane %v831_v18, %v1055_v26 }
 0x338   : > { %v817_v23 = vsel %vm186_vm0, %v816_v19, %v798_v8  ;;  %v829_v51 = vsel %vm186_vm0, %v828_v20, %v809_v9 }
 0x339   : > { %v846_v24 = vrot.slane %v827_v21, 4  ;;  %v844_v25 = vrot.slane %v839_v22, 4  ;;  %v823_v11 = vperm.slane %v817_v23, %v1055_v26  ;;  %v835_v27 = vperm.slane %v829_v51, %v1055_v26 }
 0x33b   : > { %v847_v28 = vsel %vm186_vm0, %v839_v22, %v846_v24  ;;  %v845_v56 = vsel %vm186_vm0, %v844_v25, %v827_v21  ;;  %v840_v29 = vrot.slane %v835_v27, 4  ;;  %v842_v30 = vrot.slane %v823_v11, 4 }
 0x33c   : > { %857 = vrot.lane.b32.xlu0 %v847_v28, %s998_s23  ;;  %853 = vrot.lane.b32.xlu1 %v845_v56, %s999_s24 }
 0x33d   : > { %v843_v31 = vsel %vm186_vm0, %v835_v27, %v842_v30  ;;  %v841_v58 = vsel %vm186_vm0, %v840_v29, %v823_v11 }
 0x33e   : > { %849 = vrot.lane.b32.xlu2 %v843_v31, %s1000_s25 }
 0x398   : > { %v850_v32 = vpop.permute.xlu2 %849 }
 0x399   : > { %v860_v26 = vsel %vm522_vm1, %v841_v58, %v850_v32 }
 0x3ae   : > { %v858_v33 = vpop.permute.xlu0 %857  ;;  %v854_v34 = vpop.permute.xlu1 %853 }
 0x3af   : > { %v862_v35 = vsel %vm861_vm4, %v860_v26, %v854_v34 }
 0x3b0   : > { %v864_v38 = vsel %vm863_vm5, %v862_v35, %v858_v33 }
 0x3b1   : > { %v865_v61 = vpack.c.bf16 %v864_v38, %v864_v38 }
 0x3b3   : > { %867 = vst.msk [vmem:[%s152_s28] sm:$0xf] %vm866_vm6, %v865_v61 }
 0x3b4 PF: > { %s12_s9 = sadd.s32 1, %s988_s9  }
 0x3b5   : > { %p9_p4 = scmp.ge.s32.totalorder %s12_s9, 4  }
 0x3b7   :  { %11 = sbr.rel (!%p9_p4) target bundleno = 1 (0x1), region = 61 }

// kernel: transformer_forward.37
= control target key start
LH: loop header
LB: loop body
LE: loop exit
PB: predicated region body
PF: predicated region fallthrough
CT: control target
= control target key end

     0   :  { %vm42_vm0 = vcmask 261120   ;;  %vm62_vm1 = vcmask 519168   ;;  %s124_s1 = inlined_call_operand.vmem [shape: bf16[32,64], index: 1, kind: input, shape index: {}]   ;;  %s125_s2 = inlined_call_operand.vmem [shape: f32[1,64], index: 2, kind: input, shape index: {}]   ;;  %s126_s0 = inlined_call_operand.vmem [shape: bf16[16,32], index: 0, kind: input, shape index: {}]   ;;  %s127_s3 = inlined_call_operand.vmem [shape: bf16[16,64], index: 3, kind: output, shape index: {}]  }
   0x1   :  { %v84_v0 = vld [vmem:[%s124_s1 + $0x8] sm:$0xff]  ;;  %v83_v1 = vld [vmem:[%s124_s1] sm:$0xff] }
   0x2   :  { %52 = vmatpush.bf16.msra.mxu0 %v84_v0  ;;  %v82_v2 = vld [vmem:[%s126_s0] sm:$0xff] }
   0x3   :  { %v85_v3 = vld [vmem:[%s125_s2] ss:$0 sm:$0xff] }
   0x6   :  { %53 = vmatpush.bf16.msra.mxu0 %v83_v1 }
   0x9   :  { %81 = vmatmul.msk.bf16.vlgmr.msra.gmra.mxu0 %vm42_vm0, %v82_v2 }
  0x86   :  { %v55_v4 = vpop.f32.mrf.mxu0 }
  0x87   :  { %v56_v5 = vadd.f32 %v85_v3, %v55_v4 }
  0x89   :  { %v60_v6 = vpack.c.bf16 %v56_v5, %v56_v5 }
  0x8b   :  { %63 = vst.msk [vmem:[%s127_s3] sm:$0xf] %vm62_vm1, %v60_v6 }
  0x8e   :  { %v57_v7 = vpop.f32.mrf.mxu0 }
  0x8f   :  { %v58_v8 = vadd.f32 %v85_v3, %v57_v7 }
  0x91   :  { %v61_v9 = vpack.c.bf16 %v58_v8, %v58_v8 }
  0x93   :  { %64 = vst.msk [vmem:[%s127_s3 + $0x4] sm:$0xf] %vm62_vm1, %v61_v9 }

// kernel: transformer_forward.35
= control target key start
LH: loop header
LB: loop body
LE: loop exit
PB: predicated region body
PF: predicated region fallthrough
CT: control target
= control target key end

     0   :  { %11 = vsyncpa [#allocation3], 0  ;;  %s219_s24 = smov [#allocation2]   ;;  %s288_s0 = inlined_call_operand.vmem [shape: bf16[16,32], index: 0, kind: input, shape index: {}]   ;;  %s289_s1 = inlined_call_operand.vmem [shape: bf16[32,32], index: 1, kind: input, shape index: {}]   ;;  %s290_s2 = inlined_call_operand.vmem [shape: f32[1,32], index: 2, kind: input, shape index: {}]   ;;  %s291_s3 = inlined_call_operand.vmem [shape: bf16[16,32], index: 3, kind: input, shape index: {}]   ;;  %s292_s4 = inlined_call_operand.vmem [shape: f32[1,32], index: 4, kind: input, shape index: {}]   ;;  %s293_s5 = inlined_call_operand.hbm [shape: f32[1,32], index: 5, kind: input, shape index: {}]   ;;  %s294_s6 = inlined_call_operand.vmem [shape: bf16[16,32], index: 6, kind: output, shape index: {}]  }
   0x1   :  { %s27_s23 = sshll.u32 %s293_s5, 4  ;;  %s29_s25 = sshll.u32 %s219_s24, 4  ;;  %s28_s23 = int_to_ptr.hbm [resolvable:$true] %s27_s23  ;;  %s30_s25 = int_to_ptr.vmem [resolvable:$true] %s29_s25 }
   0x2   :  { %32 = dma.hbm_to_vmem [thread:$0]  %s28_s23, 16, %s30_s25, [#allocation3]  }
   0x3   :  { %217 = dma.done.wait [#allocation3], 16  }
   0x4   :  { %218 = vsyncadd [#allocation3], 4294967280  ;;  %v177_v0 = vld [vmem:[%s289_s1 + $0x8] sm:$0xff]  ;;  %v176_v1 = vld [vmem:[%s289_s1] sm:$0xff]  ;;  %vm65_vm0 = vcmask 261120   ;;  %v220_v15 = vmov 32.0  }
   0x5   :  { %75 = vmatpush.bf16.msra.mxu0 %v177_v0  ;;  %v175_v2 = vld [vmem:[%s288_s0] sm:$0xff]  ;;  %187 = vrcp.f32 %v220_v15  ;;  %vm154_vm6 = vcmask 257024  }
   0x6   :  { %v179_v3 = vld [vmem:[%s291_s3] sm:$0xff]  }
   0x7   :  { %v184_v4 = vld [vmem:[%s290_s2] ss:$0 sm:$0xff]  ;;  %v180_v5 = vunpack.c.l.bf16 %v179_v3  ;;  %v181_v10 = vunpack.c.h.bf16 %v179_v3 }
   0x8   :  { %v185_v46 = vld [vmem:[%s292_s4] ss:$0 sm:$0xff] }
   0x9   :  { %76 = vmatpush.bf16.msra.mxu0 %v176_v1  ;;  %v186_v49 = vld [vmem:[#allocation2] ss:$0 sm:$0xff] }
   0xb   :  { %v188_v16 = vpop.eup %187 }
   0xc   :  { %174 = vmatmul.msk.bf16.vlgmr.msra.gmra.mxu0 %vm65_vm0, %v175_v2  ;;  %v96_v17 = vmul.f32 32.0, %v188_v16  ;;  %vm100_vm1 = vweird.f32 %v188_v16 }
   0xe   :  { %v97_v18 = vsub.f32 1.0, %v96_v17 }
  0x10   :  { %v98_v19 = vmul.f32 %v188_v16, %v97_v18 }
  0x12   :  { %v99_v20 = vadd.f32 %v188_v16, %v98_v19 }
  0x14   :  { %v101_v21 = vsel %vm100_vm1, %v188_v16, %v99_v20 }
  0x89   :  { %v78_v6 = vpop.f32.mrf.mxu0 }
  0x8a   :  { %v79_v7 = vadd.f32 %v184_v4, %v78_v6 }
  0x8c   :  { %v87_v8 = vadd.f32 %v180_v5, %v79_v7 }
  0x8e   :  { %v89_v9 = vsel %vm65_vm0, %v87_v8, 0.0 }
  0x8f   :  { %90 = vadd.xlane.f32.xlu0 %v89_v9 }
  0x91   :  { %v80_v11 = vpop.f32.mrf.mxu0 }
  0x92   :  { %v81_v12 = vadd.f32 %v184_v4, %v80_v11 }
  0x94   :  { %v88_v13 = vadd.f32 %v181_v10, %v81_v12 }
  0x96   :  { %v92_v14 = vsel %vm65_vm0, %v88_v13, 0.0 }
  0x97   :  { %93 = vadd.xlane.f32.xlu0 %v92_v14 }
 0x102   :  { %v91_v22 = vpop.xlane.xlu0 %90 }
 0x103   :  { %v102_v23 = vmul.f32 %v101_v21, %v91_v22 }
 0x105   :  { %v104_v24 = vsub.f32 %v87_v8, %v102_v23 }
 0x107   :  { %v106_v25 = vmul.f32 %v104_v24, %v104_v24 }
 0x109   :  { %v108_v26 = vsel %vm65_vm0, %v106_v25, 0.0 }
 0x10a   :  { %109 = vadd.xlane.f32.xlu1 %v108_v26  ;;  %v94_v27 = vpop.xlane.xlu0 %93 }
 0x10b   :  { %v103_v28 = vmul.f32 %v101_v21, %v94_v27 }
 0x10d   :  { %v105_v29 = vsub.f32 %v88_v13, %v103_v28 }
 0x10f   :  { %v107_v30 = vmul.f32 %v105_v29, %v105_v29 }
 0x111   :  { %v111_v31 = vsel %vm65_vm0, %v107_v30, 0.0 }
 0x112   :  { %112 = vadd.xlane.f32.xlu1 %v111_v31 }
 0x17d   :  { %v110_v32 = vpop.xlane.xlu1 %109 }
 0x17e   :  { %v114_v33 = vmul.f32 %v110_v32, %v101_v21 }
 0x180   :  { %v116_v34 = vadd.f32 1e-05, %v114_v33 }
 0x182   :  { %189 = vrsqrt.f32 %v116_v34  ;;  %vm124_vm3 = vweird.f32 %v116_v34 }
 0x185   :  { %v113_v35 = vpop.xlane.xlu1 %112 }
 0x186   :  { %v115_v36 = vmul.f32 %v113_v35, %v101_v21 }
 0x188   :  { %v190_v37 = vpop.eup %189  ;;  %v117_v38 = vadd.f32 1e-05, %v115_v36 }
 0x189   :  { %v119_v39 = vmul.f32 %v190_v37, %v116_v34  ;;  %vm125_vm2 = vweird.f32 %v190_v37 }
 0x18a   :  { %191 = vrsqrt.f32 %v117_v38  ;;  %vm126_vm4 = vmor %vm124_vm3, %vm125_vm2  ;;  %vm134_vm7 = vweird.f32 %v117_v38 }
 0x18b   :  { %v120_v40 = vmul.f32 %v190_v37, %v119_v39 }
 0x18d   :  { %v121_v41 = vmul.f32 0.5, %v120_v40 }
 0x18f   :  { %v122_v42 = vsub.f32 1.5, %v121_v41 }
 0x190   :  { %v192_v43 = vpop.eup %191 }
 0x191   :  { %v123_v44 = vmul.f32 %v190_v37, %v122_v42  ;;  %v129_v45 = vmul.f32 %v192_v43, %v117_v38  ;;  %vm135_vm5 = vweird.f32 %v192_v43 }
 0x192   :  { %vm136_vm8 = vmor %vm134_vm7, %vm135_vm5 }
 0x193   :  { %v127_v47 = vsel %vm126_vm4, %v190_v37, %v123_v44  ;;  %v130_v48 = vmul.f32 %v192_v43, %v129_v45 }
 0x194   :  { %v138_v50 = vmul.f32 %v127_v47, %v104_v24 }
 0x195   :  { %v131_v51 = vmul.f32 0.5, %v130_v48 }
 0x196   :  { %v144_v52 = vmul.f32 %v185_v46, %v138_v50 }
 0x197   :  { %v132_v53 = vsub.f32 1.5, %v131_v51 }
 0x198   :  { %v150_v54 = vadd.f32 %v186_v49, %v144_v52 }
 0x199   :  { %v133_v55 = vmul.f32 %v192_v43, %v132_v53 }
 0x19a   :  { %v152_v56 = vpack.c.bf16 %v150_v54, %v150_v54 }
 0x19b   :  { %v137_v57 = vsel %vm136_vm8, %v192_v43, %v133_v55 }
 0x19c   :  { %155 = vst.msk [vmem:[%s294_s6] sm:$0xf] %vm154_vm6, %v152_v56  ;;  %v139_v58 = vmul.f32 %v137_v57, %v105_v29 }
 0x19e   :  { %v145_v59 = vmul.f32 %v185_v46, %v139_v58 }
 0x1a0   :  { %v151_v60 = vadd.f32 %v186_v49, %v145_v59 }
 0x1a2   :  { %v153_v61 = vpack.c.bf16 %v151_v60, %v151_v60 }
 0x1a4   :  { %156 = vst.msk [vmem:[%s294_s6 + $0x4] sm:$0xf] %vm154_vm6, %v153_v61 }
 0x1a5   :  { %161 = vsyncpa [#allocation3], 1 }

// kernel: transformer_forward.36
= control target key start
LH: loop header
LB: loop body
LE: loop exit
PB: predicated region body
PF: predicated region fallthrough
CT: control target
= control target key end

     0   :  { %8 = vsyncpa [#allocation3], 0  ;;  %s128_s15 = smov [#allocation2]   ;;  %s167_s0 = inlined_call_operand.vmem [shape: bf16[16,32], index: 0, kind: input, shape index: {}]   ;;  %s168_s1 = inlined_call_operand.vmem [shape: bf16[32,32], index: 1, kind: input, shape index: {}]   ;;  %s169_s2 = inlined_call_operand.hbm [shape: f32[1,32], index: 2, kind: input, shape index: {}]   ;;  %s170_s3 = inlined_call_operand.vmem [shape: bf16[16,32], index: 3, kind: output, shape index: {}]  }
   0x1   :  { %s18_s14 = sshll.u32 %s169_s2, 4  ;;  %s20_s16 = sshll.u32 %s128_s15, 4  ;;  %s19_s14 = int_to_ptr.hbm [resolvable:$true] %s18_s14  ;;  %s21_s16 = int_to_ptr.vmem [resolvable:$true] %s20_s16 }
   0x2   :  { %23 = dma.hbm_to_vmem [thread:$0]  %s19_s14, 16, %s21_s16, [#allocation3]  }
   0x3   :  { %126 = dma.done.wait [#allocation3], 16  }
   0x4   :  { %127 = vsyncadd [#allocation3], 4294967280  ;;  %v99_v0 = vld [vmem:[%s168_s1 + $0x8] sm:$0xff]  ;;  %v98_v1 = vld [vmem:[%s168_s1] sm:$0xff]  ;;  %vm56_vm0 = vcmask 261120   ;;  %vm76_vm1 = vcmask 257024  }
   0x5   :  { %66 = vmatpush.bf16.msra.mxu0 %v99_v0  ;;  %v97_v2 = vld [vmem:[%s167_s0] sm:$0xff] }
   0x6   :  { %v101_v3 = vld [vmem:[#allocation2] ss:$0 sm:$0xff] }
   0x9   :  { %67 = vmatpush.bf16.msra.mxu0 %v98_v1 }
   0xc   :  { %96 = vmatmul.msk.bf16.vlgmr.msra.gmra.mxu0 %vm56_vm0, %v97_v2 }
  0x89   :  { %v69_v4 = vpop.f32.mrf.mxu0 }
  0x8a   :  { %v70_v5 = vadd.f32 %v101_v3, %v69_v4 }
  0x8c   :  { %v74_v6 = vpack.c.bf16 %v70_v5, %v70_v5 }
  0x8e   :  { %77 = vst.msk [vmem:[%s170_s3] sm:$0xf] %vm76_vm1, %v74_v6 }
  0x91   :  { %v71_v7 = vpop.f32.mrf.mxu0 }
  0x92   :  { %v72_v8 = vadd.f32 %v101_v3, %v71_v7 }
  0x94   :  { %v75_v9 = vpack.c.bf16 %v72_v8, %v72_v8 }
  0x96   :  { %78 = vst.msk [vmem:[%s170_s3 + $0x4] sm:$0xf] %vm76_vm1, %v75_v9 }
  0x97   :  { %83 = vsyncpa [#allocation3], 1 }

// kernel: transformer_forward.34
= control target key start
LH: loop header
LB: loop body
LE: loop exit
PB: predicated region body
PF: predicated region fallthrough
CT: control target
= control target key end

     0   :  { %s1022_s9 = smov 0   ;;  %s1247_s0 = inlined_call_operand.vmem [shape: bf16[2,8,96], index: 0, kind: input, shape index: {}]   ;;  %s1248_s1 = inlined_call_operand.vmem [shape: f32[2,1,8], index: 1, kind: input, shape index: {}]   ;;  %s1249_s2 = inlined_call_operand.vmem [shape: bf16[2,8,32], index: 2, kind: output, shape index: {}]  }
   0x1 LB: > { %s936_s10 = sadd.s32 4294967295, %s994_s9   ;;  %p940_p0 = scmp.ge.s32.totalorder %s994_s9, 1  ;;  %s994_s9 = sphi %s1022_s9, %s12_s9  }
   0x2   : > { %p119_p1 = scmp.lt.s32.totalorder %s994_s9, 3 }
   0x4   : > { %p120_p2 = pnand %p940_p0, %p119_p1 }
   0x5   : > { %p142_p3 = scmp.lt.s32.totalorder (!%p120_p2), %s936_s10, 1  ;;  %s996_s15 = smov (!%p120_p2), 104  }
   0x6   : > { %123 = sbr.rel (%p120_p2) target bundleno = 948 (0x3b4), region = 28  ;;  %s997_s16 = smov (!%p120_p2), 120  }
   0x7   : > { %s998_s17 = smov (!%p120_p2), 112   ;;  %s999_s18 = smov (!%p120_p2), 96  }
   0x8   : > { %s1000_s19 = smov (!%p120_p2), 64   ;;  %s1004_s23 = smov (!%p120_p2), 24  }
   0x9   : > { %s1005_s24 = smov (!%p120_p2), 16   ;;  %s1006_s25 = smov (!%p120_p2), 8  }
   0xb   : > { %s1251_s10 = smov (!%p142_p3, %s936_s10), 1  ;;  %v1001_v6 = vmov 1983009808   ;;  %v1002_v19 = vmov 1934713408   ;;  %vm186_vm0 = vcmask 1047556  }
   0xc   : > { %s941_s11 = sshll.u32 %s1251_s10, 2  ;;  %v177_v7 = vunpack.c.l.s4 %v1001_v6  ;;  %v191_v20 = vunpack.c.l.s4 %v1002_v19  ;;  %vm522_vm1 = vcmask 64512   ;;  %s148_s22 = scalar_lea.vmem %s1248_s1, %s1251_s10  ;;  %vm669_vm4 = vcmask 1043456  }
   0xd   : > { %s145_s14 = scalar_lea.vmem %s1247_s0, %s941_s11  ;;  %vm867_vm5 = vcmask 130048   ;;  %vm869_vm6 = vcmask 195584   ;;  %s152_s28 = scalar_lea.vmem %s1249_s2, %s941_s11  ;;  %vm872_vm7 = vcmask 257024  }
   0xe   : > { %v154_v0 = vld [vmem:[%s145_s14] sm:$0xf]  ;;  %v1051_v11 = vunpack.c.0.s8 %v177_v7  ;;  %v1061_v26 = vunpack.c.0.s8 %v191_v20 }
   0xf   : > { %161 = vrot.lane.b32.xlu1 %v154_v0, %s996_s15  ;;  %157 = vrot.lane.b32.xlu0 %v154_v0, %s997_s16  ;;  %v166_v4 = vshrl.u32 %v154_v0, 16 }
  0x17   : > { %159 = vrot.lane.b32.xlu0 %v154_v0, %s998_s17  ;;  %278 = vrot.lane.b32.xlu1 %v154_v0, %s999_s18 }
  0x1f   : > { %400 = vrot.lane.b32.xlu1 %v154_v0, %s1000_s19 }
  0x81   : > { %v1038_v1 = vpop.permute.xlu1 %161  ;;  %v1040_v2 = vpop.permute.xlu0 %157 }
  0x82   : > { %284 = vrot.lane.b32.xlu0 %v1038_v1, %s999_s18  ;;  %280 = vrot.lane.b32.xlu2 %v1040_v2, %s999_s18  ;;  %v167_v5 = vshrl.u32 %v1040_v2, 16  ;;  %v173_v10 = vshrl.u32 %v1038_v1, 16  ;;  %v165_v12 = vpack.i.b16 %v1040_v2, %v154_v0 }
  0x84   : > { %v168_v8 = vpack.i.b16 %v167_v5, %v166_v4  ;;  %v179_v16 = vperm.slane %v165_v12, %v1051_v11 }
  0x86   : > { %v206_v13 = vperm.slane %v168_v8, %v1051_v11  ;;  %v188_v22 = vrot.slane %v179_v16, 4 }
  0x88   : > { %v214_v17 = vrot.slane %v206_v13, 4 }
  0x89   : > { %v1044_v3 = vpop.permute.xlu0 %159  ;;  %v279_v29 = vpop.permute.xlu1 %278 }
  0x8a   : > { %282 = vrot.lane.b32.xlu2 %v1044_v3, %s999_s18  ;;  %v172_v9 = vshrl.u32 %v1044_v3, 16  ;;  %v171_v15 = vpack.i.b16 %v1038_v1, %v1044_v3  ;;  %v289_v34 = vshrl.u32 %v279_v29, 16 }
  0x8c   : > { %v174_v14 = vpack.i.b16 %v173_v10, %v172_v9  ;;  %v184_v21 = vperm.slane %v171_v15, %v1051_v11 }
  0x8e   : > { %v211_v18 = vperm.slane %v174_v14, %v1051_v11  ;;  %v185_v27 = vrot.slane %v184_v21, 4  ;;  %v189_v28 = vsel %vm186_vm0, %v184_v21, %v188_v22 }
  0x8f   : > { %v197_v33 = vperm.slane %v189_v28, %v1061_v26 }
  0x90   : > { %v212_v24 = vrot.slane %v211_v18, 4  ;;  %v215_v25 = vsel %vm186_vm0, %v211_v18, %v214_v17  ;;  %v187_v32 = vsel %vm186_vm0, %v185_v27, %v179_v16 }
  0x91   : > { %v223_v30 = vperm.slane %v215_v25, %v1061_v26  ;;  %v193_v39 = vperm.slane %v187_v32, %v1061_v26  ;;  %v200_v41 = vrot.slane %v197_v33, 4 }
  0x92   : > { %v213_v31 = vsel %vm186_vm0, %v212_v24, %v206_v13 }
  0x93   : > { %v219_v36 = vperm.slane %v213_v31, %v1061_v26  ;;  %v226_v37 = vrot.slane %v223_v30, 4  ;;  %v198_v47 = vrot.slane %v193_v39, 4  ;;  %v201_v49 = vsel %vm186_vm0, 0, %v200_v41 }
  0x94   : > { %v233_v58 = vrot.slane %v201_v49, 4  ;;  %v228_v31 = vsel %vm186_vm0, %v200_v41, %v193_v39 }
  0x95   : > { %v224_v43 = vrot.slane %v219_v36, 4  ;;  %v227_v44 = vsel %vm186_vm0, 0, %v226_v37  ;;  %v199_v59 = vsel %vm186_vm0, 0, %v198_v47  ;;  %v247_v28 = vsel %vm186_vm0, %v226_v37, %v219_v36 }
  0x96   : > { %v252_v53 = vrot.slane %v227_v44, 4  ;;  %v234_v12 = vsel %vm186_vm0, %v233_v58, %v199_v59  ;;  %v232_v36 = vperm.slane %v228_v31, %v1051_v11 }
  0x97   : > { %v225_v57 = vsel %vm186_vm0, 0, %v224_v43  ;;  %v238_v20 = vperm.slane %v234_v12, %v1051_v11  ;;  %v251_v43 = vperm.slane %v247_v28, %v1051_v11 }
  0x98   : > { %v253_v4 = vsel %vm186_vm0, %v252_v53, %v225_v57 }
  0x99   : > { %v257_v14 = vperm.slane %v253_v4, %v1051_v11 }
  0x9b   : > { %v258_v32 = vrot.slane %v257_v14, 4 }
  0x9d   : > { %v259_v41 = vsel %vm186_vm0, %v258_v32, %v251_v43 }
  0xdc   : > { %v281_v23 = vpop.permute.xlu2 %280 }
  0xdd   : > { %v290_v35 = vshrl.u32 %v281_v23, 16  ;;  %v288_v38 = vpack.i.b16 %v281_v23, %v279_v29 }
  0xdf   : > { %v291_v42 = vpack.i.b16 %v290_v35, %v289_v34  ;;  %v302_v45 = vperm.slane %v288_v38, %v1051_v11  ;;  %v239_v35 = vrot.slane %v238_v20, 4  ;;  %v605_v20 = vlaneseq }
  0xe1   : > { %v328_v50 = vperm.slane %v291_v42, %v1051_v11  ;;  %v310_v54 = vrot.slane %v302_v45, 4 }
  0xe3   : > { %v336_v60 = vrot.slane %v328_v50, 4 }
  0xe4   : > { %v283_v40 = vpop.permute.xlu2 %282 }
  0xe5   : > { %v295_v46 = vshrl.u32 %v283_v40, 16 }
  0xf4   : > { %v285_v48 = vpop.permute.xlu0 %284 }
  0xf5   : > { %v296_v51 = vshrl.u32 %v285_v48, 16  ;;  %v294_v52 = vpack.i.b16 %v285_v48, %v283_v40 }
  0xf7   : > { %v297_v55 = vpack.i.b16 %v296_v51, %v295_v46  ;;  %v307_v56 = vperm.slane %v294_v52, %v1051_v11  ;;  %v240_v46 = vsel %vm186_vm0, %v239_v35, %v232_v36 }
  0xf8   : > { %v244_v52 = vperm.slane %v240_v46, %v1061_v26 }
  0xf9   : > { %v308_v61 = vrot.slane %v307_v56, 4  ;;  %v311_v62 = vsel %vm186_vm0, %v307_v56, %v310_v54  ;;  %v333_v63 = vperm.slane %v297_v55, %v1051_v11 }
  0xfa   : > { %v319_v0 = vperm.slane %v311_v62, %v1061_v26  ;;  %v245_v4 = vrot.slane %v244_v52, 4  ;;  %v269_v12 = vshrl.u32 %v244_v52, 16 }
  0xfb   : > { %v309_v5 = vsel %vm186_vm0, %v308_v61, %v302_v45  ;;  %v334_v6 = vrot.slane %v333_v63, 4  ;;  %v337_v7 = vsel %vm186_vm0, %v333_v63, %v336_v60 }
  0xfc   : > { %v315_v8 = vperm.slane %v309_v5, %v1061_v26  ;;  %v322_v9 = vrot.slane %v319_v0, 4  ;;  %v345_v10 = vperm.slane %v337_v7, %v1061_v26 }
  0xfd   : > { %v335_v13 = vsel %vm186_vm0, %v334_v6, %v328_v50  ;;  %v263_v50 = vperm.slane %v259_v41, %v1061_v26 }
  0xfe   : > { %v320_v15 = vrot.slane %v315_v8, 4  ;;  %v323_v16 = vsel %vm186_vm0, 0, %v322_v9  ;;  %v341_v17 = vperm.slane %v335_v13, %v1061_v26  ;;  %v348_v18 = vrot.slane %v345_v10, 4 }
  0xff   : > { %v355_v19 = vrot.slane %v323_v16, 4  ;;  %v350_v25 = vsel %vm186_vm0, %v322_v9, %v315_v8  ;;  %v264_v60 = vrot.slane %v263_v50, 4  ;;  %v270_v7 = vshrl.u32 %v263_v50, 16 }
 0x100   : > { %v321_v21 = vsel %vm186_vm0, 0, %v320_v15  ;;  %v346_v22 = vrot.slane %v341_v17, 4  ;;  %v349_v23 = vsel %vm186_vm0, 0, %v348_v18  ;;  %v369_v33 = vsel %vm186_vm0, %v348_v18, %v341_v17 }
 0x101   : > { %v374_v24 = vrot.slane %v349_v23, 4  ;;  %v356_v27 = vsel %vm186_vm0, %v355_v19, %v321_v21  ;;  %v354_v38 = vperm.slane %v350_v25, %v1051_v11  ;;  %v373_v44 = vperm.slane %v369_v33, %v1051_v11  ;;  %v155_v19 = vld [vmem:[%s148_s22] sm:$0x1] }
 0x102   : > { %v347_v29 = vsel %vm186_vm0, 0, %v346_v22  ;;  %v360_v30 = vperm.slane %v356_v27, %v1051_v11  ;;  %v265_v8 = vsel %vm186_vm0, 0, %v264_v60  ;;  %v268_v10 = vpack.i.b16 %v263_v50, %v244_v52 }
 0x103   : > { %v375_v34 = vsel %vm186_vm0, %v374_v24, %v347_v29  ;;  %v246_v13 = vsel %vm186_vm0, 0, %v245_v4  ;;  %v276_v14 = vshrl.u32 %v265_v8, 16  ;;  %v271_v15 = vpack.i.b16 %v270_v7, %v269_v12 }
 0x104   : > { %v361_v40 = vrot.slane %v360_v30, 4  ;;  %v379_v42 = vperm.slane %v375_v34, %v1051_v11  ;;  %v274_v16 = vpack.i.b16 %v265_v8, %v246_v13  ;;  %v275_v17 = vshrl.u32 %v246_v13, 16 }
 0x105   : > { %vm603_vm2 = vcmp.gt.f32.partialorder %v155_v19, 0.0  ;;  %v1003_v21 = vmov -1e+09   ;;  %v606_v23 = vshrl.u32 %v605_v20, 7  ;;  %v608_v24 = vand.u32 127, %v605_v20 }
 0x106   : > { %v362_v37 = vsel %vm186_vm0, %v361_v40, %v354_v38  ;;  %v380_v39 = vrot.slane %v379_v42, 4  ;;  %v277_v18 = vpack.i.b16 %v276_v14, %v275_v17  ;;  %v604_v22 = vsel %vm603_vm2, 0.0, %v1003_v21 }
 0x107   : > { %v366_v45 = vperm.slane %v362_v37, %v1061_v26  ;;  %v611_v25 = vperm.slane %v604_v22, 0  ;;  %vm609_vm3 = vcmp.le.s32.totalorder %v608_v24, %v606_v23 }
 0x108   : > { %v381_v47 = vsel %vm186_vm0, %v380_v39, %v373_v44 }
 0x109   : > { %v385_v48 = vperm.slane %v381_v47, %v1061_v26  ;;  %v367_v49 = vrot.slane %v366_v45, 4  ;;  %v391_v51 = vshrl.u32 %v366_v45, 16  ;;  %v613_v28 = vsel %vm609_vm3, %v611_v25, -1e+09 }
 0x10b   : > { %v390_v53 = vpack.i.b16 %v385_v48, %v366_v45  ;;  %v392_v54 = vshrl.u32 %v385_v48, 16  ;;  %v368_v55 = vsel %vm186_vm0, 0, %v367_v49  ;;  %v386_v56 = vrot.slane %v385_v48, 4  ;;  %v401_v49 = vpop.permute.xlu1 %400 }
 0x10c   : > { %v397_v62 = vshrl.u32 %v368_v55, 16 }
 0x10d   : > { %v527_v57 = vsel %vm522_vm1, %v390_v53, 0  ;;  %v393_v58 = vpack.i.b16 %v392_v54, %v391_v51  ;;  %v387_v59 = vsel %vm186_vm0, 0, %v386_v56 }
 0x10e   : > { %536 = vmatpush.bf16.xpose.msra.mxu0 %v527_v57  ;;  %v396_v61 = vpack.i.b16 %v387_v59, %v368_v55  ;;  %v398_v63 = vshrl.u32 %v387_v59, 16 }
 0x10f   : > { %v546_v0 = vsel %vm522_vm1, %v393_v58, 0 }
 0x110   : > { %555 = vmatpush.bf16.xpose.msra.mxu1 %v546_v0  ;;  %v565_v5 = vsel %vm522_vm1, %v396_v61, 0  ;;  %v399_v6 = vpack.i.b16 %v398_v63, %v397_v62 }
 0x111   : > { %574 = vmatpush.bf16.xpose.msra.mxu2 %v565_v5 }
 0x112   : > { %v584_v9 = vsel %vm522_vm1, %v399_v6, 0  ;;  %v411_v6 = vshrl.u32 %v401_v49, 16 }
 0x113   : > { %593 = vmatpush.bf16.xpose.msra.mxu3 %v584_v9 }
 0x115   : > { %943 = vmatmul.msk.bf16.vlgmr.msra.gmra.mxu0 %vm522_vm1, %v268_v10 }
 0x117   : > { %944 = vmatmul.msk.bf16.vlgmr.msra.gmra.mxu1 %vm522_vm1, %v271_v15 }
 0x118   : > { %945 = vmatmul.msk.bf16.vlgmr.msra.gmra.mxu2 %vm522_vm1, %v274_v16 }
 0x11a   : > { %946 = vmatmul.msk.bf16.vlgmr.msra.gmra.mxu3 %vm522_vm1, %v277_v18 }
 0x192   : > { %v538_v27 = vpop.f32.mrf.mxu0 }
 0x193   : > { %v599_v29 = vmul.f32 0.35355338, %v538_v27 }
 0x194   : > { %v557_v30 = vpop.f32.mrf.mxu1 }
 0x195   : > { %v600_v31 = vmul.f32 0.35355338, %v557_v30  ;;  %v614_v32 = vadd.f32 %v613_v28, %v599_v29 }
 0x197   : > { %v618_v33 = vsel %vm522_vm1, %v614_v32, -inf  ;;  %v615_v34 = vadd.f32 %v613_v28, %v600_v31 }
 0x198   : > { %619 = vmax.xlane.f32.xlu0 %v618_v33 }
 0x199   : > { %v621_v35 = vsel %vm522_vm1, %v615_v34, -inf }
 0x19a   : > { %622 = vmax.xlane.f32.xlu2 %v621_v35  ;;  %v540_v38 = vpop.f32.mrf.mxu0 }
 0x19b   : > { %v576_v40 = vpop.f32.mrf.mxu2 }
 0x19c   : > { %v601_v42 = vmul.f32 0.35355338, %v576_v40  ;;  %v559_v43 = vpop.f32.mrf.mxu1 }
 0x19d   : > { %v595_v36 = vpop.f32.mrf.mxu3 }
 0x19e   : > { %v602_v37 = vmul.f32 0.35355338, %v595_v36  ;;  %v616_v44 = vadd.f32 %v613_v28, %v601_v42 }
 0x1a0   : > { %v624_v39 = vsel %vm522_vm1, %v616_v44, -inf  ;;  %v617_v41 = vadd.f32 %v613_v28, %v602_v37 }
 0x1a1   : > { %625 = vmax.xlane.f32.xlu1 %v624_v39 }
 0x1a2   : > { %v627_v45 = vsel %vm522_vm1, %v617_v41, -inf }
 0x1a3   : > { %628 = vmax.xlane.f32.xlu2 %v627_v45  ;;  %v578_v46 = vpop.f32.mrf.mxu2 }
 0x1a5   : > { %v597_v47 = vpop.f32.mrf.mxu3 }
 0x1ac   : > { %404 = vrot.lane.b32.xlu0 %v1044_v3, %s1000_s19 }
 0x1ba   : > { %406 = vrot.lane.b32.xlu1 %v1038_v1, %s1000_s19 }
 0x1bb   : > { %402 = vrot.lane.b32.xlu2 %v1040_v2, %s1000_s19 }
 0x20b   : > { %v620_v48 = vpop.xlane.xlu0 %619 }
 0x20c   : > { %v630_v50 = vsub.f32 %v614_v32, %v620_v48 }
 0x20d   : > { %v623_v51 = vpop.xlane.xlu2 %622 }
 0x20e   : > { %v634_v52 = vmul.f32 1.442695, %v630_v50  ;;  %v631_v57 = vsub.f32 %v615_v34, %v623_v51 }
 0x210   : > { %972 = vpow2.f32 %v634_v52  ;;  %v636_v59 = vmul.f32 1.442695, %v631_v57 }
 0x214   : > { %v626_v53 = vpop.xlane.xlu1 %625 }
 0x215   : > { %v632_v54 = vsub.f32 %v616_v44, %v626_v53 }
 0x216   : > { %v1140_v55 = vpop.eup %972  ;;  %v629_v56 = vpop.xlane.xlu2 %628 }
 0x217   : > { %v638_v58 = vmul.f32 1.442695, %v632_v54  ;;  %v633_v3 = vsub.f32 %v617_v41, %v629_v56  ;;  %v642_v1 = vsel %vm522_vm1, %v1140_v55, 0.0 }
 0x218   : > { %643 = vadd.xlane.f32.xlu1 %v642_v1 }
 0x219   : > { %974 = vpow2.f32 %v638_v58  ;;  %v640_v2 = vmul.f32 1.442695, %v633_v3 }
 0x21b   : > { %976 = vpow2.f32 %v640_v2 }
 0x21c   : > { %978 = vpow2.f32 %v636_v59 }
 0x21e   : > { %v403_v63 = vpop.permute.xlu2 %402  ;;  %v405_v10 = vpop.permute.xlu0 %404 }
 0x21f   : > { %v1144_v60 = vpop.eup %974  ;;  %v412_v5 = vshrl.u32 %v403_v63, 16  ;;  %v410_v7 = vpack.i.b16 %v403_v63, %v401_v49  ;;  %v417_v14 = vshrl.u32 %v405_v10, 16 }
 0x220   : > { %v648_v61 = vsel %vm522_vm1, %v1144_v60, 0.0 }
 0x221   : > { %v1148_v62 = vpop.eup %976  ;;  %649 = vadd.xlane.f32.xlu0 %v648_v61  ;;  %v413_v9 = vpack.i.b16 %v412_v5, %v411_v6  ;;  %v424_v12 = vperm.slane %v410_v7, %v1051_v11 }
 0x222   : > { %v651_v0 = vsel %vm522_vm1, %v1148_v62, 0.0  ;;  %v1152_v4 = vpop.eup %978 }
 0x223   : > { %652 = vadd.xlane.f32.xlu2 %v651_v0  ;;  %v645_v8 = vsel %vm522_vm1, %v1152_v4, 0.0  ;;  %v450_v15 = vperm.slane %v413_v9, %v1051_v11  ;;  %v432_v18 = vrot.slane %v424_v12, 4 }
 0x225   : > { %v458_v21 = vrot.slane %v450_v15, 4 }
 0x229   : > { %646 = vadd.xlane.f32.xlu0 %v645_v8 }
 0x22c   : > { %v407_v13 = vpop.permute.xlu1 %406 }
 0x22d   : > { %v416_v16 = vpack.i.b16 %v407_v13, %v405_v10  ;;  %v418_v17 = vshrl.u32 %v407_v13, 16 }
 0x22f   : > { %v419_v19 = vpack.i.b16 %v418_v17, %v417_v14  ;;  %v429_v20 = vperm.slane %v416_v16, %v1051_v11 }
 0x231   : > { %v430_v22 = vrot.slane %v429_v20, 4  ;;  %v433_v23 = vsel %vm186_vm0, %v429_v20, %v432_v18  ;;  %v455_v24 = vperm.slane %v419_v19, %v1051_v11 }
 0x232   : > { %v441_v25 = vperm.slane %v433_v23, %v1061_v26 }
 0x233   : > { %v431_v27 = vsel %vm186_vm0, %v430_v22, %v424_v12  ;;  %v456_v28 = vrot.slane %v455_v24, 4  ;;  %v459_v29 = vsel %vm186_vm0, %v455_v24, %v458_v21 }
 0x234   : > { %v437_v30 = vperm.slane %v431_v27, %v1061_v26  ;;  %v444_v31 = vrot.slane %v441_v25, 4  ;;  %v467_v32 = vperm.slane %v459_v29, %v1061_v26 }
 0x235   : > { %v457_v33 = vsel %vm186_vm0, %v456_v28, %v450_v15 }
 0x236   : > { %v442_v34 = vrot.slane %v437_v30, 4  ;;  %v445_v35 = vsel %vm186_vm0, 0, %v444_v31  ;;  %v463_v38 = vperm.slane %v457_v33, %v1061_v26  ;;  %v470_v40 = vrot.slane %v467_v32, 4 }
 0x237   : > { %v477_v42 = vrot.slane %v445_v35, 4  ;;  %v472_v39 = vsel %vm186_vm0, %v444_v31, %v437_v30 }
 0x238   : > { %v443_v43 = vsel %vm186_vm0, 0, %v442_v34  ;;  %v468_v36 = vrot.slane %v463_v38, 4  ;;  %v471_v37 = vsel %vm186_vm0, 0, %v470_v40  ;;  %v491_v47 = vsel %vm186_vm0, %v470_v40, %v463_v38 }
 0x239   : > { %v496_v44 = vrot.slane %v471_v37, 4  ;;  %v478_v41 = vsel %vm186_vm0, %v477_v42, %v443_v43  ;;  %v476_v49 = vperm.slane %v472_v39, %v1051_v11  ;;  %v495_v53 = vperm.slane %v491_v47, %v1051_v11 }
 0x23a   : > { %v469_v45 = vsel %vm186_vm0, 0, %v468_v36  ;;  %v482_v46 = vperm.slane %v478_v41, %v1051_v11 }
 0x23b   : > { %v497_v48 = vsel %vm186_vm0, %v496_v44, %v469_v45 }
 0x23c   : > { %v483_v50 = vrot.slane %v482_v46, 4  ;;  %v501_v51 = vperm.slane %v497_v48, %v1051_v11 }
 0x23e   : > { %v484_v52 = vsel %vm186_vm0, %v483_v50, %v476_v49  ;;  %v502_v54 = vrot.slane %v501_v51, 4 }
 0x23f   : > { %v488_v56 = vperm.slane %v484_v52, %v1061_v26 }
 0x240   : > { %v503_v57 = vsel %vm186_vm0, %v502_v54, %v495_v53 }
 0x241   : > { %v507_v58 = vperm.slane %v503_v57, %v1061_v26  ;;  %v489_v3 = vrot.slane %v488_v56, 4  ;;  %v513_v1 = vshrl.u32 %v488_v56, 16 }
 0x243   : > { %v512_v2 = vpack.i.b16 %v507_v58, %v488_v56  ;;  %v514_v59 = vshrl.u32 %v507_v58, 16  ;;  %v490_v61 = vsel %vm186_vm0, 0, %v489_v3  ;;  %v508_v63 = vrot.slane %v507_v58, 4 }
 0x244   : > { %v519_v8 = vshrl.u32 %v490_v61, 16 }
 0x245   : > { %v671_v0 = vsel %vm669_vm4, %v512_v2, 0  ;;  %v515_v5 = vpack.i.b16 %v514_v59, %v513_v1  ;;  %v509_v6 = vsel %vm186_vm0, 0, %v508_v63 }
 0x246   : > { %680 = vmatpush.bf16.msrb.mxu0 %v671_v0  ;;  %v518_v7 = vpack.i.b16 %v509_v6, %v490_v61  ;;  %v520_v9 = vshrl.u32 %v509_v6, 16 }
 0x247   : > { %v690_v10 = vsel %vm669_vm4, %v515_v5, 0 }
 0x248   : > { %699 = vmatpush.bf16.msrb.mxu1 %v690_v10  ;;  %v709_v12 = vsel %vm669_vm4, %v518_v7, 0  ;;  %v521_v13 = vpack.i.b16 %v520_v9, %v519_v8 }
 0x249   : > { %718 = vmatpush.bf16.msrb.mxu2 %v709_v12 }
 0x24a   : > { %v728_v14 = vsel %vm669_vm4, %v521_v13, 0 }
 0x24b   : > { %737 = vmatpush.bf16.msrb.mxu3 %v728_v14 }
 0x28b   : > { %v644_v15 = vpop.xlane.xlu1 %643 }
 0x28c   : > { %980 = vrcp.f32 %v644_v15 }
 0x292   : > { %v981_v16 = vpop.eup %980 }
 0x293   : > { %v658_v17 = vmul.f32 %v981_v16, %v1140_v55 }
 0x294   : > { %v650_v18 = vpop.xlane.xlu0 %649 }
 0x295   : > { %982 = vrcp.f32 %v650_v18  ;;  %v662_v19 = vpack.c.bf16 %v658_v17, %v658_v17 }
 0x296   : > { %v653_v20 = vpop.xlane.xlu2 %652 }
 0x297   : > { %984 = vrcp.f32 %v653_v20  ;;  %947 = vmatmul.msk.bf16.vlgmr.msrb.gmra.mxu0 %vm522_vm1, %v662_v19 }
 0x29b   : > { %v983_v21 = vpop.eup %982 }
 0x29c   : > { %v660_v22 = vmul.f32 %v983_v21, %v1144_v60  ;;  %v647_v23 = vpop.xlane.xlu0 %646 }
 0x29d   : > { %v985_v24 = vpop.eup %984  ;;  %986 = vrcp.f32 %v647_v23 }
 0x29e   : > { %v661_v25 = vmul.f32 %v985_v24, %v1148_v62  ;;  %v664_v27 = vpack.c.bf16 %v660_v22, %v660_v22 }
 0x2a0   : > { %949 = vmatmul.msk.bf16.vlgmr.msrb.gmra.mxu2 %vm522_vm1, %v664_v27  ;;  %v665_v28 = vpack.c.bf16 %v661_v25, %v661_v25 }
 0x2a2   : > { %950 = vmatmul.msk.bf16.vlgmr.msrb.gmra.mxu3 %vm522_vm1, %v665_v28 }
 0x2a3   : > { %v987_v55 = vpop.eup %986 }
 0x2a4   : > { %v659_v29 = vmul.f32 %v987_v55, %v1152_v4 }
 0x2a6   : > { %v663_v30 = vpack.c.bf16 %v659_v29, %v659_v29 }
 0x2a8   : > { %948 = vmatmul.msk.bf16.vlgmr.msrb.gmra.mxu1 %vm522_vm1, %v663_v30 }
 0x314   : > { %v682_v31 = vpop.f32.mrf.mxu0 }
 0x315   : > { %v746_v60 = vrot.slane %v682_v31, 4 }
 0x31c   : > { %v684_v32 = vpop.f32.mrf.mxu0 }
 0x323   : > { %v720_v33 = vpop.f32.mrf.mxu2 }
 0x324   : > { %v743_v34 = vrot.slane %v720_v33, 4  ;;  %v747_v35 = vsel %vm186_vm0, %v720_v33, %v746_v60 }
 0x325   : > { %v755_v62 = vperm.slane %v747_v35, %v1051_v11  ;;  %v701_v38 = vpop.f32.mrf.mxu1  ;;  %v739_v40 = vpop.f32.mrf.mxu3 }
 0x326   : > { %v745_v42 = vsel %vm186_vm0, %v743_v34, %v682_v31  ;;  %v758_v43 = vrot.slane %v701_v38, 4  ;;  %v756_v36 = vrot.slane %v739_v40, 4 }
 0x327   : > { %v751_v4 = vperm.slane %v745_v42, %v1051_v11  ;;  %v782_v41 = vrot.slane %v755_v62, 4 }
 0x328   : > { %v757_v37 = vsel %vm186_vm0, %v756_v36, %v701_v38  ;;  %v759_v44 = vsel %vm186_vm0, %v739_v40, %v758_v43 }
 0x329   : > { %v770_v39 = vrot.slane %v751_v4, 4  ;;  %v763_v45 = vperm.slane %v757_v37, %v1051_v11  ;;  %v767_v46 = vperm.slane %v759_v44, %v1051_v11 }
 0x32b   : > { %v768_v47 = vrot.slane %v763_v45, 4  ;;  %v771_v48 = vsel %vm186_vm0, %v763_v45, %v770_v39  ;;  %v780_v49 = vrot.slane %v767_v46, 4  ;;  %v783_v50 = vsel %vm186_vm0, %v767_v46, %v782_v41  ;;  %v722_v51 = vpop.f32.mrf.mxu2 }
 0x32c   : > { %v779_v52 = vperm.slane %v771_v48, %v1061_v26  ;;  %v791_v53 = vperm.slane %v783_v50, %v1061_v26 }
 0x32d   : > { %v769_v54 = vsel %vm186_vm0, %v768_v47, %v751_v4  ;;  %v781_v56 = vsel %vm186_vm0, %v780_v49, %v755_v62  ;;  %v703_v57 = vpop.f32.mrf.mxu1  ;;  %v741_v58 = vpop.f32.mrf.mxu3 }
 0x32e   : > { %v775_v3 = vperm.slane %v769_v54, %v1061_v26  ;;  %v787_v1 = vperm.slane %v781_v56, %v1061_v26  ;;  %v794_v2 = vrot.slane %v779_v52, 4  ;;  %v798_v59 = vrot.slane %v791_v53, 4 }
 0x330   : > { %v792_v61 = vrot.slane %v775_v3, 4  ;;  %v795_v63 = vsel %vm186_vm0, 0.0, %v794_v2  ;;  %v796_v0 = vrot.slane %v787_v1, 4  ;;  %v799_v5 = vsel %vm186_vm0, 0.0, %v798_v59 }
 0x331   : > { %v805_v6 = vrot.slane %v795_v63, 4  ;;  %v811_v7 = vsel %vm186_vm0, %v798_v59, %v787_v1  ;;  %v816_v8 = vrot.slane %v799_v5, 4  ;;  %v800_v9 = vsel %vm186_vm0, %v794_v2, %v775_v3 }
 0x332   : > { %v797_v10 = vsel %vm186_vm0, 0.0, %v796_v0  ;;  %v793_v12 = vsel %vm186_vm0, 0.0, %v792_v61  ;;  %v804_v13 = vperm.slane %v800_v9, %v1051_v11  ;;  %v815_v14 = vperm.slane %v811_v7, %v1051_v11 }
 0x333   : > { %v806_v15 = vsel %vm186_vm0, %v805_v6, %v793_v12  ;;  %v817_v16 = vsel %vm186_vm0, %v816_v8, %v797_v10 }
 0x334   : > { %v810_v17 = vperm.slane %v806_v15, %v1051_v11  ;;  %v821_v18 = vperm.slane %v817_v16, %v1051_v11  ;;  %v824_v19 = vrot.slane %v804_v13, 4  ;;  %v836_v20 = vrot.slane %v815_v14, 4 }
 0x336   : > { %v825_v21 = vsel %vm186_vm0, %v810_v17, %v824_v19  ;;  %v837_v22 = vsel %vm186_vm0, %v821_v18, %v836_v20  ;;  %v822_v23 = vrot.slane %v810_v17, 4  ;;  %v834_v24 = vrot.slane %v821_v18, 4 }
 0x337   : > { %v833_v25 = vperm.slane %v825_v21, %v1061_v26  ;;  %v845_v27 = vperm.slane %v837_v22, %v1061_v26 }
 0x338   : > { %v823_v28 = vsel %vm186_vm0, %v822_v23, %v804_v13  ;;  %v835_v55 = vsel %vm186_vm0, %v834_v24, %v815_v14 }
 0x339   : > { %v852_v29 = vrot.slane %v833_v25, 4  ;;  %v850_v30 = vrot.slane %v845_v27, 4  ;;  %v829_v11 = vperm.slane %v823_v28, %v1061_v26  ;;  %v841_v31 = vperm.slane %v835_v55, %v1061_v26 }
 0x33b   : > { %v853_v32 = vsel %vm186_vm0, %v845_v27, %v852_v29  ;;  %v851_v60 = vsel %vm186_vm0, %v850_v30, %v833_v25  ;;  %v846_v33 = vrot.slane %v841_v31, 4  ;;  %v848_v34 = vrot.slane %v829_v11, 4 }
 0x33c   : > { %863 = vrot.lane.b32.xlu0 %v853_v32, %s1004_s23  ;;  %859 = vrot.lane.b32.xlu1 %v851_v60, %s1005_s24 }
 0x33d   : > { %v849_v35 = vsel %vm186_vm0, %v841_v31, %v848_v34  ;;  %v847_v62 = vsel %vm186_vm0, %v846_v33, %v829_v11 }
 0x33e   : > { %855 = vrot.lane.b32.xlu2 %v849_v35, %s1006_s25 }
 0x398   : > { %v856_v38 = vpop.permute.xlu2 %855 }
 0x399   : > { %v866_v26 = vsel %vm522_vm1, %v847_v62, %v856_v38 }
 0x3ae   : > { %v864_v40 = vpop.permute.xlu0 %863  ;;  %v860_v42 = vpop.permute.xlu1 %859 }
 0x3af   : > { %v868_v43 = vsel %vm867_vm5, %v866_v26, %v860_v42 }
 0x3b0   : > { %v870_v36 = vsel %vm869_vm6, %v868_v43, %v864_v40 }
 0x3b1   : > { %v871_v4 = vpack.c.bf16 %v870_v36, %v870_v36 }
 0x3b3   : > { %873 = vst.msk [vmem:[%s152_s28] sm:$0xf] %vm872_vm7, %v871_v4 }
 0x3b4 PF: > { %s12_s9 = sadd.s32 1, %s994_s9  }
 0x3b5   : > { %p9_p4 = scmp.ge.s32.totalorder %s12_s9, 4  }
 0x3b7   :  { %11 = sbr.rel (!%p9_p4) target bundleno = 1 (0x1), region = 61 }

// kernel: transformer_forward.40
= control target key start
LH: loop header
LB: loop body
LE: loop exit
PB: predicated region body
PF: predicated region fallthrough
CT: control target
= control target key end

     0   :  { %12 = vsyncpa [#allocation3], 0  ;;  %s509_s0 = inlined_call_operand.vmem [shape: bf16[16,32], index: 0, kind: input, shape index: {}]   ;;  %s510_s1 = inlined_call_operand.vmem [shape: bf16[32,64], index: 1, kind: input, shape index: {}]   ;;  %s511_s2 = inlined_call_operand.hbm [shape: f32[1,64], index: 2, kind: input, shape index: {}]   ;;  %s512_s3 = inlined_call_operand.vmem [shape: bf16[64,32], index: 3, kind: input, shape index: {}]   ;;  %s513_s4 = inlined_call_operand.hbm [shape: f32[1,32], index: 4, kind: input, shape index: {}]   ;;  %s514_s5 = inlined_call_operand.hbm [shape: f32[1,32], index: 5, kind: input, shape index: {}]   ;;  %s515_s6 = inlined_call_operand.hbm [shape: f32[1,32], index: 6, kind: input, shape index: {}]   ;;  %s516_s7 = inlined_call_operand.vmem [shape: bf16[16,32], index: 7, kind: output, shape index: {}]  }
   0x1   :  { %13 = vsyncpa [#allocation5], 0  ;;  %s37_s26 = sshll.u32 %s513_s4, 4  ;;  %s38_s26 = int_to_ptr.hbm [resolvable:$true] %s37_s26 }
   0x2   :  { %14 = vsyncpa [#allocation8], 0  ;;  %s417_s27 = smov [#allocation4]   ;;  %s24_s8 = sshll.u32 %s511_s2, 4  ;;  %s25_s8 = int_to_ptr.hbm [resolvable:$true] %s24_s8 }
   0x3   :  { %s39_s28 = sshll.u32 %s417_s27, 4  ;;  %s418_s9 = smov [#allocation2]   ;;  %s40_s28 = int_to_ptr.vmem [resolvable:$true] %s39_s28 }
   0x4   :  { %42 = dma.hbm_to_vmem [thread:$0]  %s38_s26, 16, %s40_s28, [#allocation5]  }
   0x5   :  { %s26_s10 = sshll.u32 %s418_s9, 4  ;;  %s48_s13 = sshll.u32 %s514_s5, 4  ;;  %s27_s10 = int_to_ptr.vmem [resolvable:$true] %s26_s10  ;;  %s49_s13 = int_to_ptr.hbm [resolvable:$true] %s48_s13 }
   0x6   :  { %29 = dma.hbm_to_vmem [thread:$0]  %s25_s8, 16, %s27_s10, [#allocation3]  }
   0x7   :  { %s59_s15 = sshll.u32 %s515_s6, 4  ;;  %s419_s16 = smov [#allocation6]   ;;  %s60_s15 = int_to_ptr.hbm [resolvable:$true] %s59_s15 }
   0x8   :  { %s50_s17 = sshll.u32 %s419_s16, 4  ;;  %s420_s2 = smov [#allocation7]   ;;  %s51_s17 = int_to_ptr.vmem [resolvable:$true] %s50_s17 }
   0x9   :  { %53 = dma.hbm_to_vmem [thread:$0]  %s49_s13, 16, %s51_s17, [#allocation5]  }
   0xa   :  { %s61_s18 = sshll.u32 %s420_s2, 4  ;;  %s62_s18 = int_to_ptr.vmem [resolvable:$true] %s61_s18 }
   0xb   :  { %64 = dma.hbm_to_vmem [thread:$0]  %s60_s15, 16, %s62_s18, [#allocation8]  }
   0xc   :  { %411 = dma.done.wait [#allocation3], 16  }
   0xd   :  { %412 = vsyncadd [#allocation3], 4294967280 }
   0xe   :  { %413 = dma.done.wait [#allocation5], 32  }
   0xf   :  { %414 = vsyncadd [#allocation5], 4294967264 }
  0x10   :  { %415 = dma.done.wait [#allocation8], 16  }
  0x11   :  { %416 = vsyncadd [#allocation8], 4294967280  ;;  %v295_v0 = vld [vmem:[%s510_s1 + $0x8] sm:$0xff]  ;;  %v294_v1 = vld [vmem:[%s510_s1] sm:$0xff]  ;;  %vm109_vm0 = vcmask 261120   ;;  %vm166_vm1 = vcmask 523264  }
  0x12   :  { %119 = vmatpush.bf16.msra.mxu0 %v295_v0  ;;  %v293_v2 = vld [vmem:[%s509_s0] sm:$0xff]  ;;  %v299_v3 = vld [vmem:[%s512_s3 + $0x18] sm:$0xff]  ;;  %v298_v4 = vld [vmem:[%s512_s3 + $0x10] sm:$0xff]  ;;  %v421_v27 = vmov 32.0   ;;  %vm253_vm7 = vcmask 257024  }
  0x13   :  { %174 = vmatpush.bf16.msra.mxu1 %v299_v3  ;;  %v297_v5 = vld [vmem:[%s512_s3 + $0x8] sm:$0xff]  ;;  %v296_v6 = vld [vmem:[%s512_s3] sm:$0xff]  ;;  %309 = vrcp.f32 %v421_v27 }
  0x14   :  { %v305_v8 = vld [vmem:[#allocation2] ss:$0 sm:$0xff]  ;;  %v306_v16 = vld [vmem:[#allocation4] ss:$0 sm:$0xff]  ;;  %v307_v58 = vld [vmem:[#allocation6] ss:$0 sm:$0xff] }
  0x15   :  { %v82_v15 = vld [vmem:[%s509_s0] sm:$0xff]  }
  0x16   :  { %120 = vmatpush.bf16.msra.mxu0 %v294_v1  ;;  %v184_v17 = vunpack.c.l.bf16 %v82_v15  ;;  %v185_v22 = vunpack.c.h.bf16 %v82_v15  ;;  %v308_v61 = vld [vmem:[#allocation7] ss:$0 sm:$0xff] }
  0x17   :  { %175 = vmatpush.bf16.msra.mxu1 %v298_v4 }
  0x19   :  { %275 = vmatmul.msk.bf16.vlgmr.msra.gmra.mxu0 %vm109_vm0, %v293_v2  ;;  %v310_v28 = vpop.eup %309 }
  0x1a   :  { %v195_v29 = vmul.f32 32.0, %v310_v28  ;;  %vm199_vm2 = vweird.f32 %v310_v28 }
  0x1b   :  { %176 = vmatpush.bf16.msra.mxu1 %v297_v5 }
  0x1c   :  { %v196_v30 = vsub.f32 1.0, %v195_v29 }
  0x1e   :  { %v197_v31 = vmul.f32 %v310_v28, %v196_v30 }
  0x1f   :  { %177 = vmatpush.bf16.msra.mxu1 %v296_v6 }
  0x20   :  { %v198_v32 = vadd.f32 %v310_v28, %v197_v31 }
  0x22   :  { %v200_v33 = vsel %vm199_vm2, %v310_v28, %v198_v32 }
  0x96   :  { %v122_v7 = vpop.f32.mrf.mxu0 }
  0x97   :  { %v123_v9 = vadd.f32 %v305_v8, %v122_v7 }
  0x99   :  { %v127_v12 = vmax.f32 %v123_v9, 0.0 }
  0x9e   :  { %v124_v10 = vpop.f32.mrf.mxu0 }
  0x9f   :  { %v125_v11 = vadd.f32 %v305_v8, %v124_v10 }
  0xa1   :  { %v128_v13 = vmax.f32 %v125_v11, 0.0 }
  0xa3   :  { %v129_v14 = vpack.c.bf16 %v128_v13, %v127_v12 }
  0xa5   :  { %292 = vmatmul.msk.bf16.vlgmr.msra.gmra.mxu1 %vm166_vm1, %v129_v14 }
 0x122   :  { %v179_v18 = vpop.f32.mrf.mxu1 }
 0x123   :  { %v180_v19 = vadd.f32 %v306_v16, %v179_v18 }
 0x125   :  { %v186_v20 = vadd.f32 %v184_v17, %v180_v19 }
 0x127   :  { %v188_v21 = vsel %vm109_vm0, %v186_v20, 0.0 }
 0x128   :  { %189 = vadd.xlane.f32.xlu0 %v188_v21 }
 0x12a   :  { %v181_v23 = vpop.f32.mrf.mxu1 }
 0x12b   :  { %v182_v24 = vadd.f32 %v306_v16, %v181_v23 }
 0x12d   :  { %v187_v25 = vadd.f32 %v185_v22, %v182_v24 }
 0x12f   :  { %v191_v26 = vsel %vm109_vm0, %v187_v25, 0.0 }
 0x130   :  { %192 = vadd.xlane.f32.xlu0 %v191_v26 }
 0x19b   :  { %v190_v34 = vpop.xlane.xlu0 %189 }
 0x19c   :  { %v201_v35 = vmul.f32 %v200_v33, %v190_v34 }
 0x19e   :  { %v203_v36 = vsub.f32 %v186_v20, %v201_v35 }
 0x1a0   :  { %v205_v37 = vmul.f32 %v203_v36, %v203_v36 }
 0x1a2   :  { %v207_v38 = vsel %vm109_vm0, %v205_v37, 0.0 }
 0x1a3   :  { %208 = vadd.xlane.f32.xlu1 %v207_v38  ;;  %v193_v39 = vpop.xlane.xlu0 %192 }
 0x1a4   :  { %v202_v40 = vmul.f32 %v200_v33, %v193_v39 }
 0x1a6   :  { %v204_v41 = vsub.f32 %v187_v25, %v202_v40 }
 0x1a8   :  { %v206_v42 = vmul.f32 %v204_v41, %v204_v41 }
 0x1aa   :  { %v210_v43 = vsel %vm109_vm0, %v206_v42, 0.0 }
 0x1ab   :  { %211 = vadd.xlane.f32.xlu1 %v210_v43 }
 0x216   :  { %v209_v44 = vpop.xlane.xlu1 %208 }
 0x217   :  { %v213_v45 = vmul.f32 %v209_v44, %v200_v33 }
 0x219   :  { %v215_v46 = vadd.f32 1e-05, %v213_v45 }
 0x21b   :  { %311 = vrsqrt.f32 %v215_v46  ;;  %vm223_vm4 = vweird.f32 %v215_v46 }
 0x21e   :  { %v212_v47 = vpop.xlane.xlu1 %211 }
 0x21f   :  { %v214_v48 = vmul.f32 %v212_v47, %v200_v33 }
 0x221   :  { %v312_v49 = vpop.eup %311  ;;  %v216_v50 = vadd.f32 1e-05, %v214_v48 }
 0x222   :  { %v218_v51 = vmul.f32 %v312_v49, %v215_v46  ;;  %vm224_vm3 = vweird.f32 %v312_v49 }
 0x223   :  { %313 = vrsqrt.f32 %v216_v50  ;;  %vm225_vm5 = vmor %vm223_vm4, %vm224_vm3  ;;  %vm233_vm8 = vweird.f32 %v216_v50 }
 0x224   :  { %v219_v52 = vmul.f32 %v312_v49, %v218_v51 }
 0x226   :  { %v220_v53 = vmul.f32 0.5, %v219_v52 }
 0x228   :  { %v221_v54 = vsub.f32 1.5, %v220_v53 }
 0x229   :  { %v314_v55 = vpop.eup %313 }
 0x22a   :  { %v222_v56 = vmul.f32 %v312_v49, %v221_v54  ;;  %v228_v57 = vmul.f32 %v314_v55, %v216_v50  ;;  %vm234_vm6 = vweird.f32 %v314_v55 }
 0x22b   :  { %vm235_vm9 = vmor %vm233_vm8, %vm234_vm6 }
 0x22c   :  { %v226_v59 = vsel %vm225_vm5, %v312_v49, %v222_v56  ;;  %v229_v60 = vmul.f32 %v314_v55, %v228_v57 }
 0x22d   :  { %v237_v62 = vmul.f32 %v226_v59, %v203_v36 }
 0x22e   :  { %v230_v63 = vmul.f32 0.5, %v229_v60 }
 0x22f   :  { %v243_v0 = vmul.f32 %v307_v58, %v237_v62 }
 0x230   :  { %v231_v1 = vsub.f32 1.5, %v230_v63 }
 0x231   :  { %v249_v2 = vadd.f32 %v308_v61, %v243_v0 }
 0x232   :  { %v232_v3 = vmul.f32 %v314_v55, %v231_v1 }
 0x233   :  { %v251_v4 = vpack.c.bf16 %v249_v2, %v249_v2 }
 0x234   :  { %v236_v5 = vsel %vm235_vm9, %v314_v55, %v232_v3 }
 0x235   :  { %254 = vst.msk [vmem:[%s516_s7] sm:$0xf] %vm253_vm7, %v251_v4  ;;  %v238_v6 = vmul.f32 %v236_v5, %v204_v41 }
 0x237   :  { %v244_v7 = vmul.f32 %v307_v58, %v238_v6 }
 0x239   :  { %v250_v8 = vadd.f32 %v308_v61, %v244_v7 }
 0x23b   :  { %v252_v9 = vpack.c.bf16 %v250_v8, %v250_v8 }
 0x23d   :  { %255 = vst.msk [vmem:[%s516_s7 + $0x4] sm:$0xf] %vm253_vm7, %v252_v9 }
 0x23e   :  { %260 = vsyncpa [#allocation3], 1 }
 0x23f   :  { %261 = vsyncpa [#allocation5], 1 }
 0x240   :  { %262 = vsyncpa [#allocation8], 1 }

// kernel: transformer_forward.39
= control target key start
LH: loop header
LB: loop body
LE: loop exit
PB: predicated region body
PF: predicated region fallthrough
CT: control target
= control target key end

     0   :  { %11 = vsyncpa [#allocation3], 0  ;;  %s370_s0 = inlined_call_operand.vmem [shape: bf16[16,32], index: 0, kind: input, shape index: {}]   ;;  %s371_s1 = inlined_call_operand.vmem [shape: bf16[32,32], index: 1, kind: input, shape index: {}]   ;;  %s372_s2 = inlined_call_operand.hbm [shape: f32[1,32], index: 2, kind: input, shape index: {}]   ;;  %s373_s3 = inlined_call_operand.vmem [shape: bf16[16,32], index: 3, kind: input, shape index: {}]   ;;  %s374_s4 = inlined_call_operand.hbm [shape: f32[1,32], index: 4, kind: input, shape index: {}]   ;;  %s375_s5 = inlined_call_operand.hbm [shape: f32[1,32], index: 5, kind: input, shape index: {}]   ;;  %s376_s6 = inlined_call_operand.vmem [shape: bf16[16,32], index: 6, kind: output, shape index: {}]  }
   0x1   :  { %12 = vsyncpa [#allocation5], 0  ;;  %s35_s23 = sshll.u32 %s374_s4, 4  ;;  %s299_s24 = smov [#allocation4]   ;;  %s36_s23 = int_to_ptr.hbm [resolvable:$true] %s35_s23 }
   0x2   :  { %s37_s25 = sshll.u32 %s299_s24, 4  ;;  %s22_s28 = sshll.u32 %s372_s2, 4  ;;  %s38_s25 = int_to_ptr.vmem [resolvable:$true] %s37_s25  ;;  %s23_s28 = int_to_ptr.hbm [resolvable:$true] %s22_s28 }
   0x3   :  { %40 = dma.hbm_to_vmem [thread:$0]  %s36_s23, 16, %s38_s25, [#allocation5]  }
   0x4   :  { %s300_s29 = smov [#allocation2]   ;;  %s46_s9 = sshll.u32 %s375_s5, 4  ;;  %s47_s9 = int_to_ptr.hbm [resolvable:$true] %s46_s9 }
   0x5   :  { %s24_s30 = sshll.u32 %s300_s29, 4  ;;  %s301_s4 = smov [#allocation6]   ;;  %s25_s30 = int_to_ptr.vmem [resolvable:$true] %s24_s30 }
   0x6   :  { %27 = dma.hbm_to_vmem [thread:$0]  %s23_s28, 16, %s25_s30, [#allocation3]  }
   0x7   :  { %s48_s10 = sshll.u32 %s301_s4, 4  ;;  %s49_s10 = int_to_ptr.vmem [resolvable:$true] %s48_s10 }
   0x8   :  { %51 = dma.hbm_to_vmem [thread:$0]  %s47_s9, 16, %s49_s10, [#allocation5]  }
   0x9   :  { %295 = dma.done.wait [#allocation3], 16  }
   0xa   :  { %296 = vsyncadd [#allocation3], 4294967280 }
   0xb   :  { %297 = dma.done.wait [#allocation5], 32  }
   0xc   :  { %298 = vsyncadd [#allocation5], 4294967264  ;;  %v205_v0 = vld [vmem:[%s371_s1 + $0x8] sm:$0xff]  ;;  %v204_v1 = vld [vmem:[%s371_s1] sm:$0xff]  ;;  %vm92_vm0 = vcmask 261120   ;;  %v302_v15 = vmov 32.0  }
   0xd   :  { %102 = vmatpush.bf16.msra.mxu0 %v205_v0  ;;  %v203_v2 = vld [vmem:[%s370_s0] sm:$0xff]  ;;  %217 = vrcp.f32 %v302_v15  ;;  %vm181_vm6 = vcmask 257024  }
   0xe   :  { %v207_v3 = vld [vmem:[%s373_s3] sm:$0xff]  }
   0xf   :  { %v214_v4 = vld [vmem:[#allocation2] ss:$0 sm:$0xff]  ;;  %v208_v5 = vunpack.c.l.bf16 %v207_v3  ;;  %v209_v10 = vunpack.c.h.bf16 %v207_v3  ;;  %v215_v46 = vld [vmem:[#allocation4] ss:$0 sm:$0xff]  ;;  %v216_v49 = vld [vmem:[#allocation6] ss:$0 sm:$0xff] }
  0x11   :  { %103 = vmatpush.bf16.msra.mxu0 %v204_v1 }
  0x13   :  { %v218_v16 = vpop.eup %217 }
  0x14   :  { %202 = vmatmul.msk.bf16.vlgmr.msra.gmra.mxu0 %vm92_vm0, %v203_v2  ;;  %v123_v17 = vmul.f32 32.0, %v218_v16  ;;  %vm127_vm1 = vweird.f32 %v218_v16 }
  0x16   :  { %v124_v18 = vsub.f32 1.0, %v123_v17 }
  0x18   :  { %v125_v19 = vmul.f32 %v218_v16, %v124_v18 }
  0x1a   :  { %v126_v20 = vadd.f32 %v218_v16, %v125_v19 }
  0x1c   :  { %v128_v21 = vsel %vm127_vm1, %v218_v16, %v126_v20 }
  0x91   :  { %v105_v6 = vpop.f32.mrf.mxu0 }
  0x92   :  { %v106_v7 = vadd.f32 %v214_v4, %v105_v6 }
  0x94   :  { %v114_v8 = vadd.f32 %v208_v5, %v106_v7 }
  0x96   :  { %v116_v9 = vsel %vm92_vm0, %v114_v8, 0.0 }
  0x97   :  { %117 = vadd.xlane.f32.xlu0 %v116_v9 }
  0x99   :  { %v107_v11 = vpop.f32.mrf.mxu0 }
  0x9a   :  { %v108_v12 = vadd.f32 %v214_v4, %v107_v11 }
  0x9c   :  { %v115_v13 = vadd.f32 %v209_v10, %v108_v12 }
  0x9e   :  { %v119_v14 = vsel %vm92_vm0, %v115_v13, 0.0 }
  0x9f   :  { %120 = vadd.xlane.f32.xlu0 %v119_v14 }
 0x10a   :  { %v118_v22 = vpop.xlane.xlu0 %117 }
 0x10b   :  { %v129_v23 = vmul.f32 %v128_v21, %v118_v22 }
 0x10d   :  { %v131_v24 = vsub.f32 %v114_v8, %v129_v23 }
 0x10f   :  { %v133_v25 = vmul.f32 %v131_v24, %v131_v24 }
 0x111   :  { %v135_v26 = vsel %vm92_vm0, %v133_v25, 0.0 }
 0x112   :  { %136 = vadd.xlane.f32.xlu1 %v135_v26  ;;  %v121_v27 = vpop.xlane.xlu0 %120 }
 0x113   :  { %v130_v28 = vmul.f32 %v128_v21, %v121_v27 }
 0x115   :  { %v132_v29 = vsub.f32 %v115_v13, %v130_v28 }
 0x117   :  { %v134_v30 = vmul.f32 %v132_v29, %v132_v29 }
 0x119   :  { %v138_v31 = vsel %vm92_vm0, %v134_v30, 0.0 }
 0x11a   :  { %139 = vadd.xlane.f32.xlu1 %v138_v31 }
 0x185   :  { %v137_v32 = vpop.xlane.xlu1 %136 }
 0x186   :  { %v141_v33 = vmul.f32 %v137_v32, %v128_v21 }
 0x188   :  { %v143_v34 = vadd.f32 1e-05, %v141_v33 }
 0x18a   :  { %219 = vrsqrt.f32 %v143_v34  ;;  %vm151_vm3 = vweird.f32 %v143_v34 }
 0x18d   :  { %v140_v35 = vpop.xlane.xlu1 %139 }
 0x18e   :  { %v142_v36 = vmul.f32 %v140_v35, %v128_v21 }
 0x190   :  { %v220_v37 = vpop.eup %219  ;;  %v144_v38 = vadd.f32 1e-05, %v142_v36 }
 0x191   :  { %v146_v39 = vmul.f32 %v220_v37, %v143_v34  ;;  %vm152_vm2 = vweird.f32 %v220_v37 }
 0x192   :  { %221 = vrsqrt.f32 %v144_v38  ;;  %vm153_vm4 = vmor %vm151_vm3, %vm152_vm2  ;;  %vm161_vm7 = vweird.f32 %v144_v38 }
 0x193   :  { %v147_v40 = vmul.f32 %v220_v37, %v146_v39 }
 0x195   :  { %v148_v41 = vmul.f32 0.5, %v147_v40 }
 0x197   :  { %v149_v42 = vsub.f32 1.5, %v148_v41 }
 0x198   :  { %v222_v43 = vpop.eup %221 }
 0x199   :  { %v150_v44 = vmul.f32 %v220_v37, %v149_v42  ;;  %v156_v45 = vmul.f32 %v222_v43, %v144_v38  ;;  %vm162_vm5 = vweird.f32 %v222_v43 }
 0x19a   :  { %vm163_vm8 = vmor %vm161_vm7, %vm162_vm5 }
 0x19b   :  { %v154_v47 = vsel %vm153_vm4, %v220_v37, %v150_v44  ;;  %v157_v48 = vmul.f32 %v222_v43, %v156_v45 }
 0x19c   :  { %v165_v50 = vmul.f32 %v154_v47, %v131_v24 }
 0x19d   :  { %v158_v51 = vmul.f32 0.5, %v157_v48 }
 0x19e   :  { %v171_v52 = vmul.f32 %v215_v46, %v165_v50 }
 0x19f   :  { %v159_v53 = vsub.f32 1.5, %v158_v51 }
 0x1a0   :  { %v177_v54 = vadd.f32 %v216_v49, %v171_v52 }
 0x1a1   :  { %v160_v55 = vmul.f32 %v222_v43, %v159_v53 }
 0x1a2   :  { %v179_v56 = vpack.c.bf16 %v177_v54, %v177_v54 }
 0x1a3   :  { %v164_v57 = vsel %vm163_vm8, %v222_v43, %v160_v55 }
 0x1a4   :  { %182 = vst.msk [vmem:[%s376_s6] sm:$0xf] %vm181_vm6, %v179_v56  ;;  %v166_v58 = vmul.f32 %v164_v57, %v132_v29 }
 0x1a6   :  { %v172_v59 = vmul.f32 %v215_v46, %v166_v58 }
 0x1a8   :  { %v178_v60 = vadd.f32 %v216_v49, %v172_v59 }
 0x1aa   :  { %v180_v61 = vpack.c.bf16 %v178_v60, %v178_v60 }
 0x1ac   :  { %183 = vst.msk [vmem:[%s376_s6 + $0x4] sm:$0xf] %vm181_vm6, %v180_v61 }
 0x1ad   :  { %188 = vsyncpa [#allocation3], 1 }
 0x1ae   :  { %189 = vsyncpa [#allocation5], 1 }

// kernel: transformer_forward.38
= control target key start
LH: loop header
LB: loop body
LE: loop exit
PB: predicated region body
PF: predicated region fallthrough
CT: control target
= control target key end

     0   :  { %s1076_s12 = smov 0   ;;  %s1302_s0 = inlined_call_operand.vmem [shape: bf16[2,8,32], index: 0, kind: input, shape index: {}]   ;;  %s1303_s1 = inlined_call_operand.vmem [shape: bf16[2,8,64], index: 1, kind: input, shape index: {}]   ;;  %s1304_s2 = inlined_call_operand.vmem [shape: f32[2,1,8], index: 2, kind: input, shape index: {}]   ;;  %s1305_s3 = inlined_call_operand.vmem [shape: bf16[2,8,32], index: 3, kind: output, shape index: {}]  }
   0x1 LB: > { %s986_s13 = sadd.s32 4294967295, %s1044_s12   ;;  %p990_p0 = scmp.ge.s32.totalorder %s1044_s12, 1  ;;  %s1044_s12 = sphi %s1076_s12, %s13_s12  }
   0x2   : > { %p153_p1 = scmp.lt.s32.totalorder %s1044_s12, 3 }
   0x4   : > { %p154_p2 = pnand %p990_p0, %p153_p1 }
   0x5   : > { %p182_p3 = scmp.lt.s32.totalorder (!%p154_p2), %s986_s13, 1  ;;  %s1046_s21 = smov (!%p154_p2), 104  }
   0x6   : > { %157 = sbr.rel (%p154_p2) target bundleno = 844 (0x34c), region = 32  ;;  %s1047_s22 = smov (!%p154_p2), 120  }
   0x7   : > { %s1048_s23 = smov (!%p154_p2), 112   ;;  %s1049_s24 = smov (!%p154_p2), 96  }
   0x8   : > { %s1053_s28 = smov (!%p154_p2), 24   ;;  %s1054_s29 = smov (!%p154_p2), 16  }
   0x9   : > { %s1055_s30 = smov (!%p154_p2), 8  }
   0xb   : > { %s1307_s13 = smov (!%p182_p3, %s986_s13), 1  ;;  %v1050_v4 = vmov 1983009808   ;;  %v1051_v19 = vmov 1934713408   ;;  %vm231_vm0 = vcmask 1047556  }
   0xc   : > { %s1087_s14 = sshll.u32 %s1307_s13, 2  ;;  %v222_v5 = vunpack.c.l.s4 %v1050_v4  ;;  %v236_v20 = vunpack.c.l.s4 %v1051_v19  ;;  %vm566_vm1 = vcmask 64512   ;;  %s192_s27 = scalar_lea.vmem %s1304_s2, %s1307_s13  ;;  %vm707_vm3 = vcmask 1043456  }
   0xd   : > { %s189_s17 = scalar_lea.vmem %s1303_s1, %s1087_s14  ;;  %s185_s20 = scalar_lea.vmem %s1302_s0, %s1087_s14  ;;  %vm905_vm4 = vcmask 130048   ;;  %vm907_vm5 = vcmask 195584   ;;  %vm910_vm6 = vcmask 257024  }
   0xe   : > { %v199_v0 = vld [vmem:[%s189_s17] sm:$0xf]  ;;  %v1103_v13 = vunpack.c.0.s8 %v222_v5  ;;  %v1116_v33 = vunpack.c.0.s8 %v236_v20  ;;  %s196_s6 = scalar_lea.vmem %s1305_s3, %s1087_s14 }
   0xf   : > { %328 = vrot.lane.b32.xlu1 %v199_v0, %s1046_s21  ;;  %324 = vrot.lane.b32.xlu0 %v199_v0, %s1047_s22  ;;  %v198_v1 = vld [vmem:[%s185_s20] sm:$0xf]  ;;  %v333_v8 = vshrl.u32 %v199_v0, 16 }
  0x10   : > { %204 = vrot.lane.b32.xlu2 %v198_v1, %s1048_s23  ;;  %v211_v21 = vshrl.u32 %v198_v1, 16 }
  0x17   : > { %326 = vrot.lane.b32.xlu0 %v199_v0, %s1048_s23  ;;  %202 = vrot.lane.b32.xlu1 %v198_v1, %s1047_s22 }
  0x18   : > { %206 = vrot.lane.b32.xlu2 %v198_v1, %s1046_s21 }
  0x1f   : > { %444 = vrot.lane.b32.xlu0 %v199_v0, %s1049_s24 }
  0x6a   : > { %v205_v2 = vpop.permute.xlu2 %204 }
  0x6b   : > { %v217_v9 = vshrl.u32 %v205_v2, 16 }
  0x72   : > { %v207_v3 = vpop.permute.xlu2 %206 }
  0x73   : > { %v216_v10 = vpack.i.b16 %v207_v3, %v205_v2  ;;  %v218_v11 = vshrl.u32 %v207_v3, 16 }
  0x75   : > { %v219_v16 = vpack.i.b16 %v218_v11, %v217_v9  ;;  %v229_v17 = vperm.slane %v216_v10, %v1103_v13 }
  0x77   : > { %v230_v25 = vrot.slane %v229_v17, 4  ;;  %v256_v26 = vperm.slane %v219_v16, %v1103_v13 }
  0x79   : > { %v257_v39 = vrot.slane %v256_v26, 4 }
  0x81   : > { %v1098_v6 = vpop.permute.xlu1 %328  ;;  %v1100_v7 = vpop.permute.xlu0 %324 }
  0x82   : > { %v334_v12 = vshrl.u32 %v1100_v7, 16  ;;  %v332_v14 = vpack.i.b16 %v1100_v7, %v199_v0  ;;  %v340_v22 = vshrl.u32 %v1098_v6, 16 }
  0x84   : > { %v335_v15 = vpack.i.b16 %v334_v12, %v333_v8  ;;  %v346_v18 = vperm.slane %v332_v14, %v1103_v13 }
  0x86   : > { %v372_v23 = vperm.slane %v335_v15, %v1103_v13  ;;  %v354_v32 = vrot.slane %v346_v18, 4 }
  0x88   : > { %v380_v38 = vrot.slane %v372_v23, 4 }
  0x89   : > { %v1110_v24 = vpop.permute.xlu0 %326  ;;  %v203_v27 = vpop.permute.xlu1 %202 }
  0x8a   : > { %v338_v28 = vpack.i.b16 %v1098_v6, %v1110_v24  ;;  %v339_v29 = vshrl.u32 %v1110_v24, 16  ;;  %v210_v30 = vpack.i.b16 %v203_v27, %v198_v1  ;;  %v212_v31 = vshrl.u32 %v203_v27, 16 }
  0x8c   : > { %v341_v34 = vpack.i.b16 %v340_v22, %v339_v29  ;;  %v351_v35 = vperm.slane %v338_v28, %v1103_v13  ;;  %v213_v36 = vpack.i.b16 %v212_v31, %v211_v21  ;;  %v224_v37 = vperm.slane %v210_v30, %v1103_v13 }
  0x8e   : > { %v352_v40 = vrot.slane %v351_v35, 4  ;;  %v355_v41 = vsel %vm231_vm0, %v351_v35, %v354_v32  ;;  %v377_v42 = vperm.slane %v341_v34, %v1103_v13  ;;  %v232_v43 = vsel %vm231_vm0, %v230_v25, %v224_v37 }
  0x8f   : > { %v363_v44 = vperm.slane %v355_v41, %v1116_v33  ;;  %v233_v45 = vrot.slane %v224_v37, 4  ;;  %v238_v46 = vperm.slane %v232_v43, %v1116_v33  ;;  %v251_v50 = vperm.slane %v213_v36, %v1103_v13 }
  0x90   : > { %v353_v47 = vsel %vm231_vm0, %v352_v40, %v346_v18  ;;  %v378_v48 = vrot.slane %v377_v42, 4  ;;  %v381_v49 = vsel %vm231_vm0, %v377_v42, %v380_v38 }
  0x91   : > { %v359_v51 = vperm.slane %v353_v47, %v1116_v33  ;;  %v366_v52 = vrot.slane %v363_v44, 4  ;;  %v389_v53 = vperm.slane %v381_v49, %v1116_v33  ;;  %v234_v54 = vsel %vm231_vm0, %v229_v17, %v233_v45 }
  0x92   : > { %v379_v55 = vsel %vm231_vm0, %v378_v48, %v372_v23  ;;  %v242_v56 = vperm.slane %v234_v54, %v1116_v33  ;;  %v258_v57 = vsel %vm231_vm0, %v257_v39, %v251_v50  ;;  %v243_v63 = vrot.slane %v238_v46, 4 }
  0x93   : > { %v364_v58 = vrot.slane %v359_v51, 4  ;;  %v367_v59 = vsel %vm231_vm0, 0, %v366_v52  ;;  %v385_v60 = vperm.slane %v379_v55, %v1116_v33  ;;  %v392_v61 = vrot.slane %v389_v53, 4 }
  0x94   : > { %v399_v62 = vrot.slane %v367_v59, 4  ;;  %v245_v0 = vrot.slane %v242_v56, 4  ;;  %v259_v1 = vrot.slane %v251_v50, 4  ;;  %v264_v4 = vperm.slane %v258_v57, %v1116_v33 }
  0x95   : > { %v390_v2 = vrot.slane %v385_v60, 4  ;;  %v393_v3 = vsel %vm231_vm0, 0, %v392_v61  ;;  %v365_v5 = vsel %vm231_vm0, 0, %v364_v58  ;;  %v244_v15 = vsel %vm231_vm0, 0, %v243_v63 }
  0x96   : > { %v418_v8 = vrot.slane %v393_v3, 4  ;;  %v246_v9 = vsel %vm231_vm0, 0, %v245_v0  ;;  %v260_v10 = vsel %vm231_vm0, %v256_v26, %v259_v1  ;;  %v394_v16 = vsel %vm231_vm0, %v366_v52, %v359_v51 }
  0x97   : > { %v268_v11 = vperm.slane %v260_v10, %v1116_v33  ;;  %v278_v12 = vrot.slane %v246_v9, 4  ;;  %v391_v14 = vsel %vm231_vm0, 0, %v390_v2  ;;  %v400_v17 = vsel %vm231_vm0, %v399_v62, %v365_v5 }
  0x98   : > { %v419_v18 = vsel %vm231_vm0, %v418_v8, %v391_v14  ;;  %v269_v19 = vrot.slane %v264_v4, 4  ;;  %v404_v21 = vperm.slane %v400_v17, %v1103_v13  ;;  %v413_v22 = vsel %vm231_vm0, %v392_v61, %v385_v60 }
  0x99   : > { %v271_v20 = vrot.slane %v268_v11, 4  ;;  %v273_v23 = vsel %vm231_vm0, %v245_v0, %v238_v46  ;;  %v423_v25 = vperm.slane %v419_v18, %v1103_v13  ;;  %v279_v26 = vsel %vm231_vm0, %v278_v12, %v244_v15  ;;  %v200_v18 = vld [vmem:[%s192_s27] sm:$0x1] }
  0x9a   : > { %v398_v28 = vperm.slane %v394_v16, %v1103_v13  ;;  %v405_v29 = vrot.slane %v404_v21, 4  ;;  %v283_v30 = vperm.slane %v279_v26, %v1103_v13  ;;  %v417_v32 = vperm.slane %v413_v22, %v1103_v13 }
  0x9b   : > { %v272_v27 = vsel %vm231_vm0, 0, %v271_v20  ;;  %v424_v34 = vrot.slane %v423_v25, 4  ;;  %v270_v35 = vsel %vm231_vm0, 0, %v269_v19  ;;  %v277_v37 = vperm.slane %v273_v23, %v1103_v13 }
  0x9c   : > { %v297_v31 = vrot.slane %v272_v27, 4  ;;  %v406_v36 = vsel %vm231_vm0, %v405_v29, %v398_v28  ;;  %v284_v38 = vrot.slane %v283_v30, 4  ;;  %v292_v44 = vsel %vm231_vm0, %v271_v20, %v264_v4 }
  0x9d   : > { %v410_v39 = vperm.slane %v406_v36, %v1116_v33  ;;  %v425_v40 = vsel %vm231_vm0, %v424_v34, %v417_v32  ;;  %v296_v54 = vperm.slane %v292_v44, %v1103_v13  ;;  %vm647_vm2 = vcmp.gt.f32.partialorder %v200_v18, 0.0 }
  0x9e   : > { %v298_v41 = vsel %vm231_vm0, %v297_v31, %v270_v35  ;;  %v429_v42 = vperm.slane %v425_v40, %v1116_v33  ;;  %v285_v43 = vsel %vm231_vm0, %v284_v38, %v277_v37  ;;  %v1052_v19 = vmov -1e+09  }
  0x9f   : > { %v302_v45 = vperm.slane %v298_v41, %v1103_v13  ;;  %v435_v46 = vshrl.u32 %v410_v39, 16  ;;  %v411_v47 = vrot.slane %v410_v39, 4  ;;  %v289_v48 = vperm.slane %v285_v43, %v1116_v33 }
  0xa0   : > { %v434_v49 = vpack.i.b16 %v429_v42, %v410_v39  ;;  %v436_v50 = vshrl.u32 %v429_v42, 16  ;;  %v430_v51 = vrot.slane %v429_v42, 4  ;;  %v648_v20 = vsel %vm647_vm2, 0.0, %v1052_v19 }
  0xa1   : > { %v303_v52 = vrot.slane %v302_v45, 4  ;;  %v412_v53 = vsel %vm231_vm0, 0, %v411_v47  ;;  %v290_v0 = vrot.slane %v289_v48, 4  ;;  %v314_v9 = vshrl.u32 %v289_v48, 16  ;;  %v445_v45 = vpop.permute.xlu0 %444 }
  0xa2   : > { %v571_v55 = vsel %vm566_vm1, %v434_v49, 0  ;;  %v437_v56 = vpack.i.b16 %v436_v50, %v435_v46  ;;  %v431_v57 = vsel %vm231_vm0, 0, %v430_v51  ;;  %v441_v59 = vshrl.u32 %v412_v53, 16 }
  0xa3   : > { %580 = vmatpush.bf16.xpose.msra.mxu0 %v571_v55  ;;  %v440_v58 = vpack.i.b16 %v431_v57, %v412_v53  ;;  %v442_v60 = vshrl.u32 %v431_v57, 16  ;;  %v304_v61 = vsel %vm231_vm0, %v303_v52, %v296_v54  ;;  %v291_v10 = vsel %vm231_vm0, 0, %v290_v0 }
  0xa4   : > { %v590_v62 = vsel %vm566_vm1, %v437_v56, 0  ;;  %v308_v63 = vperm.slane %v304_v61, %v1116_v33  ;;  %v320_v16 = vshrl.u32 %v291_v10, 16  ;;  %v650_v21 = vperm.slane %v648_v20, 0 }
  0xa5   : > { %599 = vmatpush.bf16.xpose.msra.mxu1 %v590_v62  ;;  %v609_v1 = vsel %vm566_vm1, %v440_v58, 0  ;;  %v443_v2 = vpack.i.b16 %v442_v60, %v441_v59 }
  0xa6   : > { %618 = vmatpush.bf16.xpose.msra.mxu2 %v609_v1  ;;  %v315_v3 = vshrl.u32 %v308_v63, 16  ;;  %v309_v4 = vrot.slane %v308_v63, 4  ;;  %v313_v8 = vpack.i.b16 %v308_v63, %v289_v48 }
  0xa7   : > { %v628_v5 = vsel %vm566_vm1, %v443_v2, 0 }
  0xa8   : > { %637 = vmatpush.bf16.xpose.msra.mxu3 %v628_v5  ;;  %v310_v11 = vsel %vm231_vm0, 0, %v309_v4  ;;  %v316_v14 = vpack.i.b16 %v315_v3, %v314_v9 }
  0xa9   : > { %v321_v12 = vshrl.u32 %v310_v11, 16  ;;  %v319_v15 = vpack.i.b16 %v310_v11, %v291_v10 }
  0xaa   : > { %994 = vmatmul.msk.bf16.vlgmr.msra.gmra.mxu0 %vm566_vm1, %v313_v8  ;;  %v455_v8 = vshrl.u32 %v445_v45, 16 }
  0xab   : > { %v322_v17 = vpack.i.b16 %v321_v12, %v320_v16 }
  0xac   : > { %995 = vmatmul.msk.bf16.vlgmr.msra.gmra.mxu1 %vm566_vm1, %v316_v14 }
  0xad   : > { %996 = vmatmul.msk.bf16.vlgmr.msra.gmra.mxu2 %vm566_vm1, %v319_v15 }
  0xaf   : > { %997 = vmatmul.msk.bf16.vlgmr.msra.gmra.mxu3 %vm566_vm1, %v322_v17 }
 0x127   : > { %v582_v22 = vpop.f32.mrf.mxu0 }
 0x128   : > { %v643_v23 = vmul.f32 0.35355338, %v582_v22 }
 0x129   : > { %v601_v25 = vpop.f32.mrf.mxu1 }
 0x12a   : > { %v652_v26 = vadd.f32 %v650_v21, %v643_v23  ;;  %v644_v27 = vmul.f32 0.35355338, %v601_v25 }
 0x12c   : > { %v656_v28 = vsel %vm566_vm1, %v652_v26, -inf  ;;  %v653_v31 = vadd.f32 %v650_v21, %v644_v27 }
 0x12d   : > { %657 = vmax.xlane.f32.xlu2 %v656_v28 }
 0x12e   : > { %v659_v38 = vsel %vm566_vm1, %v653_v31, -inf }
 0x12f   : > { %v584_v29 = vpop.f32.mrf.mxu0 }
 0x130   : > { %v620_v30 = vpop.f32.mrf.mxu2 }
 0x131   : > { %v645_v32 = vmul.f32 0.35355338, %v620_v30  ;;  %v603_v34 = vpop.f32.mrf.mxu1 }
 0x132   : > { %v639_v35 = vpop.f32.mrf.mxu3 }
 0x133   : > { %v646_v36 = vmul.f32 0.35355338, %v639_v35  ;;  %v654_v37 = vadd.f32 %v650_v21, %v645_v32 }
 0x135   : > { %660 = vmax.xlane.f32.xlu2 %v659_v38  ;;  %v662_v39 = vsel %vm566_vm1, %v654_v37, -inf  ;;  %v655_v40 = vadd.f32 %v650_v21, %v646_v36 }
 0x136   : > { %663 = vmax.xlane.f32.xlu0 %v662_v39 }
 0x137   : > { %v665_v41 = vsel %vm566_vm1, %v655_v40, -inf }
 0x138   : > { %666 = vmax.xlane.f32.xlu1 %v665_v41  ;;  %v622_v42 = vpop.f32.mrf.mxu2 }
 0x13a   : > { %v641_v43 = vpop.f32.mrf.mxu3 }
 0x14a   : > { %450 = vrot.lane.b32.xlu0 %v1098_v6, %s1049_s24 }
 0x14d   : > { %448 = vrot.lane.b32.xlu2 %v1110_v24, %s1049_s24 }
 0x151   : > { %446 = vrot.lane.b32.xlu1 %v1100_v7, %s1049_s24 }
 0x1a0   : > { %v658_v44 = vpop.xlane.xlu2 %657 }
 0x1a1   : > { %v668_v46 = vsub.f32 %v652_v26, %v658_v44 }
 0x1a3   : > { %v672_v47 = vmul.f32 1.442695, %v668_v46 }
 0x1a5   : > { %1022 = vpow2.f32 %v672_v47 }
 0x1a8   : > { %v661_v48 = vpop.xlane.xlu2 %660 }
 0x1a9   : > { %v664_v49 = vpop.xlane.xlu0 %663  ;;  %v669_v53 = vsub.f32 %v653_v31, %v661_v48 }
 0x1aa   : > { %v670_v50 = vsub.f32 %v654_v37, %v664_v49 }
 0x1ab   : > { %v1196_v51 = vpop.eup %1022  ;;  %v667_v52 = vpop.xlane.xlu1 %666  ;;  %v674_v55 = vmul.f32 1.442695, %v669_v53 }
 0x1ac   : > { %v676_v54 = vmul.f32 1.442695, %v670_v50  ;;  %v671_v6 = vsub.f32 %v655_v40, %v667_v52  ;;  %v680_v24 = vsel %vm566_vm1, %v1196_v51, 0.0 }
 0x1ad   : > { %681 = vadd.xlane.f32.xlu2 %v680_v24 }
 0x1ae   : > { %1024 = vpow2.f32 %v676_v54  ;;  %v678_v7 = vmul.f32 1.442695, %v671_v6 }
 0x1b0   : > { %1026 = vpow2.f32 %v678_v7  ;;  %v449_v61 = vpop.permute.xlu2 %448 }
 0x1b1   : > { %1028 = vpow2.f32 %v674_v55  ;;  %v461_v1 = vshrl.u32 %v449_v61, 16 }
 0x1b4   : > { %v1200_v56 = vpop.eup %1024 }
 0x1b5   : > { %v686_v57 = vsel %vm566_vm1, %v1200_v56, 0.0 }
 0x1b6   : > { %v1204_v58 = vpop.eup %1026  ;;  %687 = vadd.xlane.f32.xlu1 %v686_v57 }
 0x1b7   : > { %v689_v59 = vsel %vm566_vm1, %v1204_v58, 0.0  ;;  %v1208_v60 = vpop.eup %1028 }
 0x1b8   : > { %690 = vadd.xlane.f32.xlu0 %v689_v59  ;;  %v683_v0 = vsel %vm566_vm1, %v1208_v60, 0.0 }
 0x1bc   : > { %v451_v62 = vpop.permute.xlu0 %450 }
 0x1bd   : > { %v462_v63 = vshrl.u32 %v451_v62, 16  ;;  %v460_v2 = vpack.i.b16 %v451_v62, %v449_v61 }
 0x1be   : > { %684 = vadd.xlane.f32.xlu1 %v683_v0 }
 0x1bf   : > { %v463_v3 = vpack.i.b16 %v462_v63, %v461_v1  ;;  %v473_v4 = vperm.slane %v460_v2, %v1103_v13 }
 0x1c1   : > { %v499_v9 = vperm.slane %v463_v3, %v1103_v13  ;;  %v474_v12 = vrot.slane %v473_v4, 4 }
 0x1c3   : > { %v447_v5 = vpop.permute.xlu1 %446  ;;  %v500_v16 = vrot.slane %v499_v9, 4 }
 0x1c4   : > { %v454_v10 = vpack.i.b16 %v447_v5, %v445_v45  ;;  %v456_v11 = vshrl.u32 %v447_v5, 16 }
 0x1c6   : > { %v457_v14 = vpack.i.b16 %v456_v11, %v455_v8  ;;  %v468_v15 = vperm.slane %v454_v10, %v1103_v13 }
 0x1c8   : > { %v475_v17 = vsel %vm231_vm0, %v474_v12, %v468_v15  ;;  %v476_v18 = vrot.slane %v468_v15, 4  ;;  %v494_v19 = vperm.slane %v457_v14, %v1103_v13 }
 0x1c9   : > { %v481_v20 = vperm.slane %v475_v17, %v1116_v33 }
 0x1ca   : > { %v477_v21 = vsel %vm231_vm0, %v473_v4, %v476_v18  ;;  %v501_v22 = vsel %vm231_vm0, %v500_v16, %v494_v19  ;;  %v502_v23 = vrot.slane %v494_v19, 4 }
 0x1cb   : > { %v485_v25 = vperm.slane %v477_v21, %v1116_v33  ;;  %v507_v26 = vperm.slane %v501_v22, %v1116_v33  ;;  %v486_v28 = vrot.slane %v481_v20, 4 }
 0x1cc   : > { %v503_v27 = vsel %vm231_vm0, %v499_v9, %v502_v23 }
 0x1cd   : > { %v488_v29 = vrot.slane %v485_v25, 4  ;;  %v511_v30 = vperm.slane %v503_v27, %v1116_v33  ;;  %v512_v32 = vrot.slane %v507_v26, 4  ;;  %v487_v36 = vsel %vm231_vm0, 0, %v486_v28 }
 0x1cf   : > { %v489_v31 = vsel %vm231_vm0, 0, %v488_v29  ;;  %v514_v34 = vrot.slane %v511_v30, 4  ;;  %v516_v39 = vsel %vm231_vm0, %v488_v29, %v481_v20  ;;  %v513_v41 = vsel %vm231_vm0, 0, %v512_v32 }
 0x1d0   : > { %v521_v35 = vrot.slane %v489_v31, 4  ;;  %v520_v45 = vperm.slane %v516_v39, %v1103_v13 }
 0x1d1   : > { %v515_v37 = vsel %vm231_vm0, 0, %v514_v34  ;;  %v535_v43 = vsel %vm231_vm0, %v514_v34, %v507_v26 }
 0x1d2   : > { %v540_v38 = vrot.slane %v515_v37, 4  ;;  %v522_v40 = vsel %vm231_vm0, %v521_v35, %v487_v36  ;;  %v539_v49 = vperm.slane %v535_v43, %v1103_v13 }
 0x1d3   : > { %v526_v42 = vperm.slane %v522_v40, %v1103_v13 }
 0x1d4   : > { %v541_v44 = vsel %vm231_vm0, %v540_v38, %v513_v41 }
 0x1d5   : > { %v527_v46 = vrot.slane %v526_v42, 4  ;;  %v545_v47 = vperm.slane %v541_v44, %v1103_v13 }
 0x1d7   : > { %v528_v48 = vsel %vm231_vm0, %v527_v46, %v520_v45  ;;  %v546_v50 = vrot.slane %v545_v47, 4 }
 0x1d8   : > { %v532_v52 = vperm.slane %v528_v48, %v1116_v33 }
 0x1d9   : > { %v547_v53 = vsel %vm231_vm0, %v546_v50, %v539_v49 }
 0x1da   : > { %v551_v54 = vperm.slane %v547_v53, %v1116_v33  ;;  %v533_v6 = vrot.slane %v532_v52, 4  ;;  %v557_v24 = vshrl.u32 %v532_v52, 16 }
 0x1dc   : > { %v556_v7 = vpack.i.b16 %v551_v54, %v532_v52  ;;  %v558_v55 = vshrl.u32 %v551_v54, 16  ;;  %v534_v57 = vsel %vm231_vm0, 0, %v533_v6  ;;  %v552_v59 = vrot.slane %v551_v54, 4 }
 0x1dd   : > { %v563_v1 = vshrl.u32 %v534_v57, 16 }
 0x1de   : > { %v709_v61 = vsel %vm707_vm3, %v556_v7, 0  ;;  %v559_v62 = vpack.i.b16 %v558_v55, %v557_v24  ;;  %v553_v63 = vsel %vm231_vm0, 0, %v552_v59 }
 0x1df   : > { %718 = vmatpush.bf16.msrb.mxu0 %v709_v61  ;;  %v562_v0 = vpack.i.b16 %v553_v63, %v534_v57  ;;  %v564_v2 = vshrl.u32 %v553_v63, 16 }
 0x1e0   : > { %v728_v3 = vsel %vm707_vm3, %v559_v62, 0 }
 0x1e1   : > { %737 = vmatpush.bf16.msrb.mxu1 %v728_v3  ;;  %v747_v4 = vsel %vm707_vm3, %v562_v0, 0  ;;  %v565_v5 = vpack.i.b16 %v564_v2, %v563_v1 }
 0x1e2   : > { %756 = vmatpush.bf16.msrb.mxu2 %v747_v4 }
 0x1e3   : > { %v766_v8 = vsel %vm707_vm3, %v565_v5, 0 }
 0x1e4   : > { %775 = vmatpush.bf16.msrb.mxu3 %v766_v8 }
 0x220   : > { %v682_v9 = vpop.xlane.xlu2 %681 }
 0x221   : > { %1030 = vrcp.f32 %v682_v9 }
 0x227   : > { %v1031_v10 = vpop.eup %1030 }
 0x228   : > { %v696_v11 = vmul.f32 %v1031_v10, %v1196_v51 }
 0x229   : > { %v688_v12 = vpop.xlane.xlu1 %687 }
 0x22a   : > { %1032 = vrcp.f32 %v688_v12  ;;  %v700_v14 = vpack.c.bf16 %v696_v11, %v696_v11 }
 0x22b   : > { %v691_v15 = vpop.xlane.xlu0 %690 }
 0x22c   : > { %1034 = vrcp.f32 %v691_v15  ;;  %998 = vmatmul.msk.bf16.vlgmr.msrb.gmra.mxu0 %vm566_vm1, %v700_v14 }
 0x230   : > { %v1033_v16 = vpop.eup %1032 }
 0x231   : > { %v698_v17 = vmul.f32 %v1033_v16, %v1200_v56  ;;  %v685_v18 = vpop.xlane.xlu1 %684 }
 0x232   : > { %v1035_v19 = vpop.eup %1034  ;;  %1036 = vrcp.f32 %v685_v18 }
 0x233   : > { %v699_v20 = vmul.f32 %v1035_v19, %v1204_v58  ;;  %v702_v21 = vpack.c.bf16 %v698_v17, %v698_v17 }
 0x235   : > { %1000 = vmatmul.msk.bf16.vlgmr.msrb.gmra.mxu2 %vm566_vm1, %v702_v21  ;;  %v703_v22 = vpack.c.bf16 %v699_v20, %v699_v20 }
 0x237   : > { %1001 = vmatmul.msk.bf16.vlgmr.msrb.gmra.mxu3 %vm566_vm1, %v703_v22 }
 0x238   : > { %v1037_v51 = vpop.eup %1036 }
 0x239   : > { %v697_v23 = vmul.f32 %v1037_v51, %v1208_v60 }
 0x23b   : > { %v701_v25 = vpack.c.bf16 %v697_v23, %v697_v23 }
 0x23d   : > { %999 = vmatmul.msk.bf16.vlgmr.msrb.gmra.mxu1 %vm566_vm1, %v701_v25 }
 0x2a9   : > { %v720_v26 = vpop.f32.mrf.mxu0 }
 0x2aa   : > { %v784_v56 = vrot.slane %v720_v26, 4 }
 0x2b1   : > { %v722_v27 = vpop.f32.mrf.mxu0 }
 0x2b8   : > { %v758_v28 = vpop.f32.mrf.mxu2 }
 0x2b9   : > { %v781_v29 = vrot.slane %v758_v28, 4  ;;  %v785_v30 = vsel %vm231_vm0, %v758_v28, %v784_v56 }
 0x2ba   : > { %v793_v58 = vperm.slane %v785_v30, %v1103_v13  ;;  %v739_v31 = vpop.f32.mrf.mxu1  ;;  %v777_v32 = vpop.f32.mrf.mxu3 }
 0x2bb   : > { %v783_v34 = vsel %vm231_vm0, %v781_v29, %v720_v26  ;;  %v796_v35 = vrot.slane %v739_v31, 4  ;;  %v794_v36 = vrot.slane %v777_v32, 4 }
 0x2bc   : > { %v789_v60 = vperm.slane %v783_v34, %v1103_v13  ;;  %v820_v40 = vrot.slane %v793_v58, 4 }
 0x2bd   : > { %v795_v37 = vsel %vm231_vm0, %v794_v36, %v739_v31  ;;  %v797_v38 = vsel %vm231_vm0, %v777_v32, %v796_v35 }
 0x2be   : > { %v808_v39 = vrot.slane %v789_v60, 4  ;;  %v801_v41 = vperm.slane %v795_v37, %v1103_v13  ;;  %v805_v42 = vperm.slane %v797_v38, %v1103_v13 }
 0x2c0   : > { %v806_v43 = vrot.slane %v801_v41, 4  ;;  %v809_v44 = vsel %vm231_vm0, %v801_v41, %v808_v39  ;;  %v818_v45 = vrot.slane %v805_v42, 4  ;;  %v821_v46 = vsel %vm231_vm0, %v805_v42, %v820_v40  ;;  %v760_v47 = vpop.f32.mrf.mxu2 }
 0x2c1   : > { %v817_v48 = vperm.slane %v809_v44, %v1116_v33  ;;  %v829_v49 = vperm.slane %v821_v46, %v1116_v33 }
 0x2c2   : > { %v807_v50 = vsel %vm231_vm0, %v806_v43, %v789_v60  ;;  %v819_v52 = vsel %vm231_vm0, %v818_v45, %v793_v58  ;;  %v741_v53 = vpop.f32.mrf.mxu1  ;;  %v779_v54 = vpop.f32.mrf.mxu3 }
 0x2c3   : > { %v813_v6 = vperm.slane %v807_v50, %v1116_v33  ;;  %v825_v24 = vperm.slane %v819_v52, %v1116_v33  ;;  %v832_v7 = vrot.slane %v817_v48, 4  ;;  %v836_v55 = vrot.slane %v829_v49, 4 }
 0x2c5   : > { %v830_v57 = vrot.slane %v813_v6, 4  ;;  %v833_v59 = vsel %vm231_vm0, 0.0, %v832_v7  ;;  %v834_v61 = vrot.slane %v825_v24, 4  ;;  %v837_v62 = vsel %vm231_vm0, 0.0, %v836_v55 }
 0x2c6   : > { %v843_v63 = vrot.slane %v833_v59, 4  ;;  %v849_v0 = vsel %vm231_vm0, %v836_v55, %v825_v24  ;;  %v854_v1 = vrot.slane %v837_v62, 4  ;;  %v838_v2 = vsel %vm231_vm0, %v832_v7, %v813_v6 }
 0x2c7   : > { %v835_v3 = vsel %vm231_vm0, 0.0, %v834_v61  ;;  %v831_v4 = vsel %vm231_vm0, 0.0, %v830_v57  ;;  %v842_v5 = vperm.slane %v838_v2, %v1103_v13  ;;  %v853_v8 = vperm.slane %v849_v0, %v1103_v13 }
 0x2c8   : > { %v844_v9 = vsel %vm231_vm0, %v843_v63, %v831_v4  ;;  %v855_v10 = vsel %vm231_vm0, %v854_v1, %v835_v3 }
 0x2c9   : > { %v848_v11 = vperm.slane %v844_v9, %v1103_v13  ;;  %v859_v12 = vperm.slane %v855_v10, %v1103_v13  ;;  %v862_v14 = vrot.slane %v842_v5, 4  ;;  %v874_v15 = vrot.slane %v853_v8, 4 }
 0x2cb   : > { %v863_v16 = vsel %vm231_vm0, %v848_v11, %v862_v14  ;;  %v875_v17 = vsel %vm231_vm0, %v859_v12, %v874_v15  ;;  %v860_v18 = vrot.slane %v848_v11, 4  ;;  %v872_v19 = vrot.slane %v859_v12, 4 }
 0x2cc   : > { %v871_v20 = vperm.slane %v863_v16, %v1116_v33  ;;  %v883_v21 = vperm.slane %v875_v17, %v1116_v33 }
 0x2cd   : > { %v861_v22 = vsel %vm231_vm0, %v860_v18, %v842_v5  ;;  %v873_v51 = vsel %vm231_vm0, %v872_v19, %v853_v8 }
 0x2ce   : > { %v890_v23 = vrot.slane %v871_v20, 4  ;;  %v888_v25 = vrot.slane %v883_v21, 4  ;;  %v867_v13 = vperm.slane %v861_v22, %v1116_v33  ;;  %v879_v26 = vperm.slane %v873_v51, %v1116_v33 }
 0x2d0   : > { %v891_v27 = vsel %vm231_vm0, %v883_v21, %v890_v23  ;;  %v889_v56 = vsel %vm231_vm0, %v888_v25, %v871_v20  ;;  %v884_v28 = vrot.slane %v879_v26, 4  ;;  %v886_v29 = vrot.slane %v867_v13, 4 }
 0x2d1   : > { %901 = vrot.lane.b32.xlu1 %v891_v27, %s1053_s28  ;;  %897 = vrot.lane.b32.xlu2 %v889_v56, %s1054_s29 }
 0x2d2   : > { %v887_v30 = vsel %vm231_vm0, %v879_v26, %v886_v29  ;;  %v885_v58 = vsel %vm231_vm0, %v884_v28, %v867_v13 }
 0x2d3   : > { %893 = vrot.lane.b32.xlu0 %v887_v30, %s1055_s30 }
 0x32b   : > { %v898_v31 = vpop.permute.xlu2 %897 }
 0x343   : > { %v902_v34 = vpop.permute.xlu1 %901 }
 0x345   : > { %v894_v33 = vpop.permute.xlu0 %893 }
 0x346   : > { %v904_v32 = vsel %vm566_vm1, %v885_v58, %v894_v33 }
 0x347   : > { %v906_v35 = vsel %vm905_vm4, %v904_v32, %v898_v31 }
 0x348   : > { %v908_v36 = vsel %vm907_vm5, %v906_v35, %v902_v34 }
 0x349   : > { %v909_v60 = vpack.c.bf16 %v908_v36, %v908_v36 }
 0x34b   : > { %911 = vst.msk [vmem:[%s196_s6] sm:$0xf] %vm910_vm6, %v909_v60 }
 0x34c PF: > { %s13_s12 = sadd.s32 1, %s1044_s12  }
 0x34d   : > { %p10_p4 = scmp.ge.s32.totalorder %s13_s12, 4  }
 0x34f   :  { %12 = sbr.rel (!%p10_p4) target bundleno = 1 (0x1), region = 68 }

// kernel: transformer_forward.41
= control target key start
LH: loop header
LB: loop body
LE: loop exit
PB: predicated region body
PF: predicated region fallthrough
CT: control target
= control target key end

     0   :  { %8 = vsyncpa [#allocation3], 0  ;;  %s128_s15 = smov [#allocation2]   ;;  %s167_s0 = inlined_call_operand.vmem [shape: bf16[16,32], index: 0, kind: input, shape index: {}]   ;;  %s168_s1 = inlined_call_operand.vmem [shape: bf16[32,96], index: 1, kind: input, shape index: {}]   ;;  %s169_s2 = inlined_call_operand.hbm [shape: f32[1,96], index: 2, kind: input, shape index: {}]   ;;  %s170_s3 = inlined_call_operand.vmem [shape: bf16[16,96], index: 3, kind: output, shape index: {}]  }
   0x1   :  { %s18_s14 = sshll.u32 %s169_s2, 4  ;;  %s20_s16 = sshll.u32 %s128_s15, 4  ;;  %s19_s14 = int_to_ptr.hbm [resolvable:$true] %s18_s14  ;;  %s21_s16 = int_to_ptr.vmem [resolvable:$true] %s20_s16 }
   0x2   :  { %23 = dma.hbm_to_vmem [thread:$0]  %s19_s14, 16, %s21_s16, [#allocation3]  }
   0x3   :  { %126 = dma.done.wait [#allocation3], 16  }
   0x4   :  { %127 = vsyncadd [#allocation3], 4294967280  ;;  %v99_v0 = vld [vmem:[%s168_s1 + $0x8] sm:$0xff]  ;;  %v98_v1 = vld [vmem:[%s168_s1] sm:$0xff]  ;;  %vm56_vm0 = vcmask 261120   ;;  %vm76_vm1 = vcmask 781312  }
   0x5   :  { %66 = vmatpush.bf16.msra.mxu0 %v99_v0  ;;  %v97_v2 = vld [vmem:[%s167_s0] sm:$0xff] }
   0x6   :  { %v101_v3 = vld [vmem:[#allocation2] ss:$0 sm:$0xff] }
   0x9   :  { %67 = vmatpush.bf16.msra.mxu0 %v98_v1 }
   0xc   :  { %96 = vmatmul.msk.bf16.vlgmr.msra.gmra.mxu0 %vm56_vm0, %v97_v2 }
  0x89   :  { %v69_v4 = vpop.f32.mrf.mxu0 }
  0x8a   :  { %v70_v5 = vadd.f32 %v101_v3, %v69_v4 }
  0x8c   :  { %v74_v6 = vpack.c.bf16 %v70_v5, %v70_v5 }
  0x8e   :  { %77 = vst.msk [vmem:[%s170_s3] sm:$0xf] %vm76_vm1, %v74_v6 }
  0x91   :  { %v71_v7 = vpop.f32.mrf.mxu0 }
  0x92   :  { %v72_v8 = vadd.f32 %v101_v3, %v71_v7 }
  0x94   :  { %v75_v9 = vpack.c.bf16 %v72_v8, %v72_v8 }
  0x96   :  { %78 = vst.msk [vmem:[%s170_s3 + $0x4] sm:$0xf] %vm76_vm1, %v75_v9 }
  0x97   :  { %83 = vsyncpa [#allocation3], 1 }

// kernel: transformer_forward.44
= control target key start
LH: loop header
LB: loop body
LE: loop exit
PB: predicated region body
PF: predicated region fallthrough
CT: control target
= control target key end

     0   :  { %vm42_vm0 = vcmask 261120   ;;  %vm62_vm1 = vcmask 257024   ;;  %s124_s1 = inlined_call_operand.vmem [shape: bf16[32,32], index: 1, kind: input, shape index: {}]   ;;  %s125_s2 = inlined_call_operand.vmem [shape: f32[1,32], index: 2, kind: input, shape index: {}]   ;;  %s126_s0 = inlined_call_operand.vmem [shape: bf16[16,32], index: 0, kind: input, shape index: {}]   ;;  %s127_s3 = inlined_call_operand.vmem [shape: bf16[16,32], index: 3, kind: output, shape index: {}]  }
   0x1   :  { %v84_v0 = vld [vmem:[%s124_s1 + $0x8] sm:$0xff]  ;;  %v83_v1 = vld [vmem:[%s124_s1] sm:$0xff] }
   0x2   :  { %52 = vmatpush.bf16.msra.mxu0 %v84_v0  ;;  %v82_v2 = vld [vmem:[%s126_s0] sm:$0xff] }
   0x3   :  { %v85_v3 = vld [vmem:[%s125_s2] ss:$0 sm:$0xff] }
   0x6   :  { %53 = vmatpush.bf16.msra.mxu0 %v83_v1 }
   0x9   :  { %81 = vmatmul.msk.bf16.vlgmr.msra.gmra.mxu0 %vm42_vm0, %v82_v2 }
  0x86   :  { %v55_v4 = vpop.f32.mrf.mxu0 }
  0x87   :  { %v56_v5 = vadd.f32 %v85_v3, %v55_v4 }
  0x89   :  { %v60_v6 = vpack.c.bf16 %v56_v5, %v56_v5 }
  0x8b   :  { %63 = vst.msk [vmem:[%s127_s3] sm:$0xf] %vm62_vm1, %v60_v6 }
  0x8e   :  { %v57_v7 = vpop.f32.mrf.mxu0 }
  0x8f   :  { %v58_v8 = vadd.f32 %v85_v3, %v57_v7 }
  0x91   :  { %v61_v9 = vpack.c.bf16 %v58_v8, %v58_v8 }
  0x93   :  { %64 = vst.msk [vmem:[%s127_s3 + $0x4] sm:$0xf] %vm62_vm1, %v61_v9 }

// kernel: transformer_forward.49
= control target key start
LH: loop header
LB: loop body
LE: loop exit
PB: predicated region body
PF: predicated region fallthrough
CT: control target
= control target key end

     0   :  { %s165_s0 = inlined_call_operand.vmem [shape: bf16[16,32], index: 0, kind: input, shape index: {}]   ;;  %s166_s1 = inlined_call_operand.vmem [shape: bf16[32,32], index: 1, kind: input, shape index: {}]   ;;  %s167_s2 = inlined_call_operand.vmem [shape: f32[1,32], index: 2, kind: input, shape index: {}]   ;;  %s168_s3 = inlined_call_operand.hbm [shape: f32[16,32], index: 3, kind: output, shape index: {}]  }
   0x1   :  { %v96_v0 = vld [vmem:[%s166_s1 + $0x8] sm:$0xff] }
   0x2   :  { %8 = vsyncpa [#allocation3], 0  ;;  %53 = vmatpush.bf16.msra.mxu0 %v96_v0  ;;  %v95_v1 = vld [vmem:[%s166_s1] sm:$0xff]  ;;  %vm43_vm0 = vcmask 261120   ;;  %s127_s20 = smov [#allocation2]   ;;  %s69_s1 = sshll.u32 %s168_s3, 4  ;;  %s70_s1 = int_to_ptr.hbm [resolvable:$true] %s69_s1 }
   0x3   :  { %v94_v2 = vld [vmem:[%s165_s0] sm:$0xff]  ;;  %s67_s21 = sshll.u32 %s127_s20, 4  ;;  %s128_s0 = smov 128   ;;  %s68_s21 = int_to_ptr.vmem [resolvable:$true] %s67_s21 }
   0x4   :  { %v100_v3 = vld [vmem:[%s167_s2] ss:$0 sm:$0xff]  ;;  %s129_s24 = smov 8  }
   0x6   :  { %54 = vmatpush.bf16.msra.mxu0 %v95_v1 }
   0x9   :  { %93 = vmatmul.msk.bf16.vlgmr.msra.gmra.mxu0 %vm43_vm0, %v94_v2 }
  0x86   :  { %v56_v4 = vpop.f32.mrf.mxu0 }
  0x87   :  { %v57_v5 = vadd.f32 %v100_v3, %v56_v4 }
  0x89   :  { %61 = vst.msk [vmem:[#allocation2] sm:$0xff] %vm43_vm0, %v57_v5 }
  0x8e   :  { %v58_v6 = vpop.f32.mrf.mxu0 }
  0x8f   :  { %v59_v7 = vadd.f32 %v100_v3, %v58_v6 }
  0x91   :  { %62 = vst.msk [vmem:[#allocation2 + $0x8] sm:$0xff] %vm43_vm0, %v59_v7 }
  0x92   :  { %75 = dma.vmem_to_hbm [thread:$0]  %s68_s21, 256, %s70_s1, [#allocation3], %s128_s0, %s128_s0, %s129_s24  }
  0x93   :  { %125 = dma.done.wait [#allocation3], 256  }
  0x94   :  { %126 = vsyncadd [#allocation3], 4294967040 }
  0x95   :  { %80 = vsyncpa [#allocation3], 1 }

</bundles_post_ra>
